<compile_context>
chip_gen: v7x
topology: tpu7x:2x2x1
jax: 0.10.0
libtpu: 0.0.40
codegen_flags: <defaults>
</compile_context>

<pallas_src>
import numpy as np
import jax
import jax.numpy as jnp
from jax import lax
from jax.experimental import pallas as pl
from jax.experimental.pallas import tpu as pltpu

# ---- model hyper-parameters (module defaults) ----
ATTR_FIXED = 4
ATTR_DESIGN = 5
STATE_DIM = 21                      # must be >= ZN*3
MSG = 128                           # msg_dim (module default)
P_STEP = 4                          # module default
ZN = 6                              # z_num
ZD = 16                             # z_dim == vector_dim
D_H = ATTR_FIXED + ATTR_DESIGN + STATE_DIM - ZN * 3   # scalar node-feature width
F_DIM = 3 * ZD                      # flattened vector-feature width (48)
S_TOT = MSG + F_DIM                 # packed node state width: [ s (128) | f (48) ]
EDGE_TILE = 8                       # edges per grid step (raise to 256-1024 for big graphs)


# ----------------------------------------------------------------------------
# in-kernel helpers
# ----------------------------------------------------------------------------
def _silu(x):
    # exp on the EUP, approx reciprocal also on the EUP -> frees VPU slots
    return x * pl.reciprocal(1.0 + jnp.exp(-x), approx=True)


def _bdot(a, b):
    # bf16 MXU operands, f32 accumulation
    return jnp.dot(a.astype(jnp.bfloat16), b.astype(jnp.bfloat16),
                   preferred_element_type=jnp.float32)


# ----------------------------------------------------------------------------
# Pallas kernel: all P_STEP message-passing steps, edge-tiled
# ----------------------------------------------------------------------------
def sgnn_mp_kernel(
    # scalar prefetch (SMEM)
    ei_ref,                                   # [2, E] int32 edge_index
    # data
    state_in_ref,                             # [N, S_TOT] initial [s | f]
    edge_f_ref,                               # [ET, 3*ZN] edge vector attrs (tile)
    edge_s_ref,                               # [ET, 1]    edge scalar attrs (tile)
    inv_deg_ref,                              # [N, 1]     1/deg for scatter-mean
    # edge_s MLP (input concat folded into split W1)
    esW1a, esW1b, esw1c, esb1, esW2, esb2, esW3, esb3,
    # edge_mlp (gate)
    emW1, emb1, emW2, emb2, emW3, emb3,
    # edge_f linear, block-diag fused over the 3 spatial dims
    efWa3, efWb3, efWc3,
    # s_mlp (input concat folded into split W1)
    smW1a, smW1b, smW1c, smb1, smW2, smb2, smW3, smb3,
    # sf_mlp (input concat folded into split W1)
    sfW1a, sfW1b, sfW1c, sfb1, sfW2, sfb2, sfW3, sfb3,
    # f_mlp linear, block-diag fused
    fmWa3, fmWb3,
    # constant 0/1 selection matrices for the f^T f invariants
    Rsel, Tsel,
    # output: packed node state [N, S_TOT], resident across the whole grid
    state_ref,
    # scratch
    g0_ref, g1_ref, msg_ref,                  # [ET, S_TOT]
    agg_ref,                                  # [N, S_TOT]
):
    step = pl.program_id(0)
    kt = pl.program_id(1)
    n_kt = pl.num_programs(1)
    ET = g0_ref.shape[0]

    # initialise the resident node state once
    @pl.when(jnp.logical_and(step == 0, kt == 0))
    def _init_state():
        state_ref[...] = state_in_ref[...]

    # fresh scatter accumulator at the start of every message-passing step
    @pl.when(kt == 0)
    def _zero_agg():
        agg_ref[...] = jnp.zeros_like(agg_ref)

    # ---- indexed gather of node state rows for this edge tile -----------------
    def gather_body(e, carry):
        eg = kt * ET + e
        i0 = ei_ref[0, eg]
        i1 = ei_ref[1, eg]
        g0_ref[pl.ds(e, 1), :] = state_ref[pl.ds(i0, 1), :]
        g1_ref[pl.ds(e, 1), :] = state_ref[pl.ds(i1, 1), :]
        return carry

    lax.fori_loop(0, ET, gather_body, 0)

    g0 = g0_ref[...]                          # [ET, S_TOT]
    g1 = g1_ref[...]
    s_e0, f_e0 = g0[:, :MSG], g0[:, MSG:]
    s_e1, f_e1 = g1[:, :MSG], g1[:, MSG:]
    es = edge_s_ref[...]                      # [ET, 1]
    ef = edge_f_ref[...]                      # [ET, 3*ZN]

    # ---- edge scalar message MLP (cat(s0, s1, es) folded into split W1) -------
    h = _silu(_bdot(s_e0, esW1a[...]) + _bdot(s_e1, esW1b[...])
              + es * esw1c[...] + esb1[...])
    h = _silu(_bdot(h, esW2[...]) + esb2[...])
    s_msg = _bdot(h, esW3[...]) + esb3[...]                    # [ET, MSG]

    # ---- gate = edge_mlp(_s) ---------------------------------------------------
    gh = _silu(_bdot(s_msg, emW1[...]) + emb1[...])
    gh = _silu(_bdot(gh, emW2[...]) + emb2[...])
    gate = _bdot(gh, emW3[...]) + emb3[...]                    # [ET, ZD]
    gate3 = jnp.concatenate([gate, gate, gate], axis=-1)       # [ET, 3*ZD]

    # ---- edge_f linear, fused across the 3 spatial dims (block-diag weights) ---
    f_msg = (_bdot(f_e0, efWa3[...]) + _bdot(f_e1, efWb3[...])
             + _bdot(ef, efWc3[...]))                          # [ET, 3*ZD]
    f_msg = gate3 * f_msg

    msg_ref[:, :MSG] = s_msg
    msg_ref[:, MSG:] = f_msg

    # ---- scatter-add messages to source nodes (edge_index[0]) -----------------
    def scatter_body(e, carry):
        eg = kt * ET + e
        d = ei_ref[0, eg]
        agg_ref[pl.ds(d, 1), :] = agg_ref[pl.ds(d, 1), :] + msg_ref[pl.ds(e, 1), :]
        return carry

    lax.fori_loop(0, ET, scatter_body, 0)

    # ---- node update after the last edge tile of this step --------------------
    @pl.when(kt == n_kt - 1)
    def _node_update():
        state = state_ref[...]
        s, f = state[:, :MSG], state[:, MSG:]
        agg = agg_ref[...] * inv_deg_ref[...]                  # scatter-mean (f32)
        s_c, f_c = agg[:, :MSG], agg[:, MSG:]

        # f^T f invariants -> flattened [N, ZD*ZD] via selection matmuls (MXU)
        A = _bdot(f, Rsel[...])                                # [N, 3*ZD*ZD]
        B = _bdot(f, Tsel[...])
        P = A * B
        ZZ = ZD * ZD
        f2s = P[:, :ZZ] + P[:, ZZ:2 * ZZ] + P[:, 2 * ZZ:]      # [N, ZD*ZD]

        # s_mlp (cat(s, s_c, f2s) folded into split W1)
        h1 = _silu(_bdot(s, smW1a[...]) + _bdot(s_c, smW1b[...])
                   + _bdot(f2s, smW1c[...]) + smb1[...])
        h1 = _silu(_bdot(h1, smW2[...]) + smb2[...])
        s_new = _bdot(h1, smW3[...]) + smb3[...]               # [N, MSG]

        # sf_mlp
        h2 = _silu(_bdot(s, sfW1a[...]) + _bdot(s_c, sfW1b[...])
                   + _bdot(f2s, sfW1c[...]) + sfb1[...])
        h2 = _silu(_bdot(h2, sfW2[...]) + sfb2[...])
        sf = _bdot(h2, sfW3[...]) + sfb3[...]                  # [N, ZD]
        sf3 = jnp.concatenate([sf, sf, sf], axis=-1)           # [N, 3*ZD]

        # f_mlp linear on cat(f, f_c), fused with block-diag weights, then gated
        f_new = sf3 * (_bdot(f, fmWa3[...]) + _bdot(f_c, fmWb3[...]))

        state_ref[:, :MSG] = s_new
        state_ref[:, MSG:] = f_new


# ----------------------------------------------------------------------------
# pallas_call wrapper
# ----------------------------------------------------------------------------
def mp_forward(state0, edge_index, edge_f, edge_s, inv_deg, mp_params):
    n = state0.shape[0]
    e = edge_index.shape[1]
    et = EDGE_TILE if (e % EDGE_TILE == 0) else e
    n_tiles = e // et

    def cmap(st, k, ei):      # constant blocks: fetched once, resident in VMEM
        return (0, 0)

    def emap(st, k, ei):      # edge-tiled blocks: pipelined along the kt axis
        return (k, 0)

    in_specs = ([
        pl.BlockSpec((n, S_TOT), cmap),        # state0
        pl.BlockSpec((et, 3 * ZN), emap),      # edge_f tile
        pl.BlockSpec((et, 1), emap),           # edge_s tile
        pl.BlockSpec((n, 1), cmap),            # inv_deg
    ] + [pl.BlockSpec(w.shape, cmap) for w in mp_params])

    grid_spec = pltpu.PrefetchScalarGridSpec(
        num_scalar_prefetch=1,                 # edge_index -> SMEM
        grid=(P_STEP, n_tiles),
        in_specs=in_specs,
        out_specs=pl.BlockSpec((n, S_TOT), cmap),
        scratch_shapes=[pltpu.VMEM((et, S_TOT), jnp.float32)] * 3
                       + [pltpu.VMEM((n, S_TOT), jnp.float32)],
    )

    return pl.pallas_call(
        sgnn_mp_kernel,
        grid_spec=grid_spec,
        out_shape=jax.ShapeDtypeStruct((n, S_TOT), jnp.float32),
        compiler_params=pltpu.CompilerParams(
            dimension_semantics=("arbitrary", "arbitrary"),
            vmem_limit_bytes=32 * 1024 * 1024,
        ),
    )(edge_index, state0, edge_f, edge_s, inv_deg, *mp_params)


def prepare_mp_params(p):
    """Split / fuse the raw parameters into the kernel's argument layout."""
    esW1, smW1, sfW1 = p["esw1"], p["smw1"], p["sfw1"]
    I3 = jnp.eye(3, dtype=jnp.float32)

    # 0/1 selection matrices: (f @ Rsel) * (f @ Tsel) summed over the 3 spatial
    # blocks gives the flattened f^T f Gram matrix.
    R = np.zeros((3 * ZD, 3 * ZD * ZD), np.float32)
    T = np.zeros((3 * ZD, 3 * ZD * ZD), np.float32)
    for j in range(3):
        for i in range(ZD):
            for k in range(ZD):
                R[j * ZD + i, j * ZD * ZD + i * ZD + k] = 1.0
                T[j * ZD + k, j * ZD * ZD + i * ZD + k] = 1.0

    return (
        # edge_s MLP
        esW1[:MSG], esW1[MSG:2 * MSG], esW1[2 * MSG:], p["esb1"],
        p["esw2"], p["esb2"], p["esw3"], p["esb3"],
        # edge_mlp (gate)
        p["emw1"], p["emb1"], p["emw2"], p["emb2"], p["emw3"], p["emb3"],
        # edge_f linear (block-diag fused over j)
        jnp.kron(I3, p["efw"][:ZD]), jnp.kron(I3, p["efw"][ZD:2 * ZD]),
        jnp.kron(I3, p["efw"][2 * ZD:]),
        # s_mlp
        smW1[:MSG], smW1[MSG:2 * MSG], smW1[2 * MSG:], p["smb1"],
        p["smw2"], p["smb2"], p["smw3"], p["smb3"],
        # sf_mlp
        sfW1[:MSG], sfW1[MSG:2 * MSG], sfW1[2 * MSG:], p["sfb1"],
        p["sfw2"], p["sfb2"], p["sfw3"], p["sfb3"],
        # f_mlp linear (block-diag fused over j)
        jnp.kron(I3, p["fmw"][:ZD]), jnp.kron(I3, p["fmw"][ZD:]),
        # f^T f selection constants
        jnp.asarray(R), jnp.asarray(T),
    )


# ----------------------------------------------------------------------------
# Plain-JAX glue (embeddings, basis construction, bookkeeping)
# ----------------------------------------------------------------------------
def construct_3d_basis_from_1_vectors(v1):
    v1 = v1 * jnp.array([1.0, 1.0, 0.0], dtype=v1.dtype)
    u1 = v1 / (jnp.linalg.norm(v1, axis=-1, keepdims=True) + 1e-6)
    zeros = jnp.zeros_like(u1[..., 0])
    u2 = jnp.stack([-u1[..., 1], u1[..., 0], zeros], axis=-1)
    u3 = jnp.broadcast_to(jnp.array([0.0, 0.0, 1.0], dtype=v1.dtype), u1.shape)
    return jnp.stack([u1, u2, u3], axis=-1)          # [N, 3, 3]


def sgnn_forward(params, x, edge_index, num_nodes_cum):
    n = x.shape[0]
    h_a = x[:, :ATTR_FIXED]
    z_flat = x[:, ATTR_FIXED:ATTR_FIXED + ZN * 3]
    h_rest = x[:, ATTR_FIXED + ZN * 3:]
    h = jnp.concatenate([h_a, h_rest], axis=-1)                   # [N, D_H]

    Z = z_flat.reshape(n, ZN, 3).transpose(0, 2, 1)               # [N, 3, ZN]
    f_p = Z[..., 0]                                               # [N, 3]
    Z0, h0 = Z, h

    ei0, ei1 = edge_index[0], edge_index[1]
    e = ei0.shape[0]
    edge_f = (Z[ei1] - Z[ei0]).reshape(e, 3 * ZN)                 # [E, 3*ZN]
    edge_s = jnp.linalg.norm(f_p[ei1] - f_p[ei0], axis=-1, keepdims=True)  # [E, 1]

    # embeddings (tiny linears -> plain JAX glue)
    s = jnp.dot(h, params["emb_in_w"]) + params["emb_in_b"]       # [N, MSG]
    f = jnp.dot(Z, params["emb_z_w"]).reshape(n, 3 * ZD)          # [N, 3*ZD]
    state0 = jnp.concatenate([s, f], axis=-1).astype(jnp.float32) # [N, S_TOT]

    # scatter-mean normalisation (torch_scatter 'mean' over edge_index[0], dim_size=N)
    deg = jnp.zeros((n,), jnp.float32).at[ei0].add(1.0)
    inv_deg = (1.0 / jnp.maximum(deg, 1.0)).reshape(n, 1)

    mp_params = prepare_mp_params(params)
    state = mp_forward(state0, edge_index.astype(jnp.int32),
                       edge_f.astype(jnp.float32), edge_s.astype(jnp.float32),
                       inv_deg, mp_params)                        # [N, S_TOT]

    f_fin = state[:, MSG:]                                        # [N, 3*ZD]
    Zf = f_fin.reshape(n, 3, ZD)
    u = jnp.dot(Zf, params["emb_u_w"])[..., 0]                    # [N, 3]
    mat = construct_3d_basis_from_1_vectors(u)                    # [N, 3, 3]

    # root node per graph (static python bookkeeping)
    root = []
    start = 0
    for end in num_nodes_cum:
        root.extend([start] * (end - start))
        start = end
    root = jnp.array(root, dtype=jnp.int32)

    mat_r = mat[root]                                             # [N, 3, 3]
    f_p_out = jnp.einsum("bji,bjk->bik", mat_r, Z0)               # mat^T @ Z0 -> [N, 3, ZN]
    f_p_out = f_p_out.transpose(0, 2, 1).reshape(n, ZN * 3)       # [N, 18]
    return jnp.concatenate([f_p_out, h0], axis=-1)                # [N, 18 + D_H]


# ----------------------------------------------------------------------------
# deterministic parameter init
# ----------------------------------------------------------------------------
def init_params(key):
    keys = iter(jax.random.split(key, 64))

    def lin(shape, scale=0.1):
        return (scale * jax.random.normal(next(keys), shape)).astype(jnp.float32)

    p = {}
    p["emb_in_w"] = lin((D_H, MSG))
    p["emb_in_b"] = lin((MSG,))
    p["emb_z_w"] = lin((ZN, ZD))
    p["emb_u_w"] = lin((ZD, 1))

    def mlp(prefix, din, dh, dout):
        p[prefix + "w1"] = lin((din, dh))
        p[prefix + "b1"] = lin((1, dh))
        p[prefix + "w2"] = lin((dh, dh))
        p[prefix + "b2"] = lin((1, dh))
        p[prefix + "w3"] = lin((dh, dout))
        p[prefix + "b3"] = lin((1, dout))

    mlp("es", 2 * MSG + 1, MSG, MSG)        # edge_s MLP
    mlp("sm", 2 * MSG + ZD * ZD, MSG, MSG)  # s_mlp
    mlp("em", MSG, MSG, ZD)                 # edge_mlp (gate)
    mlp("sf", 2 * MSG + ZD * ZD, MSG, ZD)   # sf_mlp
    p["efw"] = lin((2 * ZD + ZN, ZD))       # edge_f linear (no bias)
    p["fmw"] = lin((2 * ZD, ZD))            # f_mlp linear (no bias)
    return p


if __name__ == "__main__":
    key = jax.random.PRNGKey(0)
    k_param, k_x = jax.random.split(key)
    params = init_params(k_param)

    # two graphs of 4 nodes each
    n_nodes = 8
    num_nodes_cum = [4, 8]
    x = jax.random.normal(k_x, (n_nodes, ATTR_FIXED + ATTR_DESIGN + STATE_DIM),
                          dtype=jnp.float32)

    # ring edges (both directions) inside each graph -> E = 16 (2 edge tiles of 8)
    src, dst = [], []
    for base in (0, 4):
        for i in range(4):
            a, b = base + i, base + (i + 1) % 4
            src += [a, b]
            dst += [b, a]
    edge_index = jnp.array([src, dst], dtype=jnp.int32)

    # TODO(synk): embedding_out is defined in the reference module but unused in forward.
    out = sgnn_forward(params, x, edge_index, num_nodes_cum)
    out = jax.block_until_ready(out)
    assert out.shape == (n_nodes, ZN * 3 + D_H)
    assert bool(jnp.all(jnp.isfinite(out)))
    print("KERNEL_OK")
</pallas_src>

<mosaic_0001>
module attributes {stable_mosaic.version = 11 : i64} {
  func.func @sgnn_mp_kernel(%arg0: i32, %arg1: i32, %arg2: memref<2x16xi32, #tpu.memory_space<smem>>, %arg3: memref<8x176xf32, #tpu.memory_space<vmem>>, %arg4: memref<8x18xf32, #tpu.memory_space<vmem>>, %arg5: memref<8x1xf32, #tpu.memory_space<vmem>>, %arg6: memref<8x1xf32, #tpu.memory_space<vmem>>, %arg7: memref<128x128xf32, #tpu.memory_space<vmem>>, %arg8: memref<128x128xf32, #tpu.memory_space<vmem>>, %arg9: memref<1x128xf32, #tpu.memory_space<vmem>>, %arg10: memref<1x128xf32, #tpu.memory_space<vmem>>, %arg11: memref<128x128xf32, #tpu.memory_space<vmem>>, %arg12: memref<1x128xf32, #tpu.memory_space<vmem>>, %arg13: memref<128x128xf32, #tpu.memory_space<vmem>>, %arg14: memref<1x128xf32, #tpu.memory_space<vmem>>, %arg15: memref<128x128xf32, #tpu.memory_space<vmem>>, %arg16: memref<1x128xf32, #tpu.memory_space<vmem>>, %arg17: memref<128x128xf32, #tpu.memory_space<vmem>>, %arg18: memref<1x128xf32, #tpu.memory_space<vmem>>, %arg19: memref<128x16xf32, #tpu.memory_space<vmem>>, %arg20: memref<1x16xf32, #tpu.memory_space<vmem>>, %arg21: memref<48x48xf32, #tpu.memory_space<vmem>>, %arg22: memref<48x48xf32, #tpu.memory_space<vmem>>, %arg23: memref<18x48xf32, #tpu.memory_space<vmem>>, %arg24: memref<128x128xf32, #tpu.memory_space<vmem>>, %arg25: memref<128x128xf32, #tpu.memory_space<vmem>>, %arg26: memref<256x128xf32, #tpu.memory_space<vmem>>, %arg27: memref<1x128xf32, #tpu.memory_space<vmem>>, %arg28: memref<128x128xf32, #tpu.memory_space<vmem>>, %arg29: memref<1x128xf32, #tpu.memory_space<vmem>>, %arg30: memref<128x128xf32, #tpu.memory_space<vmem>>, %arg31: memref<1x128xf32, #tpu.memory_space<vmem>>, %arg32: memref<128x128xf32, #tpu.memory_space<vmem>>, %arg33: memref<128x128xf32, #tpu.memory_space<vmem>>, %arg34: memref<256x128xf32, #tpu.memory_space<vmem>>, %arg35: memref<1x128xf32, #tpu.memory_space<vmem>>, %arg36: memref<128x128xf32, #tpu.memory_space<vmem>>, %arg37: memref<1x128xf32, #tpu.memory_space<vmem>>, %arg38: memref<128x16xf32, #tpu.memory_space<vmem>>, %arg39: memref<1x16xf32, #tpu.memory_space<vmem>>, %arg40: memref<48x48xf32, #tpu.memory_space<vmem>>, %arg41: memref<48x48xf32, #tpu.memory_space<vmem>>, %arg42: memref<48x768xf32, #tpu.memory_space<vmem>>, %arg43: memref<48x768xf32, #tpu.memory_space<vmem>>, %arg44: memref<8x176xf32, #tpu.memory_space<vmem>>, %arg45: memref<8x176xf32, #tpu.memory_space<vmem>>, %arg46: memref<8x176xf32, #tpu.memory_space<vmem>>, %arg47: memref<8x176xf32, #tpu.memory_space<vmem>>, %arg48: memref<8x176xf32, #tpu.memory_space<vmem>>) attributes {dimension_semantics = [#tpu.dimension_semantics<arbitrary>, #tpu.dimension_semantics<arbitrary>], iteration_bounds = array<i64: 4, 2>, scalar_prefetch = 1 : i64, scratch_operands = 4 : i64, tpu.core_type = #tpu.core_type<tc>, window_params = [{pipeline_mode = #tpu.pipeline_mode<synchronous>, transform_indices = @transform_0, window_bounds = array<i64: 8, 176>}, {transform_indices = @transform_1, window_bounds = array<i64: 8, 18>}, {transform_indices = @transform_2, window_bounds = array<i64: 8, 1>}, {pipeline_mode = #tpu.pipeline_mode<synchronous>, transform_indices = @transform_3, window_bounds = array<i64: 8, 1>}, {pipeline_mode = #tpu.pipeline_mode<synchronous>, transform_indices = @transform_4, window_bounds = array<i64: 128, 128>}, {pipeline_mode = #tpu.pipeline_mode<synchronous>, transform_indices = @transform_5, window_bounds = array<i64: 128, 128>}, {pipeline_mode = #tpu.pipeline_mode<synchronous>, transform_indices = @transform_6, window_bounds = array<i64: 1, 128>}, {pipeline_mode = #tpu.pipeline_mode<synchronous>, transform_indices = @transform_7, window_bounds = array<i64: 1, 128>}, {pipeline_mode = #tpu.pipeline_mode<synchronous>, transform_indices = @transform_8, window_bounds = array<i64: 128, 128>}, {pipeline_mode = #tpu.pipeline_mode<synchronous>, transform_indices = @transform_9, window_bounds = array<i64: 1, 128>}, {pipeline_mode = #tpu.pipeline_mode<synchronous>, transform_indices = @transform_10, window_bounds = array<i64: 128, 128>}, {pipeline_mode = #tpu.pipeline_mode<synchronous>, transform_indices = @transform_11, window_bounds = array<i64: 1, 128>}, {pipeline_mode = #tpu.pipeline_mode<synchronous>, transform_indices = @transform_12, window_bounds = array<i64: 128, 128>}, {pipeline_mode = #tpu.pipeline_mode<synchronous>, transform_indices = @transform_13, window_bounds = array<i64: 1, 128>}, {pipeline_mode = #tpu.pipeline_mode<synchronous>, transform_indices = @transform_14, window_bounds = array<i64: 128, 128>}, {pipeline_mode = #tpu.pipeline_mode<synchronous>, transform_indices = @transform_15, window_bounds = array<i64: 1, 128>}, {pipeline_mode = #tpu.pipeline_mode<synchronous>, transform_indices = @transform_16, window_bounds = array<i64: 128, 16>}, {pipeline_mode = #tpu.pipeline_mode<synchronous>, transform_indices = @transform_17, window_bounds = array<i64: 1, 16>}, {pipeline_mode = #tpu.pipeline_mode<synchronous>, transform_indices = @transform_18, window_bounds = array<i64: 48, 48>}, {pipeline_mode = #tpu.pipeline_mode<synchronous>, transform_indices = @transform_19, window_bounds = array<i64: 48, 48>}, {pipeline_mode = #tpu.pipeline_mode<synchronous>, transform_indices = @transform_20, window_bounds = array<i64: 18, 48>}, {pipeline_mode = #tpu.pipeline_mode<synchronous>, transform_indices = @transform_21, window_bounds = array<i64: 128, 128>}, {pipeline_mode = #tpu.pipeline_mode<synchronous>, transform_indices = @transform_22, window_bounds = array<i64: 128, 128>}, {pipeline_mode = #tpu.pipeline_mode<synchronous>, transform_indices = @transform_23, window_bounds = array<i64: 256, 128>}, {pipeline_mode = #tpu.pipeline_mode<synchronous>, transform_indices = @transform_24, window_bounds = array<i64: 1, 128>}, {pipeline_mode = #tpu.pipeline_mode<synchronous>, transform_indices = @transform_25, window_bounds = array<i64: 128, 128>}, {pipeline_mode = #tpu.pipeline_mode<synchronous>, transform_indices = @transform_26, window_bounds = array<i64: 1, 128>}, {pipeline_mode = #tpu.pipeline_mode<synchronous>, transform_indices = @transform_27, window_bounds = array<i64: 128, 128>}, {pipeline_mode = #tpu.pipeline_mode<synchronous>, transform_indices = @transform_28, window_bounds = array<i64: 1, 128>}, {pipeline_mode = #tpu.pipeline_mode<synchronous>, transform_indices = @transform_29, window_bounds = array<i64: 128, 128>}, {pipeline_mode = #tpu.pipeline_mode<synchronous>, transform_indices = @transform_30, window_bounds = array<i64: 128, 128>}, {pipeline_mode = #tpu.pipeline_mode<synchronous>, transform_indices = @transform_31, window_bounds = array<i64: 256, 128>}, {pipeline_mode = #tpu.pipeline_mode<synchronous>, transform_indices = @transform_32, window_bounds = array<i64: 1, 128>}, {pipeline_mode = #tpu.pipeline_mode<synchronous>, transform_indices = @transform_33, window_bounds = array<i64: 128, 128>}, {pipeline_mode = #tpu.pipeline_mode<synchronous>, transform_indices = @transform_34, window_bounds = array<i64: 1, 128>}, {pipeline_mode = #tpu.pipeline_mode<synchronous>, transform_indices = @transform_35, window_bounds = array<i64: 128, 16>}, {pipeline_mode = #tpu.pipeline_mode<synchronous>, transform_indices = @transform_36, window_bounds = array<i64: 1, 16>}, {pipeline_mode = #tpu.pipeline_mode<synchronous>, transform_indices = @transform_37, window_bounds = array<i64: 48, 48>}, {pipeline_mode = #tpu.pipeline_mode<synchronous>, transform_indices = @transform_38, window_bounds = array<i64: 48, 48>}, {pipeline_mode = #tpu.pipeline_mode<synchronous>, transform_indices = @transform_39, window_bounds = array<i64: 48, 768>}, {pipeline_mode = #tpu.pipeline_mode<synchronous>, transform_indices = @transform_40, window_bounds = array<i64: 48, 768>}, {pipeline_mode = #tpu.pipeline_mode<synchronous>, transform_indices = @transform_41, window_bounds = array<i64: 8, 176>}]} {
    %c0_i32 = arith.constant 0 : i32
    %0 = arith.cmpi eq, %arg0, %c0_i32 : i32
    %c0_i32_0 = arith.constant 0 : i32
    %1 = arith.cmpi eq, %arg1, %c0_i32_0 : i32
    %2 = arith.andi %0, %1 : i1
    %3 = arith.extui %2 : i1 to i32
    %c0_i32_1 = arith.constant 0 : i32
    %4 = arith.cmpi ne, %3, %c0_i32_1 : i32
    scf.if %4 {
      %c0_73 = arith.constant 0 : index
      %c0_74 = arith.constant 0 : index
      %119 = vector.load %arg3[%c0_73, %c0_74] : memref<8x176xf32, #tpu.memory_space<vmem>>, vector<8x176xf32>
      %c0_75 = arith.constant 0 : index
      %c0_76 = arith.constant 0 : index
      %120 = vector.load %arg44[%c0_75, %c0_76] : memref<8x176xf32, #tpu.memory_space<vmem>>, vector<8x176xf32>
      tpu.vector_store %arg44[%c0_75, %c0_76], %119 {strides = array<i32>} : memref<8x176xf32, #tpu.memory_space<vmem>>, vector<8x176xf32>,
    } else {
    }
    %c0_i32_2 = arith.constant 0 : i32
    %5 = arith.cmpi eq, %arg1, %c0_i32_2 : i32
    %6 = arith.extui %5 : i1 to i32
    %c0_i32_3 = arith.constant 0 : i32
    %7 = arith.cmpi ne, %6, %c0_i32_3 : i32
    scf.if %7 {
      %cst_73 = arith.constant 0.000000e+00 : f32
      %119 = vector.broadcast %cst_73 : f32 to vector<8x176xf32>
      %c0_74 = arith.constant 0 : index
      %c0_75 = arith.constant 0 : index
      %120 = vector.load %arg48[%c0_74, %c0_75] : memref<8x176xf32, #tpu.memory_space<vmem>>, vector<8x176xf32>
      tpu.vector_store %arg48[%c0_74, %c0_75], %119 {strides = array<i32>} : memref<8x176xf32, #tpu.memory_space<vmem>>, vector<8x176xf32>,
    } else {
    }
    %c0_i32_4 = arith.constant 0 : i32
    %c8_i32 = arith.constant 8 : i32
    %8 = arith.addi %c0_i32_4, %c8_i32 : i32
    %c1_i32 = arith.constant 1 : i32
    scf.for %arg49 = %c0_i32_4 to %8 step %c1_i32  : i32 {
      %c8_i32_73 = arith.constant 8 : i32
      %119 = arith.muli %arg1, %c8_i32_73 : i32
      %120 = arith.addi %119, %arg49 : i32
      %c0_74 = arith.constant 0 : index
      %121 = arith.index_cast %120 : i32 to index
      %122 = memref.load %arg2[%c0_74, %121] : memref<2x16xi32, #tpu.memory_space<smem>>
      %c1 = arith.constant 1 : index
      %123 = arith.index_cast %120 : i32 to index
      %124 = memref.load %arg2[%c1, %123] : memref<2x16xi32, #tpu.memory_space<smem>>
      %125 = arith.index_cast %122 : i32 to index
      %c0_75 = arith.constant 0 : index
      %126 = vector.load %arg44[%125, %c0_75] : memref<8x176xf32, #tpu.memory_space<vmem>>, vector<1x176xf32>
      %127 = arith.index_cast %arg49 : i32 to index
      %c0_76 = arith.constant 0 : index
      %128 = vector.load %arg45[%127, %c0_76] : memref<8x176xf32, #tpu.memory_space<vmem>>, vector<1x176xf32>
      tpu.vector_store %arg45[%127, %c0_76], %126 {strides = array<i32>} : memref<8x176xf32, #tpu.memory_space<vmem>>, vector<1x176xf32>,
      %129 = arith.index_cast %124 : i32 to index
      %c0_77 = arith.constant 0 : index
      %130 = vector.load %arg44[%129, %c0_77] : memref<8x176xf32, #tpu.memory_space<vmem>>, vector<1x176xf32>
      %131 = arith.index_cast %arg49 : i32 to index
      %c0_78 = arith.constant 0 : index
      %132 = vector.load %arg46[%131, %c0_78] : memref<8x176xf32, #tpu.memory_space<vmem>>, vector<1x176xf32>
      tpu.vector_store %arg46[%131, %c0_78], %130 {strides = array<i32>} : memref<8x176xf32, #tpu.memory_space<vmem>>, vector<1x176xf32>,
    }
    %c8_i32_5 = arith.constant 8 : i32
    %c0 = arith.constant 0 : index
    %c0_6 = arith.constant 0 : index
    %9 = vector.load %arg45[%c0, %c0_6] : memref<8x176xf32, #tpu.memory_space<vmem>>, vector<8x176xf32>
    %c0_7 = arith.constant 0 : index
    %c0_8 = arith.constant 0 : index
    %10 = vector.load %arg46[%c0_7, %c0_8] : memref<8x176xf32, #tpu.memory_space<vmem>>, vector<8x176xf32>
    %11 = vector.extract_strided_slice %9 {offsets = [0, 0], sizes = [8, 128], strides = [1, 1]} : vector<8x176xf32> to vector<8x128xf32>
    %12 = vector.extract_strided_slice %9 {offsets = [0, 128], sizes = [8, 48], strides = [1, 1]} : vector<8x176xf32> to vector<8x48xf32>
    %13 = vector.extract_strided_slice %10 {offsets = [0, 0], sizes = [8, 128], strides = [1, 1]} : vector<8x176xf32> to vector<8x128xf32>
    %14 = vector.extract_strided_slice %10 {offsets = [0, 128], sizes = [8, 48], strides = [1, 1]} : vector<8x176xf32> to vector<8x48xf32>
    %c0_9 = arith.constant 0 : index
    %c0_10 = arith.constant 0 : index
    %15 = vector.load %arg5[%c0_9, %c0_10] : memref<8x1xf32, #tpu.memory_space<vmem>>, vector<8x1xf32>
    %c0_11 = arith.constant 0 : index
    %c0_12 = arith.constant 0 : index
    %16 = vector.load %arg4[%c0_11, %c0_12] : memref<8x18xf32, #tpu.memory_space<vmem>>, vector<8x18xf32>
    %c0_13 = arith.constant 0 : index
    %c0_14 = arith.constant 0 : index
    %17 = vector.load %arg7[%c0_13, %c0_14] : memref<128x128xf32, #tpu.memory_space<vmem>>, vector<128x128xf32>
    %18 = arith.truncf %11 : vector<8x128xf32> to vector<8x128xbf16>
    %19 = arith.truncf %17 : vector<128x128xf32> to vector<128x128xbf16>
    %cst = arith.constant dense<0.000000e+00> : vector<8x128xf32>
    %20 = tpu.matmul %18, %19, %cst {dimension_numbers = #tpu.dot_dimension_numbers<[1], [0], [0], [1], [0, 0, 1, 1], [], []>} : vector<8x128xbf16>, vector<128x128xbf16>, vector<8x128xf32> -> vector<8x128xf32>
    %c0_15 = arith.constant 0 : index
    %c0_16 = arith.constant 0 : index
    %21 = vector.load %arg8[%c0_15, %c0_16] : memref<128x128xf32, #tpu.memory_space<vmem>>, vector<128x128xf32>
    %22 = arith.truncf %13 : vector<8x128xf32> to vector<8x128xbf16>
    %23 = arith.truncf %21 : vector<128x128xf32> to vector<128x128xbf16>
    %cst_17 = arith.constant dense<0.000000e+00> : vector<8x128xf32>
    %24 = tpu.matmul %22, %23, %cst_17 {dimension_numbers = #tpu.dot_dimension_numbers<[1], [0], [0], [1], [0, 0, 1, 1], [], []>} : vector<8x128xbf16>, vector<128x128xbf16>, vector<8x128xf32> -> vector<8x128xf32>
    %25 = arith.addf %20, %24 : vector<8x128xf32>
    %c0_18 = arith.constant 0 : index
    %c0_19 = arith.constant 0 : index
    %26 = vector.load %arg9[%c0_18, %c0_19] : memref<1x128xf32, #tpu.memory_space<vmem>>, vector<1x128xf32>
    %27 = vector.broadcast %15 : vector<8x1xf32> to vector<8x128xf32>
    %28 = vector.broadcast %26 : vector<1x128xf32> to vector<8x128xf32>
    %29 = arith.mulf %27, %28 : vector<8x128xf32>
    %30 = arith.addf %25, %29 : vector<8x128xf32>
    %c0_20 = arith.constant 0 : index
    %c0_21 = arith.constant 0 : index
    %31 = vector.load %arg10[%c0_20, %c0_21] : memref<1x128xf32, #tpu.memory_space<vmem>>, vector<1x128xf32>
    %32 = vector.broadcast %31 : vector<1x128xf32> to vector<8x128xf32>
    %33 = arith.addf %30, %32 : vector<8x128xf32>
    %cst_22 = arith.constant 0.000000e+00 : f32
    %34 = vector.broadcast %cst_22 : f32 to vector<8x128xf32>
    %35 = arith.subf %34, %33 : vector<8x128xf32>
    %36 = math.exp %35 : vector<8x128xf32>
    %cst_23 = arith.constant 1.000000e+00 : f32
    %37 = vector.broadcast %cst_23 : f32 to vector<8x128xf32>
    %38 = arith.addf %37, %36 : vector<8x128xf32>
    %39 = tpu.reciprocal %38 {approx = true} : vector<8x128xf32> -> vector<8x128xf32>
    %40 = arith.mulf %33, %39 : vector<8x128xf32>
    %c0_24 = arith.constant 0 : index
    %c0_25 = arith.constant 0 : index
    %41 = vector.load %arg11[%c0_24, %c0_25] : memref<128x128xf32, #tpu.memory_space<vmem>>, vector<128x128xf32>
    %42 = arith.truncf %40 : vector<8x128xf32> to vector<8x128xbf16>
    %43 = arith.truncf %41 : vector<128x128xf32> to vector<128x128xbf16>
    %cst_26 = arith.constant dense<0.000000e+00> : vector<8x128xf32>
    %44 = tpu.matmul %42, %43, %cst_26 {dimension_numbers = #tpu.dot_dimension_numbers<[1], [0], [0], [1], [0, 0, 1, 1], [], []>} : vector<8x128xbf16>, vector<128x128xbf16>, vector<8x128xf32> -> vector<8x128xf32>
    %c0_27 = arith.constant 0 : index
    %c0_28 = arith.constant 0 : index
    %45 = vector.load %arg12[%c0_27, %c0_28] : memref<1x128xf32, #tpu.memory_space<vmem>>, vector<1x128xf32>
    %46 = vector.broadcast %45 : vector<1x128xf32> to vector<8x128xf32>
    %47 = arith.addf %44, %46 : vector<8x128xf32>
    %cst_29 = arith.constant 0.000000e+00 : f32
    %48 = vector.broadcast %cst_29 : f32 to vector<8x128xf32>
    %49 = arith.subf %48, %47 : vector<8x128xf32>
    %50 = math.exp %49 : vector<8x128xf32>
    %cst_30 = arith.constant 1.000000e+00 : f32
    %51 = vector.broadcast %cst_30 : f32 to vector<8x128xf32>
    %52 = arith.addf %51, %50 : vector<8x128xf32>
    %53 = tpu.reciprocal %52 {approx = true} : vector<8x128xf32> -> vector<8x128xf32>
    %54 = arith.mulf %47, %53 : vector<8x128xf32>
    %c0_31 = arith.constant 0 : index
    %c0_32 = arith.constant 0 : index
    %55 = vector.load %arg13[%c0_31, %c0_32] : memref<128x128xf32, #tpu.memory_space<vmem>>, vector<128x128xf32>
    %56 = arith.truncf %54 : vector<8x128xf32> to vector<8x128xbf16>
    %57 = arith.truncf %55 : vector<128x128xf32> to vector<128x128xbf16>
    %cst_33 = arith.constant dense<0.000000e+00> : vector<8x128xf32>
    %58 = tpu.matmul %56, %57, %cst_33 {dimension_numbers = #tpu.dot_dimension_numbers<[1], [0], [0], [1], [0, 0, 1, 1], [], []>} : vector<8x128xbf16>, vector<128x128xbf16>, vector<8x128xf32> -> vector<8x128xf32>
    %c0_34 = arith.constant 0 : index
    %c0_35 = arith.constant 0 : index
    %59 = vector.load %arg14[%c0_34, %c0_35] : memref<1x128xf32, #tpu.memory_space<vmem>>, vector<1x128xf32>
    %60 = vector.broadcast %59 : vector<1x128xf32> to vector<8x128xf32>
    %61 = arith.addf %58, %60 : vector<8x128xf32>
    %c0_36 = arith.constant 0 : index
    %c0_37 = arith.constant 0 : index
    %62 = vector.load %arg15[%c0_36, %c0_37] : memref<128x128xf32, #tpu.memory_space<vmem>>, vector<128x128xf32>
    %63 = arith.truncf %61 : vector<8x128xf32> to vector<8x128xbf16>
    %64 = arith.truncf %62 : vector<128x128xf32> to vector<128x128xbf16>
    %cst_38 = arith.constant dense<0.000000e+00> : vector<8x128xf32>
    %65 = tpu.matmul %63, %64, %cst_38 {dimension_numbers = #tpu.dot_dimension_numbers<[1], [0], [0], [1], [0, 0, 1, 1], [], []>} : vector<8x128xbf16>, vector<128x128xbf16>, vector<8x128xf32> -> vector<8x128xf32>
    %c0_39 = arith.constant 0 : index
    %c0_40 = arith.constant 0 : index
    %66 = vector.load %arg16[%c0_39, %c0_40] : memref<1x128xf32, #tpu.memory_space<vmem>>, vector<1x128xf32>
    %67 = vector.broadcast %66 : vector<1x128xf32> to vector<8x128xf32>
    %68 = arith.addf %65, %67 : vector<8x128xf32>
    %cst_41 = arith.constant 0.000000e+00 : f32
    %69 = vector.broadcast %cst_41 : f32 to vector<8x128xf32>
    %70 = arith.subf %69, %68 : vector<8x128xf32>
    %71 = math.exp %70 : vector<8x128xf32>
    %cst_42 = arith.constant 1.000000e+00 : f32
    %72 = vector.broadcast %cst_42 : f32 to vector<8x128xf32>
    %73 = arith.addf %72, %71 : vector<8x128xf32>
    %74 = tpu.reciprocal %73 {approx = true} : vector<8x128xf32> -> vector<8x128xf32>
    %75 = arith.mulf %68, %74 : vector<8x128xf32>
    %c0_43 = arith.constant 0 : index
    %c0_44 = arith.constant 0 : index
    %76 = vector.load %arg17[%c0_43, %c0_44] : memref<128x128xf32, #tpu.memory_space<vmem>>, vector<128x128xf32>
    %77 = arith.truncf %75 : vector<8x128xf32> to vector<8x128xbf16>
    %78 = arith.truncf %76 : vector<128x128xf32> to vector<128x128xbf16>
    %cst_45 = arith.constant dense<0.000000e+00> : vector<8x128xf32>
    %79 = tpu.matmul %77, %78, %cst_45 {dimension_numbers = #tpu.dot_dimension_numbers<[1], [0], [0], [1], [0, 0, 1, 1], [], []>} : vector<8x128xbf16>, vector<128x128xbf16>, vector<8x128xf32> -> vector<8x128xf32>
    %c0_46 = arith.constant 0 : index
    %c0_47 = arith.constant 0 : index
    %80 = vector.load %arg18[%c0_46, %c0_47] : memref<1x128xf32, #tpu.memory_space<vmem>>, vector<1x128xf32>
    %81 = vector.broadcast %80 : vector<1x128xf32> to vector<8x128xf32>
    %82 = arith.addf %79, %81 : vector<8x128xf32>
    %cst_48 = arith.constant 0.000000e+00 : f32
    %83 = vector.broadcast %cst_48 : f32 to vector<8x128xf32>
    %84 = arith.subf %83, %82 : vector<8x128xf32>
    %85 = math.exp %84 : vector<8x128xf32>
    %cst_49 = arith.constant 1.000000e+00 : f32
    %86 = vector.broadcast %cst_49 : f32 to vector<8x128xf32>
    %87 = arith.addf %86, %85 : vector<8x128xf32>
    %88 = tpu.reciprocal %87 {approx = true} : vector<8x128xf32> -> vector<8x128xf32>
    %89 = arith.mulf %82, %88 : vector<8x128xf32>
    %c0_50 = arith.constant 0 : index
    %c0_51 = arith.constant 0 : index
    %90 = vector.load %arg19[%c0_50, %c0_51] : memref<128x16xf32, #tpu.memory_space<vmem>>, vector<128x16xf32>
    %91 = arith.truncf %89 : vector<8x128xf32> to vector<8x128xbf16>
    %92 = arith.truncf %90 : vector<128x16xf32> to vector<128x16xbf16>
    %cst_52 = arith.constant dense<0.000000e+00> : vector<8x16xf32>
    %93 = tpu.matmul %91, %92, %cst_52 {dimension_numbers = #tpu.dot_dimension_numbers<[1], [0], [0], [1], [0, 0, 1, 1], [], []>} : vector<8x128xbf16>, vector<128x16xbf16>, vector<8x16xf32> -> vector<8x16xf32>
    %c0_53 = arith.constant 0 : index
    %c0_54 = arith.constant 0 : index
    %94 = vector.load %arg20[%c0_53, %c0_54] : memref<1x16xf32, #tpu.memory_space<vmem>>, vector<1x16xf32>
    %95 = vector.broadcast %94 : vector<1x16xf32> to vector<8x16xf32>
    %96 = arith.addf %93, %95 : vector<8x16xf32>
    %97 = tpu.concatenate %96, %96, %96 in 1 : vector<8x16xf32>, vector<8x16xf32>, vector<8x16xf32> -> vector<8x48xf32>
    %c0_55 = arith.constant 0 : index
    %c0_56 = arith.constant 0 : index
    %98 = vector.load %arg21[%c0_55, %c0_56] : memref<48x48xf32, #tpu.memory_space<vmem>>, vector<48x48xf32>
    %99 = arith.truncf %12 : vector<8x48xf32> to vector<8x48xbf16>
    %100 = arith.truncf %98 : vector<48x48xf32> to vector<48x48xbf16>
    %cst_57 = arith.constant dense<0.000000e+00> : vector<8x48xf32>
    %101 = tpu.matmul %99, %100, %cst_57 {dimension_numbers = #tpu.dot_dimension_numbers<[1], [0], [0], [1], [0, 0, 1, 1], [], []>} : vector<8x48xbf16>, vector<48x48xbf16>, vector<8x48xf32> -> vector<8x48xf32>
    %c0_58 = arith.constant 0 : index
    %c0_59 = arith.constant 0 : index
    %102 = vector.load %arg22[%c0_58, %c0_59] : memref<48x48xf32, #tpu.memory_space<vmem>>, vector<48x48xf32>
    %103 = arith.truncf %14 : vector<8x48xf32> to vector<8x48xbf16>
    %104 = arith.truncf %102 : vector<48x48xf32> to vector<48x48xbf16>
    %cst_60 = arith.constant dense<0.000000e+00> : vector<8x48xf32>
    %105 = tpu.matmul %103, %104, %cst_60 {dimension_numbers = #tpu.dot_dimension_numbers<[1], [0], [0], [1], [0, 0, 1, 1], [], []>} : vector<8x48xbf16>, vector<48x48xbf16>, vector<8x48xf32> -> vector<8x48xf32>
    %106 = arith.addf %101, %105 : vector<8x48xf32>
    %c0_61 = arith.constant 0 : index
    %c0_62 = arith.constant 0 : index
    %107 = vector.load %arg23[%c0_61, %c0_62] : memref<18x48xf32, #tpu.memory_space<vmem>>, vector<18x48xf32>
    %108 = arith.truncf %16 : vector<8x18xf32> to vector<8x18xbf16>
    %109 = arith.truncf %107 : vector<18x48xf32> to vector<18x48xbf16>
    %cst_63 = arith.constant dense<0.000000e+00> : vector<8x48xf32>
    %110 = tpu.matmul %108, %109, %cst_63 {dimension_numbers = #tpu.dot_dimension_numbers<[1], [0], [0], [1], [0, 0, 1, 1], [], []>} : vector<8x18xbf16>, vector<18x48xbf16>, vector<8x48xf32> -> vector<8x48xf32>
    %111 = arith.addf %106, %110 : vector<8x48xf32>
    %112 = arith.mulf %97, %111 : vector<8x48xf32>
    %c0_64 = arith.constant 0 : index
    %c0_65 = arith.constant 0 : index
    %113 = vector.load %arg47[%c0_64, %c0_65] : memref<8x176xf32, #tpu.memory_space<vmem>>, vector<8x128xf32>
    tpu.vector_store %arg47[%c0_64, %c0_65], %61 {strides = array<i32>} : memref<8x176xf32, #tpu.memory_space<vmem>>, vector<8x128xf32>,
    %c0_66 = arith.constant 0 : index
    %c128 = arith.constant 128 : index
    %114 = vector.load %arg47[%c0_66, %c128] : memref<8x176xf32, #tpu.memory_space<vmem>>, vector<8x48xf32>
    tpu.vector_store %arg47[%c0_66, %c128], %112 {strides = array<i32>} : memref<8x176xf32, #tpu.memory_space<vmem>>, vector<8x48xf32>,
    %c0_i32_67 = arith.constant 0 : i32
    %c8_i32_68 = arith.constant 8 : i32
    %115 = arith.addi %c0_i32_67, %c8_i32_68 : i32
    %c1_i32_69 = arith.constant 1 : i32
    scf.for %arg49 = %c0_i32_67 to %115 step %c1_i32_69  : i32 {
      %c8_i32_73 = arith.constant 8 : i32
      %119 = arith.muli %arg1, %c8_i32_73 : i32
      %120 = arith.addi %119, %arg49 : i32
      %c0_74 = arith.constant 0 : index
      %121 = arith.index_cast %120 : i32 to index
      %122 = memref.load %arg2[%c0_74, %121] : memref<2x16xi32, #tpu.memory_space<smem>>
      %123 = arith.index_cast %122 : i32 to index
      %c0_75 = arith.constant 0 : index
      %124 = vector.load %arg48[%123, %c0_75] : memref<8x176xf32, #tpu.memory_space<vmem>>, vector<1x176xf32>
      %125 = arith.index_cast %arg49 : i32 to index
      %c0_76 = arith.constant 0 : index
      %126 = vector.load %arg47[%125, %c0_76] : memref<8x176xf32, #tpu.memory_space<vmem>>, vector<1x176xf32>
      %127 = arith.addf %124, %126 : vector<1x176xf32>
      %128 = arith.index_cast %122 : i32 to index
      %c0_77 = arith.constant 0 : index
      %129 = vector.load %arg48[%128, %c0_77] : memref<8x176xf32, #tpu.memory_space<vmem>>, vector<1x176xf32>
      tpu.vector_store %arg48[%128, %c0_77], %127 {strides = array<i32>} : memref<8x176xf32, #tpu.memory_space<vmem>>, vector<1x176xf32>,
    }
    %c8_i32_70 = arith.constant 8 : i32
    %c1_i32_71 = arith.constant 1 : i32
    %116 = arith.cmpi eq, %arg1, %c1_i32_71 : i32
    %117 = arith.extui %116 : i1 to i32
    %c0_i32_72 = arith.constant 0 : i32
    %118 = arith.cmpi ne, %117, %c0_i32_72 : i32
    scf.if %118 {
      %c0_73 = arith.constant 0 : index
      %c0_74 = arith.constant 0 : index
      %119 = vector.load %arg44[%c0_73, %c0_74] : memref<8x176xf32, #tpu.memory_space<vmem>>, vector<8x176xf32>
      %120 = vector.extract_strided_slice %119 {offsets = [0, 0], sizes = [8, 128], strides = [1, 1]} : vector<8x176xf32> to vector<8x128xf32>
      %121 = vector.extract_strided_slice %119 {offsets = [0, 128], sizes = [8, 48], strides = [1, 1]} : vector<8x176xf32> to vector<8x48xf32>
      %c0_75 = arith.constant 0 : index
      %c0_76 = arith.constant 0 : index
      %122 = vector.load %arg48[%c0_75, %c0_76] : memref<8x176xf32, #tpu.memory_space<vmem>>, vector<8x176xf32>
      %c0_77 = arith.constant 0 : index
      %c0_78 = arith.constant 0 : index
      %123 = vector.load %arg6[%c0_77, %c0_78] : memref<8x1xf32, #tpu.memory_space<vmem>>, vector<8x1xf32>
      %124 = vector.broadcast %123 : vector<8x1xf32> to vector<8x176xf32>
      %125 = arith.mulf %122, %124 : vector<8x176xf32>
      %126 = vector.extract_strided_slice %125 {offsets = [0, 0], sizes = [8, 128], strides = [1, 1]} : vector<8x176xf32> to vector<8x128xf32>
      %127 = vector.extract_strided_slice %125 {offsets = [0, 128], sizes = [8, 48], strides = [1, 1]} : vector<8x176xf32> to vector<8x48xf32>
      %c0_79 = arith.constant 0 : index
      %c0_80 = arith.constant 0 : index
      %128 = vector.load %arg42[%c0_79, %c0_80] : memref<48x768xf32, #tpu.memory_space<vmem>>, vector<48x768xf32>
      %129 = arith.truncf %121 : vector<8x48xf32> to vector<8x48xbf16>
      %130 = arith.truncf %128 : vector<48x768xf32> to vector<48x768xbf16>
      %cst_81 = arith.constant dense<0.000000e+00> : vector<8x768xf32>
      %131 = tpu.matmul %129, %130, %cst_81 {dimension_numbers = #tpu.dot_dimension_numbers<[1], [0], [0], [1], [0, 0, 1, 1], [], []>} : vector<8x48xbf16>, vector<48x768xbf16>, vector<8x768xf32> -> vector<8x768xf32>
      %c0_82 = arith.constant 0 : index
      %c0_83 = arith.constant 0 : index
      %132 = vector.load %arg43[%c0_82, %c0_83] : memref<48x768xf32, #tpu.memory_space<vmem>>, vector<48x768xf32>
      %133 = arith.truncf %121 : vector<8x48xf32> to vector<8x48xbf16>
      %134 = arith.truncf %132 : vector<48x768xf32> to vector<48x768xbf16>
      %cst_84 = arith.constant dense<0.000000e+00> : vector<8x768xf32>
      %135 = tpu.matmul %133, %134, %cst_84 {dimension_numbers = #tpu.dot_dimension_numbers<[1], [0], [0], [1], [0, 0, 1, 1], [], []>} : vector<8x48xbf16>, vector<48x768xbf16>, vector<8x768xf32> -> vector<8x768xf32>
      %136 = arith.mulf %131, %135 : vector<8x768xf32>
      %137 = vector.extract_strided_slice %136 {offsets = [0, 0], sizes = [8, 256], strides = [1, 1]} : vector<8x768xf32> to vector<8x256xf32>
      %138 = vector.extract_strided_slice %136 {offsets = [0, 256], sizes = [8, 256], strides = [1, 1]} : vector<8x768xf32> to vector<8x256xf32>
      %139 = arith.addf %137, %138 : vector<8x256xf32>
      %140 = vector.extract_strided_slice %136 {offsets = [0, 512], sizes = [8, 256], strides = [1, 1]} : vector<8x768xf32> to vector<8x256xf32>
      %141 = arith.addf %139, %140 : vector<8x256xf32>
      %c0_85 = arith.constant 0 : index
      %c0_86 = arith.constant 0 : index
      %142 = vector.load %arg24[%c0_85, %c0_86] : memref<128x128xf32, #tpu.memory_space<vmem>>, vector<128x128xf32>
      %143 = arith.truncf %120 : vector<8x128xf32> to vector<8x128xbf16>
      %144 = arith.truncf %142 : vector<128x128xf32> to vector<128x128xbf16>
      %cst_87 = arith.constant dense<0.000000e+00> : vector<8x128xf32>
      %145 = tpu.matmul %143, %144, %cst_87 {dimension_numbers = #tpu.dot_dimension_numbers<[1], [0], [0], [1], [0, 0, 1, 1], [], []>} : vector<8x128xbf16>, vector<128x128xbf16>, vector<8x128xf32> -> vector<8x128xf32>
      %c0_88 = arith.constant 0 : index
      %c0_89 = arith.constant 0 : index
      %146 = vector.load %arg25[%c0_88, %c0_89] : memref<128x128xf32, #tpu.memory_space<vmem>>, vector<128x128xf32>
      %147 = arith.truncf %126 : vector<8x128xf32> to vector<8x128xbf16>
      %148 = arith.truncf %146 : vector<128x128xf32> to vector<128x128xbf16>
      %cst_90 = arith.constant dense<0.000000e+00> : vector<8x128xf32>
      %149 = tpu.matmul %147, %148, %cst_90 {dimension_numbers = #tpu.dot_dimension_numbers<[1], [0], [0], [1], [0, 0, 1, 1], [], []>} : vector<8x128xbf16>, vector<128x128xbf16>, vector<8x128xf32> -> vector<8x128xf32>
      %150 = arith.addf %145, %149 : vector<8x128xf32>
      %c0_91 = arith.constant 0 : index
      %c0_92 = arith.constant 0 : index
      %151 = vector.load %arg26[%c0_91, %c0_92] : memref<256x128xf32, #tpu.memory_space<vmem>>, vector<256x128xf32>
      %152 = arith.truncf %141 : vector<8x256xf32> to vector<8x256xbf16>
      %153 = arith.truncf %151 : vector<256x128xf32> to vector<256x128xbf16>
      %cst_93 = arith.constant dense<0.000000e+00> : vector<8x128xf32>
      %154 = tpu.matmul %152, %153, %cst_93 {dimension_numbers = #tpu.dot_dimension_numbers<[1], [0], [0], [1], [0, 0, 1, 1], [], []>} : vector<8x256xbf16>, vector<256x128xbf16>, vector<8x128xf32> -> vector<8x128xf32>
      %155 = arith.addf %150, %154 : vector<8x128xf32>
      %c0_94 = arith.constant 0 : index
      %c0_95 = arith.constant 0 : index
      %156 = vector.load %arg27[%c0_94, %c0_95] : memref<1x128xf32, #tpu.memory_space<vmem>>, vector<1x128xf32>
      %157 = vector.broadcast %156 : vector<1x128xf32> to vector<8x128xf32>
      %158 = arith.addf %155, %157 : vector<8x128xf32>
      %cst_96 = arith.constant 0.000000e+00 : f32
      %159 = vector.broadcast %cst_96 : f32 to vector<8x128xf32>
      %160 = arith.subf %159, %158 : vector<8x128xf32>
      %161 = math.exp %160 : vector<8x128xf32>
      %cst_97 = arith.constant 1.000000e+00 : f32
      %162 = vector.broadcast %cst_97 : f32 to vector<8x128xf32>
      %163 = arith.addf %162, %161 : vector<8x128xf32>
      %164 = tpu.reciprocal %163 {approx = true} : vector<8x128xf32> -> vector<8x128xf32>
      %165 = arith.mulf %158, %164 : vector<8x128xf32>
      %c0_98 = arith.constant 0 : index
      %c0_99 = arith.constant 0 : index
      %166 = vector.load %arg28[%c0_98, %c0_99] : memref<128x128xf32, #tpu.memory_space<vmem>>, vector<128x128xf32>
      %167 = arith.truncf %165 : vector<8x128xf32> to vector<8x128xbf16>
      %168 = arith.truncf %166 : vector<128x128xf32> to vector<128x128xbf16>
      %cst_100 = arith.constant dense<0.000000e+00> : vector<8x128xf32>
      %169 = tpu.matmul %167, %168, %cst_100 {dimension_numbers = #tpu.dot_dimension_numbers<[1], [0], [0], [1], [0, 0, 1, 1], [], []>} : vector<8x128xbf16>, vector<128x128xbf16>, vector<8x128xf32> -> vector<8x128xf32>
      %c0_101 = arith.constant 0 : index
      %c0_102 = arith.constant 0 : index
      %170 = vector.load %arg29[%c0_101, %c0_102] : memref<1x128xf32, #tpu.memory_space<vmem>>, vector<1x128xf32>
      %171 = vector.broadcast %170 : vector<1x128xf32> to vector<8x128xf32>
      %172 = arith.addf %169, %171 : vector<8x128xf32>
      %cst_103 = arith.constant 0.000000e+00 : f32
      %173 = vector.broadcast %cst_103 : f32 to vector<8x128xf32>
      %174 = arith.subf %173, %172 : vector<8x128xf32>
      %175 = math.exp %174 : vector<8x128xf32>
      %cst_104 = arith.constant 1.000000e+00 : f32
      %176 = vector.broadcast %cst_104 : f32 to vector<8x128xf32>
      %177 = arith.addf %176, %175 : vector<8x128xf32>
      %178 = tpu.reciprocal %177 {approx = true} : vector<8x128xf32> -> vector<8x128xf32>
      %179 = arith.mulf %172, %178 : vector<8x128xf32>
      %c0_105 = arith.constant 0 : index
      %c0_106 = arith.constant 0 : index
      %180 = vector.load %arg30[%c0_105, %c0_106] : memref<128x128xf32, #tpu.memory_space<vmem>>, vector<128x128xf32>
      %181 = arith.truncf %179 : vector<8x128xf32> to vector<8x128xbf16>
      %182 = arith.truncf %180 : vector<128x128xf32> to vector<128x128xbf16>
      %cst_107 = arith.constant dense<0.000000e+00> : vector<8x128xf32>
      %183 = tpu.matmul %181, %182, %cst_107 {dimension_numbers = #tpu.dot_dimension_numbers<[1], [0], [0], [1], [0, 0, 1, 1], [], []>} : vector<8x128xbf16>, vector<128x128xbf16>, vector<8x128xf32> -> vector<8x128xf32>
      %c0_108 = arith.constant 0 : index
      %c0_109 = arith.constant 0 : index
      %184 = vector.load %arg31[%c0_108, %c0_109] : memref<1x128xf32, #tpu.memory_space<vmem>>, vector<1x128xf32>
      %185 = vector.broadcast %184 : vector<1x128xf32> to vector<8x128xf32>
      %186 = arith.addf %183, %185 : vector<8x128xf32>
      %c0_110 = arith.constant 0 : index
      %c0_111 = arith.constant 0 : index
      %187 = vector.load %arg32[%c0_110, %c0_111] : memref<128x128xf32, #tpu.memory_space<vmem>>, vector<128x128xf32>
      %188 = arith.truncf %120 : vector<8x128xf32> to vector<8x128xbf16>
      %189 = arith.truncf %187 : vector<128x128xf32> to vector<128x128xbf16>
      %cst_112 = arith.constant dense<0.000000e+00> : vector<8x128xf32>
      %190 = tpu.matmul %188, %189, %cst_112 {dimension_numbers = #tpu.dot_dimension_numbers<[1], [0], [0], [1], [0, 0, 1, 1], [], []>} : vector<8x128xbf16>, vector<128x128xbf16>, vector<8x128xf32> -> vector<8x128xf32>
      %c0_113 = arith.constant 0 : index
      %c0_114 = arith.constant 0 : index
      %191 = vector.load %arg33[%c0_113, %c0_114] : memref<128x128xf32, #tpu.memory_space<vmem>>, vector<128x128xf32>
      %192 = arith.truncf %126 : vector<8x128xf32> to vector<8x128xbf16>
      %193 = arith.truncf %191 : vector<128x128xf32> to vector<128x128xbf16>
      %cst_115 = arith.constant dense<0.000000e+00> : vector<8x128xf32>
      %194 = tpu.matmul %192, %193, %cst_115 {dimension_numbers = #tpu.dot_dimension_numbers<[1], [0], [0], [1], [0, 0, 1, 1], [], []>} : vector<8x128xbf16>, vector<128x128xbf16>, vector<8x128xf32> -> vector<8x128xf32>
      %195 = arith.addf %190, %194 : vector<8x128xf32>
      %c0_116 = arith.constant 0 : index
      %c0_117 = arith.constant 0 : index
      %196 = vector.load %arg34[%c0_116, %c0_117] : memref<256x128xf32, #tpu.memory_space<vmem>>, vector<256x128xf32>
      %197 = arith.truncf %141 : vector<8x256xf32> to vector<8x256xbf16>
      %198 = arith.truncf %196 : vector<256x128xf32> to vector<256x128xbf16>
      %cst_118 = arith.constant dense<0.000000e+00> : vector<8x128xf32>
      %199 = tpu.matmul %197, %198, %cst_118 {dimension_numbers = #tpu.dot_dimension_numbers<[1], [0], [0], [1], [0, 0, 1, 1], [], []>} : vector<8x256xbf16>, vector<256x128xbf16>, vector<8x128xf32> -> vector<8x128xf32>
      %200 = arith.addf %195, %199 : vector<8x128xf32>
      %c0_119 = arith.constant 0 : index
      %c0_120 = arith.constant 0 : index
      %201 = vector.load %arg35[%c0_119, %c0_120] : memref<1x128xf32, #tpu.memory_space<vmem>>, vector<1x128xf32>
      %202 = vector.broadcast %201 : vector<1x128xf32> to vector<8x128xf32>
      %203 = arith.addf %200, %202 : vector<8x128xf32>
      %cst_121 = arith.constant 0.000000e+00 : f32
      %204 = vector.broadcast %cst_121 : f32 to vector<8x128xf32>
      %205 = arith.subf %204, %203 : vector<8x128xf32>
      %206 = math.exp %205 : vector<8x128xf32>
      %cst_122 = arith.constant 1.000000e+00 : f32
      %207 = vector.broadcast %cst_122 : f32 to vector<8x128xf32>
      %208 = arith.addf %207, %206 : vector<8x128xf32>
      %209 = tpu.reciprocal %208 {approx = true} : vector<8x128xf32> -> vector<8x128xf32>
      %210 = arith.mulf %203, %209 : vector<8x128xf32>
      %c0_123 = arith.constant 0 : index
      %c0_124 = arith.constant 0 : index
      %211 = vector.load %arg36[%c0_123, %c0_124] : memref<128x128xf32, #tpu.memory_space<vmem>>, vector<128x128xf32>
      %212 = arith.truncf %210 : vector<8x128xf32> to vector<8x128xbf16>
      %213 = arith.truncf %211 : vector<128x128xf32> to vector<128x128xbf16>
      %cst_125 = arith.constant dense<0.000000e+00> : vector<8x128xf32>
      %214 = tpu.matmul %212, %213, %cst_125 {dimension_numbers = #tpu.dot_dimension_numbers<[1], [0], [0], [1], [0, 0, 1, 1], [], []>} : vector<8x128xbf16>, vector<128x128xbf16>, vector<8x128xf32> -> vector<8x128xf32>
      %c0_126 = arith.constant 0 : index
      %c0_127 = arith.constant 0 : index
      %215 = vector.load %arg37[%c0_126, %c0_127] : memref<1x128xf32, #tpu.memory_space<vmem>>, vector<1x128xf32>
      %216 = vector.broadcast %215 : vector<1x128xf32> to vector<8x128xf32>
      %217 = arith.addf %214, %216 : vector<8x128xf32>
      %cst_128 = arith.constant 0.000000e+00 : f32
      %218 = vector.broadcast %cst_128 : f32 to vector<8x128xf32>
      %219 = arith.subf %218, %217 : vector<8x128xf32>
      %220 = math.exp %219 : vector<8x128xf32>
      %cst_129 = arith.constant 1.000000e+00 : f32
      %221 = vector.broadcast %cst_129 : f32 to vector<8x128xf32>
      %222 = arith.addf %221, %220 : vector<8x128xf32>
      %223 = tpu.reciprocal %222 {approx = true} : vector<8x128xf32> -> vector<8x128xf32>
      %224 = arith.mulf %217, %223 : vector<8x128xf32>
      %c0_130 = arith.constant 0 : index
      %c0_131 = arith.constant 0 : index
      %225 = vector.load %arg38[%c0_130, %c0_131] : memref<128x16xf32, #tpu.memory_space<vmem>>, vector<128x16xf32>
      %226 = arith.truncf %224 : vector<8x128xf32> to vector<8x128xbf16>
      %227 = arith.truncf %225 : vector<128x16xf32> to vector<128x16xbf16>
      %cst_132 = arith.constant dense<0.000000e+00> : vector<8x16xf32>
      %228 = tpu.matmul %226, %227, %cst_132 {dimension_numbers = #tpu.dot_dimension_numbers<[1], [0], [0], [1], [0, 0, 1, 1], [], []>} : vector<8x128xbf16>, vector<128x16xbf16>, vector<8x16xf32> -> vector<8x16xf32>
      %c0_133 = arith.constant 0 : index
      %c0_134 = arith.constant 0 : index
      %229 = vector.load %arg39[%c0_133, %c0_134] : memref<1x16xf32, #tpu.memory_space<vmem>>, vector<1x16xf32>
      %230 = vector.broadcast %229 : vector<1x16xf32> to vector<8x16xf32>
      %231 = arith.addf %228, %230 : vector<8x16xf32>
      %232 = tpu.concatenate %231, %231, %231 in 1 : vector<8x16xf32>, vector<8x16xf32>, vector<8x16xf32> -> vector<8x48xf32>
      %c0_135 = arith.constant 0 : index
      %c0_136 = arith.constant 0 : index
      %233 = vector.load %arg40[%c0_135, %c0_136] : memref<48x48xf32, #tpu.memory_space<vmem>>, vector<48x48xf32>
      %234 = arith.truncf %121 : vector<8x48xf32> to vector<8x48xbf16>
      %235 = arith.truncf %233 : vector<48x48xf32> to vector<48x48xbf16>
      %cst_137 = arith.constant dense<0.000000e+00> : vector<8x48xf32>
      %236 = tpu.matmul %234, %235, %cst_137 {dimension_numbers = #tpu.dot_dimension_numbers<[1], [0], [0], [1], [0, 0, 1, 1], [], []>} : vector<8x48xbf16>, vector<48x48xbf16>, vector<8x48xf32> -> vector<8x48xf32>
      %c0_138 = arith.constant 0 : index
      %c0_139 = arith.constant 0 : index
      %237 = vector.load %arg41[%c0_138, %c0_139] : memref<48x48xf32, #tpu.memory_space<vmem>>, vector<48x48xf32>
      %238 = arith.truncf %127 : vector<8x48xf32> to vector<8x48xbf16>
      %239 = arith.truncf %237 : vector<48x48xf32> to vector<48x48xbf16>
      %cst_140 = arith.constant dense<0.000000e+00> : vector<8x48xf32>
      %240 = tpu.matmul %238, %239, %cst_140 {dimension_numbers = #tpu.dot_dimension_numbers<[1], [0], [0], [1], [0, 0, 1, 1], [], []>} : vector<8x48xbf16>, vector<48x48xbf16>, vector<8x48xf32> -> vector<8x48xf32>
      %241 = arith.addf %236, %240 : vector<8x48xf32>
      %242 = arith.mulf %232, %241 : vector<8x48xf32>
      %c0_141 = arith.constant 0 : index
      %c0_142 = arith.constant 0 : index
      %243 = vector.load %arg44[%c0_141, %c0_142] : memref<8x176xf32, #tpu.memory_space<vmem>>, vector<8x128xf32>
      tpu.vector_store %arg44[%c0_141, %c0_142], %186 {strides = array<i32>} : memref<8x176xf32, #tpu.memory_space<vmem>>, vector<8x128xf32>,
      %c0_143 = arith.constant 0 : index
      %c128_144 = arith.constant 128 : index
      %244 = vector.load %arg44[%c0_143, %c128_144] : memref<8x176xf32, #tpu.memory_space<vmem>>, vector<8x48xf32>
      tpu.vector_store %arg44[%c0_143, %c128_144], %242 {strides = array<i32>} : memref<8x176xf32, #tpu.memory_space<vmem>>, vector<8x48xf32>,
    } else {
    }
    return
  }
  func.func @transform_0(%arg0: i32, %arg1: i32, %arg2: memref<2x16xi32, #tpu.memory_space<smem>>) -> (i32, i32) {
    %c0_i32 = arith.constant 0 : i32
    %c0_i32_0 = arith.constant 0 : i32
    %c0_i32_1 = arith.constant 0 : i32
    return %c0_i32, %c0_i32_0 : i32, i32
  }
  func.func @transform_1(%arg0: i32, %arg1: i32, %arg2: memref<2x16xi32, #tpu.memory_space<smem>>) -> (i32, i32) {
    %c0_i32 = arith.constant 0 : i32
    %c0_i32_0 = arith.constant 0 : i32
    return %arg1, %c0_i32 : i32, i32
  }
  func.func @transform_2(%arg0: i32, %arg1: i32, %arg2: memref<2x16xi32, #tpu.memory_space<smem>>) -> (i32, i32) {
    %c0_i32 = arith.constant 0 : i32
    %c0_i32_0 = arith.constant 0 : i32
    return %arg1, %c0_i32 : i32, i32
  }
  func.func @transform_3(%arg0: i32, %arg1: i32, %arg2: memref<2x16xi32, #tpu.memory_space<smem>>) -> (i32, i32) {
    %c0_i32 = arith.constant 0 : i32
    %c0_i32_0 = arith.constant 0 : i32
    %c0_i32_1 = arith.constant 0 : i32
    return %c0_i32, %c0_i32_0 : i32, i32
  }
  func.func @transform_4(%arg0: i32, %arg1: i32, %arg2: memref<2x16xi32, #tpu.memory_space<smem>>) -> (i32, i32) {
    %c0_i32 = arith.constant 0 : i32
    %c0_i32_0 = arith.constant 0 : i32
    %c0_i32_1 = arith.constant 0 : i32
    return %c0_i32, %c0_i32_0 : i32, i32
  }
  func.func @transform_5(%arg0: i32, %arg1: i32, %arg2: memref<2x16xi32, #tpu.memory_space<smem>>) -> (i32, i32) {
    %c0_i32 = arith.constant 0 : i32
    %c0_i32_0 = arith.constant 0 : i32
    %c0_i32_1 = arith.constant 0 : i32
    return %c0_i32, %c0_i32_0 : i32, i32
  }
  func.func @transform_6(%arg0: i32, %arg1: i32, %arg2: memref<2x16xi32, #tpu.memory_space<smem>>) -> (i32, i32) {
    %c0_i32 = arith.constant 0 : i32
    %c0_i32_0 = arith.constant 0 : i32
    %c0_i32_1 = arith.constant 0 : i32
    return %c0_i32, %c0_i32_0 : i32, i32
  }
  func.func @transform_7(%arg0: i32, %arg1: i32, %arg2: memref<2x16xi32, #tpu.memory_space<smem>>) -> (i32, i32) {
    %c0_i32 = arith.constant 0 : i32
    %c0_i32_0 = arith.constant 0 : i32
    %c0_i32_1 = arith.constant 0 : i32
    return %c0_i32, %c0_i32_0 : i32, i32
  }
  func.func @transform_8(%arg0: i32, %arg1: i32, %arg2: memref<2x16xi32, #tpu.memory_space<smem>>) -> (i32, i32) {
    %c0_i32 = arith.constant 0 : i32
    %c0_i32_0 = arith.constant 0 : i32
    %c0_i32_1 = arith.constant 0 : i32
    return %c0_i32, %c0_i32_0 : i32, i32
  }
  func.func @transform_9(%arg0: i32, %arg1: i32, %arg2: memref<2x16xi32, #tpu.memory_space<smem>>) -> (i32, i32) {
    %c0_i32 = arith.constant 0 : i32
    %c0_i32_0 = arith.constant 0 : i32
    %c0_i32_1 = arith.constant 0 : i32
    return %c0_i32, %c0_i32_0 : i32, i32
  }
  func.func @transform_10(%arg0: i32, %arg1: i32, %arg2: memref<2x16xi32, #tpu.memory_space<smem>>) -> (i32, i32) {
    %c0_i32 = arith.constant 0 : i32
    %c0_i32_0 = arith.constant 0 : i32
    %c0_i32_1 = arith.constant 0 : i32
    return %c0_i32, %c0_i32_0 : i32, i32
  }
  func.func @transform_11(%arg0: i32, %arg1: i32, %arg2: memref<2x16xi32, #tpu.memory_space<smem>>) -> (i32, i32) {
    %c0_i32 = arith.constant 0 : i32
    %c0_i32_0 = arith.constant 0 : i32
    %c0_i32_1 = arith.constant 0 : i32
    return %c0_i32, %c0_i32_0 : i32, i32
  }
  func.func @transform_12(%arg0: i32, %arg1: i32, %arg2: memref<2x16xi32, #tpu.memory_space<smem>>) -> (i32, i32) {
    %c0_i32 = arith.constant 0 : i32
    %c0_i32_0 = arith.constant 0 : i32
    %c0_i32_1 = arith.constant 0 : i32
    return %c0_i32, %c0_i32_0 : i32, i32
  }
  func.func @transform_13(%arg0: i32, %arg1: i32, %arg2: memref<2x16xi32, #tpu.memory_space<smem>>) -> (i32, i32) {
    %c0_i32 = arith.constant 0 : i32
    %c0_i32_0 = arith.constant 0 : i32
    %c0_i32_1 = arith.constant 0 : i32
    return %c0_i32, %c0_i32_0 : i32, i32
  }
  func.func @transform_14(%arg0: i32, %arg1: i32, %arg2: memref<2x16xi32, #tpu.memory_space<smem>>) -> (i32, i32) {
    %c0_i32 = arith.constant 0 : i32
    %c0_i32_0 = arith.constant 0 : i32
    %c0_i32_1 = arith.constant 0 : i32
    return %c0_i32, %c0_i32_0 : i32, i32
  }
  func.func @transform_15(%arg0: i32, %arg1: i32, %arg2: memref<2x16xi32, #tpu.memory_space<smem>>) -> (i32, i32) {
    %c0_i32 = arith.constant 0 : i32
    %c0_i32_0 = arith.constant 0 : i32
    %c0_i32_1 = arith.constant 0 : i32
    return %c0_i32, %c0_i32_0 : i32, i32
  }
  func.func @transform_16(%arg0: i32, %arg1: i32, %arg2: memref<2x16xi32, #tpu.memory_space<smem>>) -> (i32, i32) {
    %c0_i32 = arith.constant 0 : i32
    %c0_i32_0 = arith.constant 0 : i32
    %c0_i32_1 = arith.constant 0 : i32
    return %c0_i32, %c0_i32_0 : i32, i32
  }
  func.func @transform_17(%arg0: i32, %arg1: i32, %arg2: memref<2x16xi32, #tpu.memory_space<smem>>) -> (i32, i32) {
    %c0_i32 = arith.constant 0 : i32
    %c0_i32_0 = arith.constant 0 : i32
    %c0_i32_1 = arith.constant 0 : i32
    return %c0_i32, %c0_i32_0 : i32, i32
  }
  func.func @transform_18(%arg0: i32, %arg1: i32, %arg2: memref<2x16xi32, #tpu.memory_space<smem>>) -> (i32, i32) {
    %c0_i32 = arith.constant 0 : i32
    %c0_i32_0 = arith.constant 0 : i32
    %c0_i32_1 = arith.constant 0 : i32
    return %c0_i32, %c0_i32_0 : i32, i32
  }
  func.func @transform_19(%arg0: i32, %arg1: i32, %arg2: memref<2x16xi32, #tpu.memory_space<smem>>) -> (i32, i32) {
    %c0_i32 = arith.constant 0 : i32
    %c0_i32_0 = arith.constant 0 : i32
    %c0_i32_1 = arith.constant 0 : i32
    return %c0_i32, %c0_i32_0 : i32, i32
  }
  func.func @transform_20(%arg0: i32, %arg1: i32, %arg2: memref<2x16xi32, #tpu.memory_space<smem>>) -> (i32, i32) {
    %c0_i32 = arith.constant 0 : i32
    %c0_i32_0 = arith.constant 0 : i32
    %c0_i32_1 = arith.constant 0 : i32
    return %c0_i32, %c0_i32_0 : i32, i32
  }
  func.func @transform_21(%arg0: i32, %arg1: i32, %arg2: memref<2x16xi32, #tpu.memory_space<smem>>) -> (i32, i32) {
    %c0_i32 = arith.constant 0 : i32
    %c0_i32_0 = arith.constant 0 : i32
    %c0_i32_1 = arith.constant 0 : i32
    return %c0_i32, %c0_i32_0 : i32, i32
  }
  func.func @transform_22(%arg0: i32, %arg1: i32, %arg2: memref<2x16xi32, #tpu.memory_space<smem>>) -> (i32, i32) {
    %c0_i32 = arith.constant 0 : i32
    %c0_i32_0 = arith.constant 0 : i32
    %c0_i32_1 = arith.constant 0 : i32
    return %c0_i32, %c0_i32_0 : i32, i32
  }
  func.func @transform_23(%arg0: i32, %arg1: i32, %arg2: memref<2x16xi32, #tpu.memory_space<smem>>) -> (i32, i32) {
    %c0_i32 = arith.constant 0 : i32
    %c0_i32_0 = arith.constant 0 : i32
    %c0_i32_1 = arith.constant 0 : i32
    return %c0_i32, %c0_i32_0 : i32, i32
  }
  func.func @transform_24(%arg0: i32, %arg1: i32, %arg2: memref<2x16xi32, #tpu.memory_space<smem>>) -> (i32, i32) {
    %c0_i32 = arith.constant 0 : i32
    %c0_i32_0 = arith.constant 0 : i32
    %c0_i32_1 = arith.constant 0 : i32
    return %c0_i32, %c0_i32_0 : i32, i32
  }
  func.func @transform_25(%arg0: i32, %arg1: i32, %arg2: memref<2x16xi32, #tpu.memory_space<smem>>) -> (i32, i32) {
    %c0_i32 = arith.constant 0 : i32
    %c0_i32_0 = arith.constant 0 : i32
    %c0_i32_1 = arith.constant 0 : i32
    return %c0_i32, %c0_i32_0 : i32, i32
  }
  func.func @transform_26(%arg0: i32, %arg1: i32, %arg2: memref<2x16xi32, #tpu.memory_space<smem>>) -> (i32, i32) {
    %c0_i32 = arith.constant 0 : i32
    %c0_i32_0 = arith.constant 0 : i32
    %c0_i32_1 = arith.constant 0 : i32
    return %c0_i32, %c0_i32_0 : i32, i32
  }
  func.func @transform_27(%arg0: i32, %arg1: i32, %arg2: memref<2x16xi32, #tpu.memory_space<smem>>) -> (i32, i32) {
    %c0_i32 = arith.constant 0 : i32
    %c0_i32_0 = arith.constant 0 : i32
    %c0_i32_1 = arith.constant 0 : i32
    return %c0_i32, %c0_i32_0 : i32, i32
  }
  func.func @transform_28(%arg0: i32, %arg1: i32, %arg2: memref<2x16xi32, #tpu.memory_space<smem>>) -> (i32, i32) {
    %c0_i32 = arith.constant 0 : i32
    %c0_i32_0 = arith.constant 0 : i32
    %c0_i32_1 = arith.constant 0 : i32
    return %c0_i32, %c0_i32_0 : i32, i32
  }
  func.func @transform_29(%arg0: i32, %arg1: i32, %arg2: memref<2x16xi32, #tpu.memory_space<smem>>) -> (i32, i32) {
    %c0_i32 = arith.constant 0 : i32
    %c0_i32_0 = arith.constant 0 : i32
    %c0_i32_1 = arith.constant 0 : i32
    return %c0_i32, %c0_i32_0 : i32, i32
  }
  func.func @transform_30(%arg0: i32, %arg1: i32, %arg2: memref<2x16xi32, #tpu.memory_space<smem>>) -> (i32, i32) {
    %c0_i32 = arith.constant 0 : i32
    %c0_i32_0 = arith.constant 0 : i32
    %c0_i32_1 = arith.constant 0 : i32
    return %c0_i32, %c0_i32_0 : i32, i32
  }
  func.func @transform_31(%arg0: i32, %arg1: i32, %arg2: memref<2x16xi32, #tpu.memory_space<smem>>) -> (i32, i32) {
    %c0_i32 = arith.constant 0 : i32
    %c0_i32_0 = arith.constant 0 : i32
    %c0_i32_1 = arith.constant 0 : i32
    return %c0_i32, %c0_i32_0 : i32, i32
  }
  func.func @transform_32(%arg0: i32, %arg1: i32, %arg2: memref<2x16xi32, #tpu.memory_space<smem>>) -> (i32, i32) {
    %c0_i32 = arith.constant 0 : i32
    %c0_i32_0 = arith.constant 0 : i32
    %c0_i32_1 = arith.constant 0 : i32
    return %c0_i32, %c0_i32_0 : i32, i32
  }
  func.func @transform_33(%arg0: i32, %arg1: i32, %arg2: memref<2x16xi32, #tpu.memory_space<smem>>) -> (i32, i32) {
    %c0_i32 = arith.constant 0 : i32
    %c0_i32_0 = arith.constant 0 : i32
    %c0_i32_1 = arith.constant 0 : i32
    return %c0_i32, %c0_i32_0 : i32, i32
  }
  func.func @transform_34(%arg0: i32, %arg1: i32, %arg2: memref<2x16xi32, #tpu.memory_space<smem>>) -> (i32, i32) {
    %c0_i32 = arith.constant 0 : i32
    %c0_i32_0 = arith.constant 0 : i32
    %c0_i32_1 = arith.constant 0 : i32
    return %c0_i32, %c0_i32_0 : i32, i32
  }
  func.func @transform_35(%arg0: i32, %arg1: i32, %arg2: memref<2x16xi32, #tpu.memory_space<smem>>) -> (i32, i32) {
    %c0_i32 = arith.constant 0 : i32
    %c0_i32_0 = arith.constant 0 : i32
    %c0_i32_1 = arith.constant 0 : i32
    return %c0_i32, %c0_i32_0 : i32, i32
  }
  func.func @transform_36(%arg0: i32, %arg1: i32, %arg2: memref<2x16xi32, #tpu.memory_space<smem>>) -> (i32, i32) {
    %c0_i32 = arith.constant 0 : i32
    %c0_i32_0 = arith.constant 0 : i32
    %c0_i32_1 = arith.constant 0 : i32
    return %c0_i32, %c0_i32_0 : i32, i32
  }
  func.func @transform_37(%arg0: i32, %arg1: i32, %arg2: memref<2x16xi32, #tpu.memory_space<smem>>) -> (i32, i32) {
    %c0_i32 = arith.constant 0 : i32
    %c0_i32_0 = arith.constant 0 : i32
    %c0_i32_1 = arith.constant 0 : i32
    return %c0_i32, %c0_i32_0 : i32, i32
  }
  func.func @transform_38(%arg0: i32, %arg1: i32, %arg2: memref<2x16xi32, #tpu.memory_space<smem>>) -> (i32, i32) {
    %c0_i32 = arith.constant 0 : i32
    %c0_i32_0 = arith.constant 0 : i32
    %c0_i32_1 = arith.constant 0 : i32
    return %c0_i32, %c0_i32_0 : i32, i32
  }
  func.func @transform_39(%arg0: i32, %arg1: i32, %arg2: memref<2x16xi32, #tpu.memory_space<smem>>) -> (i32, i32) {
    %c0_i32 = arith.constant 0 : i32
    %c0_i32_0 = arith.constant 0 : i32
    %c0_i32_1 = arith.constant 0 : i32
    return %c0_i32, %c0_i32_0 : i32, i32
  }
  func.func @transform_40(%arg0: i32, %arg1: i32, %arg2: memref<2x16xi32, #tpu.memory_space<smem>>) -> (i32, i32) {
    %c0_i32 = arith.constant 0 : i32
    %c0_i32_0 = arith.constant 0 : i32
    %c0_i32_1 = arith.constant 0 : i32
    return %c0_i32, %c0_i32_0 : i32, i32
  }
  func.func @transform_41(%arg0: i32, %arg1: i32, %arg2: memref<2x16xi32, #tpu.memory_space<smem>>) -> (i32, i32) {
    %c0_i32 = arith.constant 0 : i32
    %c0_i32_0 = arith.constant 0 : i32
    %c0_i32_1 = arith.constant 0 : i32
    return %c0_i32, %c0_i32_0 : i32, i32
  }
}

</mosaic_0001>

<bundles_post_ra>
// kernel: tpu_custom_call.1
= control target key start
LH: loop header
LB: loop body
LE: loop exit
PB: predicated region body
PF: predicated region fallthrough
CT: control target
= control target key end

     0   :  { %s6404_s6 = smov 1   ;;  %s6405_s10 = smov 2   ;;  %s7759_s0 = inlined_call_operand.smem [shape: u32[43], index: -1, kind: input, shape index: {}] }
   0x1   :  { %s6504_s5 = sld [smem:[%s7759_s0]]   ;;  %s6406_s14 = smov 3  }
   0x2   :  { %s6509_s9 = sld [smem:[%s7759_s0 + %s6404_s6]]   ;;  %s6407_s18 = smov 4  }
   0x3   :  { %s6514_s13 = sld [smem:[%s7759_s0 + %s6405_s10]]   ;;  %s6408_s22 = smov 5  }
   0x4   :  { %s6519_s17 = sld [smem:[%s7759_s0 + %s6406_s14]]   ;;  %s6409_s26 = smov 6  }
   0x5   :  { %s6524_s21 = sld [smem:[%s7759_s0 + %s6407_s18]]   ;;  %s6410_s30 = smov 7  }
   0x6   :  { %s6529_s25 = sld [smem:[%s7759_s0 + %s6408_s22]]   ;;  %s6411_s4 = smov 8  }
   0x7   :  { %s6534_s29 = sld [smem:[%s7759_s0 + %s6409_s26]]   ;;  %s6412_s10 = smov 9  }
   0x8   :  { %7823 = sst [smem:[#allocation80_spill]] %s6509_s9  ;;  %s6413_s15 = smov 10  }
   0x9   :  { %7824 = sst [smem:[#allocation81_spill]] %s6514_s13  ;;  %s6414_s20 = smov 11  }
   0xa   :  { %7825 = sst [smem:[#allocation82_spill]] %s6519_s17  ;;  %s6415_s26 = smov 12  }
   0xb   :  { %7826 = sst [smem:[#allocation83_spill]] %s6524_s21  ;;  %s6416_s1 = smov 13  }
   0xc   :  { %7827 = sst [smem:[#allocation84_spill]] %s6529_s25  ;;  %s6417_s7 = smov 14  }
   0xd   :  { %7828 = sst [smem:[#allocation85_spill]] %s6534_s29  ;;  %s6419_s22 = smov 16  }
   0xe   :  { %s6539_s3 = sld [smem:[%s7759_s0 + %s6410_s30]]   ;;  %s6420_s28 = smov 17  }
   0xf   :  { %s6544_s8 = sld [smem:[%s7759_s0 + %s6411_s4]]   ;;  %s6441_s11 = smov 38  }
  0x10   :  { %s6549_s14 = sld [smem:[%s7759_s0 + %s6412_s10]]   ;;  %s6442_s18 = smov 39  }
  0x11   :  { %s6554_s19 = sld [smem:[%s7759_s0 + %s6413_s15]]   ;;  %s6418_s15 = smov 15  }
  0x12   :  { %s6559_s24 = sld [smem:[%s7759_s0 + %s6414_s20]]   ;;  %s5348_s29 = scalar_lea.hbm %s6504_s5, 32 }
  0x13   :  { %s6564_s30 = sld [smem:[%s7759_s0 + %s6415_s26]]   ;;  %p5349_p0 = scmp.ne.s32.totalorder %s6504_s5, %s5348_s29 }
  0x14   :  { %7829 = sst [smem:[#allocation86_spill]] %s6539_s3  ;;  %p5352_p1 = scmp.lt.u32.totalorder %s5348_s29, %s6504_s5 }
  0x15   :  { %7830 = sst [smem:[#allocation87_spill]] %s6544_s8 }
  0x16   :  { %7831 = sst [smem:[#allocation88_spill]] %s6549_s14  ;;  %p5354_p2 = pnand %p5352_p1, %p5349_p0 }
  0x17   :  { %7832 = sst [smem:[#allocation89_spill]] %s6554_s19 }
  0x18   :  { %7833 = sst [smem:[#allocation90_spill]] %s6559_s24 }
  0x19   :  { %s6569_s6 = sld [smem:[%s7759_s0 + %s6416_s1]]   ;;  %s6440_s1 = smov 37  }
  0x1a   :  { %s6574_s12 = sld [smem:[%s7759_s0 + %s6417_s7]]   ;;  %s6421_s7 = smov 18  }
  0x1b   :  { %s6579_s20 = sld [smem:[%s7759_s0 + %s6418_s15]]   ;;  %s6422_s15 = smov 19  }
  0x1c   :  { %s6584_s27 = sld [smem:[%s7759_s0 + %s6419_s22]]   ;;  %s6423_s22 = smov 20  }
  0x1d   :  { %s6589_s4 = sld [smem:[%s7759_s0 + %s6420_s28]]   ;;  %s6424_s28 = smov 21  }
  0x1e   :  { %s6594_s21 = sld [smem:[%s7759_s0 + %s6421_s7]]   ;;  %s6425_s7 = smov 22  }
  0x1f   :  { %7834 = sst [smem:[#allocation91_spill]] %s6569_s6 }
  0x20   :  { %7835 = sst [smem:[#allocation92_spill]] %s6574_s12 }
  0x21   :  { %7836 = sst [smem:[#allocation93_spill]] %s6579_s20 }
  0x22   :  { %s6599_s3 = sld [smem:[%s7759_s0 + %s6422_s15]]   ;;  %s6426_s15 = smov 23  }
  0x23   :  { %7837 = sst [smem:[#allocation94_spill]] %s6589_s4 }
  0x24   :  { %7838 = sst [smem:[#allocation95_spill]] %s6594_s21 }
  0x25   :  { %s6604_s25 = sld [smem:[%s7759_s0 + %s6423_s22]]   ;;  %s6427_s22 = smov 24  }
  0x26   :  { %s6609_s4 = sld [smem:[%s7759_s0 + %s6424_s28]]   ;;  %s6428_s28 = smov 25  }
  0x27   :  { %s6614_s17 = sld [smem:[%s7759_s0 + %s6425_s7]]   ;;  %s6429_s7 = smov 26  }
  0x28   :  { %7839 = sst [smem:[#allocation96_spill]] %s6599_s3 }
  0x29   :  { %s6619_s3 = sld [smem:[%s7759_s0 + %s6426_s15]]   ;;  %s6430_s15 = smov 27  }
  0x2a   :  { %s6624_s13 = sld [smem:[%s7759_s0 + %s6427_s22]]   ;;  %s6431_s22 = smov 28  }
  0x2b   :  { %s6634_s21 = sld [smem:[%s7759_s0 + %s6429_s7]]   ;;  %s6433_s7 = smov 30  }
  0x2c   :  { %7840 = sst [smem:[#allocation97_spill]] %s6609_s4 }
  0x2d   :  { %7841 = sst [smem:[#allocation98_spill]] %s6614_s17 }
  0x2e   :  { %s6629_s4 = sld [smem:[%s7759_s0 + %s6428_s28]]   ;;  %s6432_s28 = smov 29  }
  0x2f   :  { %7842 = sst [smem:[#allocation99_spill]] %s6619_s3 }
  0x30   :  { %7843 = sst [smem:[#allocation100_spill]] %s6624_s13 }
  0x31   :  { %7845 = sst [smem:[#allocation102_spill]] %s6634_s21 }
  0x32   :  { %s6639_s3 = sld [smem:[%s7759_s0 + %s6430_s15]]   ;;  %s6434_s15 = smov 31  }
  0x33   :  { %s6644_s20 = sld [smem:[%s7759_s0 + %s6431_s22]]   ;;  %s6435_s22 = smov 32  }
  0x34   :  { %7844 = sst [smem:[#allocation101_spill]] %s6629_s4 }
  0x35   :  { %s6649_s4 = sld [smem:[%s7759_s0 + %s6432_s28]]   ;;  %s6436_s28 = smov 33  }
  0x36   :  { %s6654_s6 = sld [smem:[%s7759_s0 + %s6433_s7]]   ;;  %s6437_s7 = smov 34  }
  0x37   :  { %s6664_s24 = sld [smem:[%s7759_s0 + %s6435_s22]]   ;;  %s6439_s22 = smov 36  }
  0x38   :  { %7846 = sst [smem:[#allocation103_spill]] %s6639_s3 }
  0x39   :  { %7847 = sst [smem:[#allocation104_spill]] %s6644_s20 }
  0x3a   :  { %s6659_s3 = sld [smem:[%s7759_s0 + %s6434_s15]]   ;;  %s6438_s15 = smov 35  }
  0x3b   :  { %7848 = sst [smem:[#allocation105_spill]] %s6649_s4 }
  0x3c   :  { %7849 = sst [smem:[#allocation106_spill]] %s6654_s6 }
  0x3d   :  { %7851 = sst [smem:[#allocation108_spill]] %s6664_s24 }
  0x3e   :  { %s6669_s4 = sld [smem:[%s7759_s0 + %s6436_s28]]  }
  0x3f   :  { %s6674_s14 = sld [smem:[%s7759_s0 + %s6437_s7]]  }
  0x40   :  { %7850 = sst [smem:[#allocation107_spill]] %s6659_s3 }
  0x41   :  { %s6679_s23 = sld [smem:[%s7759_s0 + %s6438_s15]]  }
  0x42   :  { %s6684_s28 = sld [smem:[%s7759_s0 + %s6439_s22]]   ;;  %s6443_s22 = smov 40  }
  0x43   :  { %s6689_s7 = sld [smem:[%s7759_s0 + %s6440_s1]]   ;;  %s6444_s1 = smov 41  }
  0x44   :  { %7852 = sst [smem:[#allocation109_spill]] %s6669_s4  ;;  %s6445_s4 = smov 42  }
  0x45   :  { %7853 = sst [smem:[#allocation110_spill]] %s6674_s14 }
  0x46   :  { %s6694_s15 = sld [smem:[%s7759_s0 + %s6441_s11]]  }
  0x47   :  { %7854 = sst [smem:[#allocation111_spill]] %s6679_s23 }
  0x48   :  { %7855 = sst [smem:[#allocation112_spill]] %s6684_s28 }
  0x49   :  { %7856 = sst [smem:[#allocation113_spill]] %s6689_s7 }
  0x4a   :  { %s6699_s3 = sld [smem:[%s7759_s0 + %s6442_s18]]  }
  0x4b   :  { %s6704_s9 = sld [smem:[%s7759_s0 + %s6443_s22]]  }
  0x4c   :  { %7857 = sst [smem:[#allocation114_spill]] %s6694_s15 }
  0x4d   :  { %s6709_s7 = sld [smem:[%s7759_s0 + %s6444_s1]]  }
  0x4e   :  { %s6714_s15 = sld [smem:[%s7759_s0 + %s6445_s4]]  }
  0x50   :  { %7858 = sst [smem:[#allocation115_spill]] %s6699_s3 }
  0x51   :  { %7859 = sst [smem:[#allocation116_spill]] %s6704_s9 }
  0x53   :  { %7860 = sst [smem:[#allocation117_spill]] %s6709_s7 }
  0x54   :  { %7861 = sst [smem:[#allocation118_spill]] %s6714_s15 }
  0x55   :  { %5357 = shalt.err (!%p5354_p2)  }
  0x56   :  { %s6446_s23 = smov [#allocation7]  }
  0x57   :  { %91 = dma.hbm_to_smem %s6504_s5, 32, %s6446_s23, [#allocation6] }
  0x58   :  { %6286 = dma.done.wait [#allocation6], 32 }
  0x59   :  { %6287 = vsyncadd [#allocation6], 4294967264 }
  0x5a   :  { %93 = sfence }
  0x5b   :  { %94 = vsyncpa [#allocation9], 0 }
  0x5c   :  { %95 = vsyncpa [#allocation12], 0 }
  0x5d   :  { %97 = vsyncpa [#allocation12 + $0x1], 0 }
  0x5e   :  { %98 = vsyncpa [#allocation15], 0 }
  0x5f   :  { %99 = vsyncpa [#allocation18], 0 }
  0x60   :  { %100 = vsyncpa [#allocation21], 0 }
  0x61   :  { %101 = vsyncpa [#allocation24], 0 }
  0x62   :  { %102 = vsyncpa [#allocation27], 0 }
  0x63   :  { %103 = vsyncpa [#allocation30], 0 }
  0x64   :  { %104 = vsyncpa [#allocation33], 0 }
  0x65   :  { %105 = vsyncpa [#allocation36], 0 }
  0x66   :  { %106 = vsyncpa [#allocation39], 0 }
  0x67   :  { %107 = vsyncpa [#allocation42], 0 }
  0x68   :  { %108 = vsyncpa [#allocation45], 0 }
  0x69   :  { %109 = vsyncpa [#allocation48], 0 }
  0x6a   :  { %110 = vsyncpa [#allocation51], 0 }
  0x6b   :  { %111 = vsyncpa [#allocation54], 0 }
  0x6c   :  { %112 = vsyncpa [#allocation57], 0 }
  0x6d   :  { %113 = vsyncpa [#allocation10], 0  ;;  %s6720_s0 = smov 0   ;;  %s6722_s5 = smov 0  }
  0x6e   :  { %s6724_s28 = smov 0   ;;  %s6726_s18 = smov 0  }
  0x6f   :  { %s6728_s22 = smov 0   ;;  %s6730_s26 = smov 0  }
  0x70   :  { %s6732_s1 = smov 0   ;;  %s6734_s2 = smov 0  }
  0x71 LB: > { %s7862_s24 = sld [smem:[#allocation108_spill]]  ;;  %s7863_s21 = sld [smem:[#allocation102_spill]]  ;;  %s6378_s18 = sphi %s6726_s18, %s7962_s18   ;;  %s6374_s28 = sphi %s6724_s28, %s7961_s28   ;;  %s6370_s5 = sphi %s6722_s5, %s7960_s5   ;;  %s6366_s0 = sphi %s6720_s0, %s7959_s0   ;;  %s6394_s2 = sphi %s6734_s2, %s119_s2   ;;  %s6390_s1 = sphi %s6732_s1, %s7958_s1   ;;  %s6386_s26 = sphi %s6730_s26, %s7963_s26   ;;  %s6382_s22 = sphi %s6728_s22, %s7956_s22  }
  0x72   : > { %s7864_s20 = sld [smem:[#allocation104_spill]]  ;;  %s7865_s17 = sld [smem:[#allocation98_spill]] }
  0x73   : > { %s7866_s7 = sld [smem:[#allocation117_spill]]  ;;  %s7867_s3 = sld [smem:[#allocation115_spill]] }
  0x74   : > { %s7868_s14 = sld [smem:[#allocation110_spill]]  ;;  %s7869_s13 = sld [smem:[#allocation100_spill]] }
  0x75   : > { %s7870_s6 = sld [smem:[#allocation106_spill]]  ;;  %s7871_s19 = sld [smem:[#allocation89_spill]] }
  0x76   : > { %s7872_s12 = sld [smem:[#allocation92_spill]]  ;;  %s7873_s8 = sld [smem:[#allocation87_spill]] }
  0x77   : > { %7874 = sst [smem:[#allocation119_spill]] %s6390_s1  ;;  %s6759_s10 = sadd.s32 4294967295, %s6394_s2  }
  0x78   : > { %s128_s4 = sadd.s32 1, %s6386_s26  ;;  %s131_s11 = sadd.s32 1, %s6390_s1 }
  0x79   : > { %p129_p3 = scmp.ge.s32.totalorder %s128_s4, 2  ;;  %s159_s16 = sadd.s32 1, %s6374_s28 }
  0x7a   : > { %p166_p4 = scmp.ne.s32.totalorder %s6374_s28, %s6370_s5  ;;  %p167_p5 = scmp.eq.s32.totalorder %s6394_s2, 0 }
  0x7b   : > { %s7965_s4 = smov (%p129_p3, %s128_s4), 0  ;;  %s7967_s11 = smov (!%p129_p3, %s131_s11), %s6390_s1 }
  0x7c   : > { %7875 = sst [smem:[#allocation120_spill]] %s7965_s4  ;;  %s156_s29 = ssub.s32 %s6386_s26, %s7965_s4 }
  0x7d   : > { %p133_p6 = scmp.ge.s32.totalorder %s7967_s11, 4  ;;  %p157_p7 = scmp.eq.s32.totalorder %s156_s29, 0 }
  0x7e   : > { %p6772_p8 = por %p167_p5, %p166_p4  ;;  %p172_p9 = scmp.ne.s32.totalorder %s6370_s5, %s6366_s0 }
  0x7f   : > { %s7969_s11 = smov (%p133_p6, %s7967_s11), 0  ;;  %p7813_p10 = scmp.eq.s32.totalorder %s6759_s10, 0 }
  0x80   : > { %7877 = sst [smem:[#allocation121_spill]] %s7969_s11  ;;  %p4259_p11 = scmp.ge.s32.totalorder %s6394_s2, 1 }
  0x81   : > { %s6780_s15 = scalar_select %p157_p7, %s6374_s28, %s159_s16  }
  0x82   : > { %p1028_p12 = scmp.lt.s32.totalorder %s6394_s2, 9  ;;  %p6787_p13 = por %p7813_p10, %p172_p9 }
  0x83   : > { %7878 = sst [smem:[#allocation122_spill]] %s6780_s15 }
  0x84   : > { %s7879_s9 = scalar_select %p6787_p13, 1, 0 }
  0x85   : > { %p6791_p0 = pnand %p4259_p11, %p1028_p12 }
  0x86   : > { %s6447_s0 = smov (!%p6791_p0), [#allocation14]   ;;  %s6448_s29 = smov (!%p6791_p0), [#allocation17]  }
  0x87   : > { %s7880_s4 = scalar_select %p6791_p0, 1, 0 }
  0x88   : > { %1032 = sbr.rel (%p6791_p0) target bundleno = 907 (0x38b), region = 12  ;;  %s1074_s16 = sshll.u32 (!%p6791_p0), %s6447_s0, 4  ;;  %s1075_s16 = int_to_ptr.vmem [resolvable:$true] %s1074_s16 }
  0x89   : > { %s1098_s11 = sshll.u32 (!%p6791_p0), %s6448_s29, 4  ;;  %s5358_s1 = scalar_lea.hbm (!%p6791_p0), %s7873_s8, 16  ;;  %s6797_s11 = int_to_ptr.vmem [resolvable:$true] %s1098_s11 }
  0x8a   : > { %p5359_p1 = scmp.ne.s32.totalorder (!%p6791_p0), %s7873_s8, %s5358_s1  ;;  %p5364_p4 = scmp.lt.u32.totalorder (!%p6791_p0), %s5358_s1, %s7873_s8 }
  0x8c   : > { %p5360_p2 = pnand (!%p6791_p0), %p5359_p1, %p7813_p10 }
  0x8e   : > { %p5361_p3 = pneg (!%p6791_p0), %p5360_p2 }
  0x90   : > { %p5366_p5 = pnand %p5364_p4, %p5361_p3 }
  0x92   : > { %5369 = shalt.err (!%p5366_p5)
}
  0x93   : > { %s5370_s15 = scalar_lea.vmem %s1075_s16, 16  ;;  %s5376_s0 = scalar_lea.vmem %s1075_s16, 32 }
  0x94   : > { %p5371_p6 = scmp.ne.s32.totalorder %s1075_s16, %s5370_s15  ;;  %p5377_p11 = scmp.lt.s32.totalorder %s1075_s16, %s1075_s16 }
  0x95   : > { %p5378_p12 = scmp.lt.s32.totalorder %s5376_s0, %s5370_s15 }
  0x96   : > { %p5372_p7 = pnand %p5371_p6, %p7813_p10 }
  0x97   : > { %p5379_p13 = por %p5378_p12, %p5377_p11 }
  0x98   : > { %p5373_p9 = pneg %p5372_p7 }
  0x9a   : > { %p5380_p0 = pnand %p5379_p13, %p5373_p9 }
  0x9c   : > { %5383 = shalt.err (!%p5380_p0)
}
  0x9d   : > { %4943 = dma.hbm_to_vmem [thread:$0]  (%p7813_p10), %s7873_s8, 16, %s1075_s16, [#allocation15]  }
  0x9e   : > { %s5384_s1 = scalar_lea.hbm %s7871_s19, 16 }
  0x9f   : > { %p5385_p1 = scmp.ne.s32.totalorder %s7871_s19, %s5384_s1  ;;  %p5390_p4 = scmp.lt.u32.totalorder %s5384_s1, %s7871_s19 }
  0xa1   : > { %p5386_p2 = pnand %p5385_p1, %p7813_p10 }
  0xa3   : > { %p5387_p3 = pneg %p5386_p2 }
  0xa5   : > { %p5392_p5 = pnand %p5390_p4, %p5387_p3 }
  0xa7   : > { %5395 = shalt.err (!%p5392_p5)
}
  0xa8   : > { %s5396_s15 = scalar_lea.vmem %s6797_s11, 16  ;;  %s5402_s29 = scalar_lea.vmem %s6797_s11, 32 }
  0xa9   : > { %p5397_p13 = scmp.ne.s32.totalorder %s6797_s11, %s5396_s15  ;;  %p5403_p7 = scmp.lt.s32.totalorder %s6797_s11, %s6797_s11 }
  0xaa   : > { %p5404_p9 = scmp.lt.s32.totalorder %s5402_s29, %s5396_s15 }
  0xab   : > { %p5398_p0 = pnand %p5397_p13, %p7813_p10 }
  0xac   : > { %p5405_p11 = por %p5404_p9, %p5403_p7 }
  0xad   : > { %p5399_p6 = pneg %p5398_p0 }
  0xaf   : > { %p5406_p12 = pnand %p5405_p11, %p5399_p6 }
  0xb1   : > { %5409 = shalt.err (!%p5406_p12)
}
  0xb2   : > { %4947 = dma.hbm_to_vmem [thread:$0]  (%p7813_p10), %s7871_s19, 16, %s6797_s11, [#allocation18]  }
  0xb3   : > { %s6449_s16 = smov [#allocation20]   ;;  %s6450_s1 = smov [#allocation23]  }
  0xb4   : > { %s1122_s0 = sshll.u32 %s6449_s16, 4  ;;  %s1146_s8 = sshll.u32 %s6450_s1, 4  ;;  %s1123_s0 = int_to_ptr.vmem [resolvable:$true] %s1122_s0  ;;  %s6825_s8 = int_to_ptr.vmem [resolvable:$true] %s1146_s8 }
  0xb5   : > { %s5410_s15 = scalar_lea.hbm %s6564_s30, 16 }
  0xb6   : > { %p5411_p1 = scmp.ne.s32.totalorder %s6564_s30, %s5410_s15  ;;  %p5416_p4 = scmp.lt.u32.totalorder %s5410_s15, %s6564_s30 }
  0xb8   : > { %p5412_p2 = pnand %p5411_p1, %p7813_p10 }
  0xba   : > { %p5413_p3 = pneg %p5412_p2 }
  0xbc   : > { %p5418_p5 = pnand %p5416_p4, %p5413_p3 }
  0xbe   : > { %5421 = shalt.err (!%p5418_p5)
}
  0xbf   : > { %s5422_s29 = scalar_lea.vmem %s1123_s0, 16  ;;  %s5428_s11 = scalar_lea.vmem %s1123_s0, 32 }
  0xc0   : > { %p5423_p13 = scmp.ne.s32.totalorder %s1123_s0, %s5422_s29  ;;  %p5429_p7 = scmp.lt.s32.totalorder %s1123_s0, %s1123_s0 }
  0xc1   : > { %p5430_p9 = scmp.lt.s32.totalorder %s5428_s11, %s5422_s29 }
  0xc2   : > { %p5424_p0 = pnand %p5423_p13, %p7813_p10 }
  0xc3   : > { %p5431_p11 = por %p5430_p9, %p5429_p7 }
  0xc4   : > { %p5425_p6 = pneg %p5424_p0 }
  0xc6   : > { %p5432_p12 = pnand %p5431_p11, %p5425_p6 }
  0xc8   : > { %5435 = shalt.err (!%p5432_p12)
}
  0xc9   : > { %4951 = dma.hbm_to_vmem [thread:$0]  (%p7813_p10), %s6564_s30, 16, %s1123_s0, [#allocation21]  }
  0xca   : > { %s5436_s16 = scalar_lea.hbm %s7872_s12, 16 }
  0xcb   : > { %p5437_p1 = scmp.ne.s32.totalorder %s7872_s12, %s5436_s16  ;;  %p5442_p4 = scmp.lt.u32.totalorder %s5436_s16, %s7872_s12 }
  0xcd   : > { %p5438_p2 = pnand %p5437_p1, %p7813_p10 }
  0xcf   : > { %p5439_p3 = pneg %p5438_p2 }
  0xd1   : > { %p5444_p5 = pnand %p5442_p4, %p5439_p3 }
  0xd3   : > { %5447 = shalt.err (!%p5444_p5)
}
  0xd4   : > { %s5448_s1 = scalar_lea.vmem %s6825_s8, 16  ;;  %s5454_s15 = scalar_lea.vmem %s6825_s8, 32 }
  0xd5   : > { %p5449_p13 = scmp.ne.s32.totalorder %s6825_s8, %s5448_s1  ;;  %p5455_p7 = scmp.lt.s32.totalorder %s6825_s8, %s6825_s8 }
  0xd6   : > { %p5456_p9 = scmp.lt.s32.totalorder %s5454_s15, %s5448_s1 }
  0xd7   : > { %p5450_p0 = pnand %p5449_p13, %p7813_p10 }
  0xd8   : > { %p5457_p11 = por %p5456_p9, %p5455_p7 }
  0xd9   : > { %p5451_p6 = pneg %p5450_p0 }
  0xdb   : > { %p5458_p12 = pnand %p5457_p11, %p5451_p6 }
  0xdd   : > { %5461 = shalt.err (!%p5458_p12)
}
  0xde   : > { %4955 = dma.hbm_to_vmem [thread:$0]  (%p7813_p10), %s7872_s12, 16, %s6825_s8, [#allocation24]  }
  0xdf   : > { %s6451_s0 = smov [#allocation26]   ;;  %s5462_s11 = scalar_lea.hbm %s6584_s27, 16 }
  0xe0   : > { %s1170_s29 = sshll.u32 %s6451_s0, 4  ;;  %p5463_p1 = scmp.ne.s32.totalorder %s6584_s27, %s5462_s11  ;;  %s1171_s29 = int_to_ptr.vmem [resolvable:$true] %s1170_s29 }
  0xe1   : > { %p5468_p4 = scmp.lt.u32.totalorder %s5462_s11, %s6584_s27 }
  0xe2   : > { %p5464_p2 = pnand %p5463_p1, %p7813_p10 }
  0xe4   : > { %p5465_p3 = pneg %p5464_p2 }
  0xe6   : > { %p5470_p5 = pnand %p5468_p4, %p5465_p3 }
  0xe8   : > { %5473 = shalt.err (!%p5470_p5)
}
  0xe9   : > { %s5474_s16 = scalar_lea.vmem %s1171_s29, 16  ;;  %s5480_s1 = scalar_lea.vmem %s1171_s29, 32 }
  0xea   : > { %p5475_p13 = scmp.ne.s32.totalorder %s1171_s29, %s5474_s16  ;;  %p5481_p7 = scmp.lt.s32.totalorder %s1171_s29, %s1171_s29 }
  0xeb   : > { %p5482_p9 = scmp.lt.s32.totalorder %s5480_s1, %s5474_s16 }
  0xec   : > { %p5476_p0 = pnand %p5475_p13, %p7813_p10 }
  0xed   : > { %p5483_p11 = por %p5482_p9, %p5481_p7 }
  0xee   : > { %p5477_p6 = pneg %p5476_p0 }
  0xf0   : > { %p5484_p12 = pnand %p5483_p11, %p5477_p6 }
  0xf2   : > { %5487 = shalt.err (!%p5484_p12)
}
  0xf3   : > { %4959 = dma.hbm_to_vmem [thread:$0]  (%p7813_p10), %s6584_s27, 16, %s1171_s29, [#allocation27]  }
  0xf4   : > { %s6452_s8 = smov [#allocation29]   ;;  %s6453_s0 = smov [#allocation32]  }
  0xf5   : > { %s1197_s15 = sshll.u32 %s6452_s8, 4  ;;  %s1223_s11 = sshll.u32 %s6453_s0, 4  ;;  %s1198_s15 = int_to_ptr.vmem [resolvable:$true] %s1197_s15  ;;  %s1224_s11 = int_to_ptr.vmem [resolvable:$true] %s1223_s11 }
  0xf6   : > { %s5488_s12 = scalar_lea.hbm %s6604_s25, 768 }
  0xf7   : > { %p5489_p1 = scmp.ne.s32.totalorder %s6604_s25, %s5488_s12  ;;  %p5494_p4 = scmp.lt.u32.totalorder %s5488_s12, %s6604_s25 }
  0xf9   : > { %p5490_p2 = pnand %p5489_p1, %p7813_p10 }
  0xfb   : > { %p5491_p3 = pneg %p5490_p2 }
  0xfd   : > { %p5496_p5 = pnand %p5494_p4, %p5491_p3 }
  0xff   : > { %5499 = shalt.err (!%p5496_p5)
}
 0x100   : > { %s5500_s16 = scalar_lea.vmem %s1198_s15, 768  ;;  %p5507_p7 = scmp.lt.s32.totalorder %s1198_s15, %s1198_s15 }
 0x101   : > { %p5501_p13 = scmp.ne.s32.totalorder %s1198_s15, %s5500_s16  ;;  %p5508_p9 = scmp.lt.s32.totalorder %s5500_s16, %s5500_s16 }
 0x103   : > { %p5502_p0 = pnand %p5501_p13, %p7813_p10  ;;  %p5509_p11 = por %p5508_p9, %p5507_p7 }
 0x105   : > { %p5503_p6 = pneg %p5502_p0 }
 0x107   : > { %p5510_p12 = pnand %p5509_p11, %p5503_p6 }
 0x109   : > { %5513 = shalt.err (!%p5510_p12)
}
 0x10a   : > { %s7801_s29 = smov 128   ;;  %s7803_s12 = smov 8  }
 0x10b   : > { %4963 = dma.hbm_to_vmem [thread:$0]  (%p7813_p10), %s6604_s25, 768, %s1198_s15, [#allocation30], %s7801_s29, %s7801_s29, %s7803_s12  }
 0x10c   : > { %s5514_s1 = scalar_lea.hbm %s7865_s17, 2048 }
 0x10d   : > { %p5515_p1 = scmp.ne.s32.totalorder %s7865_s17, %s5514_s1  ;;  %p5520_p4 = scmp.lt.u32.totalorder %s5514_s1, %s7865_s17 }
 0x10f   : > { %p5516_p2 = pnand %p5515_p1, %p7813_p10 }
 0x111   : > { %p5517_p3 = pneg %p5516_p2 }
 0x113   : > { %p5522_p5 = pnand %p5520_p4, %p5517_p3 }
 0x115   : > { %5525 = shalt.err (!%p5522_p5)
}
 0x116   : > { %s5526_s8 = scalar_lea.vmem %s1224_s11, 2048  ;;  %p5533_p7 = scmp.lt.s32.totalorder %s1224_s11, %s1224_s11 }
 0x117   : > { %p5527_p13 = scmp.ne.s32.totalorder %s1224_s11, %s5526_s8  ;;  %p5534_p9 = scmp.lt.s32.totalorder %s5526_s8, %s5526_s8 }
 0x119   : > { %p5528_p0 = pnand %p5527_p13, %p7813_p10  ;;  %p5535_p11 = por %p5534_p9, %p5533_p7 }
 0x11b   : > { %p5529_p6 = pneg %p5528_p0 }
 0x11d   : > { %p5536_p12 = pnand %p5535_p11, %p5529_p6 }
 0x11f   : > { %5539 = shalt.err (!%p5536_p12)
}
 0x120   : > { %4967 = dma.hbm_to_vmem [thread:$0]  (%p7813_p10), %s7865_s17, 2048, %s1224_s11, [#allocation33], %s7801_s29, %s7801_s29, %s7803_s12  }
 0x121   : > { %s6456_s15 = smov [#allocation35]   ;;  %s6457_s16 = smov [#allocation38]  }
 0x122   : > { %s1249_s0 = sshll.u32 %s6456_s15, 4  ;;  %s1273_s1 = sshll.u32 %s6457_s16, 4  ;;  %s1250_s0 = int_to_ptr.vmem [resolvable:$true] %s1249_s0  ;;  %s1274_s1 = int_to_ptr.vmem [resolvable:$true] %s1273_s1 }
 0x123   : > { %s5540_s8 = scalar_lea.hbm %s7869_s13, 4096 }
 0x124   : > { %p5541_p1 = scmp.ne.s32.totalorder %s7869_s13, %s5540_s8  ;;  %p5546_p4 = scmp.lt.u32.totalorder %s5540_s8, %s7869_s13 }
 0x126   : > { %p5542_p2 = pnand %p5541_p1, %p7813_p10 }
 0x128   : > { %p5543_p3 = pneg %p5542_p2 }
 0x12a   : > { %p5548_p5 = pnand %p5546_p4, %p5543_p3 }
 0x12c   : > { %5551 = shalt.err (!%p5548_p5)
}
 0x12d   : > { %s5552_s19 = scalar_lea.vmem %s1250_s0, 4096  ;;  %p5559_p7 = scmp.lt.s32.totalorder %s1250_s0, %s1250_s0 }
 0x12e   : > { %p5553_p13 = scmp.ne.s32.totalorder %s1250_s0, %s5552_s19  ;;  %p5560_p9 = scmp.lt.s32.totalorder %s5552_s19, %s5552_s19 }
 0x130   : > { %p5554_p0 = pnand %p5553_p13, %p7813_p10  ;;  %p5561_p11 = por %p5560_p9, %p5559_p7 }
 0x132   : > { %p5555_p6 = pneg %p5554_p0 }
 0x134   : > { %p5562_p12 = pnand %p5561_p11, %p5555_p6 }
 0x136   : > { %5565 = shalt.err (!%p5562_p12)
}
 0x137   : > { %4971 = dma.hbm_to_vmem [thread:$0]  (%p7813_p10), %s7869_s13, 4096, %s1250_s0, [#allocation36], %s7801_s29, %s7801_s29, %s7803_s12  }
 0x138   : > { %s5566_s11 = scalar_lea.hbm %s7863_s21, 2048 }
 0x139   : > { %p5567_p1 = scmp.ne.s32.totalorder %s7863_s21, %s5566_s11  ;;  %p5572_p4 = scmp.lt.u32.totalorder %s5566_s11, %s7863_s21 }
 0x13b   : > { %p5568_p2 = pnand %p5567_p1, %p7813_p10 }
 0x13d   : > { %p5569_p3 = pneg %p5568_p2 }
 0x13f   : > { %p5574_p5 = pnand %p5572_p4, %p5569_p3 }
 0x141   : > { %5577 = shalt.err (!%p5574_p5)
}
 0x142   : > { %s5578_s19 = scalar_lea.vmem %s1274_s1, 2048  ;;  %p5585_p7 = scmp.lt.s32.totalorder %s1274_s1, %s1274_s1 }
 0x143   : > { %p5579_p13 = scmp.ne.s32.totalorder %s1274_s1, %s5578_s19  ;;  %p5586_p9 = scmp.lt.s32.totalorder %s5578_s19, %s5578_s19 }
 0x145   : > { %p5580_p0 = pnand %p5579_p13, %p7813_p10  ;;  %p5587_p11 = por %p5586_p9, %p5585_p7 }
 0x147   : > { %p5581_p6 = pneg %p5580_p0 }
 0x149   : > { %p5588_p12 = pnand %p5587_p11, %p5581_p6 }
 0x14b   : > { %5591 = shalt.err (!%p5588_p12)
}
 0x14c   : > { %4975 = dma.hbm_to_vmem [thread:$0]  (%p7813_p10), %s7863_s21, 2048, %s1274_s1, [#allocation39], %s7801_s29, %s7801_s29, %s7803_s12  }
 0x14d   : > { %s6458_s15 = smov [#allocation41]   ;;  %s6459_s16 = smov [#allocation44]  }
 0x14e   : > { %s1297_s0 = sshll.u32 %s6458_s15, 4  ;;  %s1321_s8 = sshll.u32 %s6459_s16, 4  ;;  %s1298_s0 = int_to_ptr.vmem [resolvable:$true] %s1297_s0  ;;  %s1322_s8 = int_to_ptr.vmem [resolvable:$true] %s1321_s8 }
 0x14f   : > { %s5592_s11 = scalar_lea.hbm %s7864_s20, 2048 }
 0x150   : > { %p5593_p1 = scmp.ne.s32.totalorder %s7864_s20, %s5592_s11  ;;  %p5598_p4 = scmp.lt.u32.totalorder %s5592_s11, %s7864_s20 }
 0x152   : > { %p5594_p2 = pnand %p5593_p1, %p7813_p10 }
 0x154   : > { %p5595_p3 = pneg %p5594_p2 }
 0x156   : > { %p5600_p5 = pnand %p5598_p4, %p5595_p3 }
 0x158   : > { %5603 = shalt.err (!%p5600_p5)
}
 0x159   : > { %s5604_s19 = scalar_lea.vmem %s1298_s0, 2048  ;;  %p5611_p7 = scmp.lt.s32.totalorder %s1298_s0, %s1298_s0 }
 0x15a   : > { %p5605_p13 = scmp.ne.s32.totalorder %s1298_s0, %s5604_s19  ;;  %p5612_p9 = scmp.lt.s32.totalorder %s5604_s19, %s5604_s19 }
 0x15c   : > { %p5606_p0 = pnand %p5605_p13, %p7813_p10  ;;  %p5613_p11 = por %p5612_p9, %p5611_p7 }
 0x15e   : > { %p5607_p6 = pneg %p5606_p0 }
 0x160   : > { %p5614_p12 = pnand %p5613_p11, %p5607_p6 }
 0x162   : > { %5617 = shalt.err (!%p5614_p12)
}
 0x163   : > { %4979 = dma.hbm_to_vmem [thread:$0]  (%p7813_p10), %s7864_s20, 2048, %s1298_s0, [#allocation42], %s7801_s29, %s7801_s29, %s7803_s12  }
 0x164   : > { %s5618_s1 = scalar_lea.hbm %s7870_s6, 2048 }
 0x165   : > { %p5619_p1 = scmp.ne.s32.totalorder %s7870_s6, %s5618_s1  ;;  %p5624_p4 = scmp.lt.u32.totalorder %s5618_s1, %s7870_s6 }
 0x167   : > { %p5620_p2 = pnand %p5619_p1, %p7813_p10 }
 0x169   : > { %p5621_p3 = pneg %p5620_p2 }
 0x16b   : > { %p5626_p5 = pnand %p5624_p4, %p5621_p3 }
 0x16d   : > { %5629 = shalt.err (!%p5626_p5)
}
 0x16e   : > { %s5630_s15 = scalar_lea.vmem %s1322_s8, 2048  ;;  %p5637_p7 = scmp.lt.s32.totalorder %s1322_s8, %s1322_s8 }
 0x16f   : > { %p5631_p13 = scmp.ne.s32.totalorder %s1322_s8, %s5630_s15  ;;  %p5638_p9 = scmp.lt.s32.totalorder %s5630_s15, %s5630_s15 }
 0x171   : > { %p5632_p0 = pnand %p5631_p13, %p7813_p10  ;;  %p5639_p11 = por %p5638_p9, %p5637_p7 }
 0x173   : > { %p5633_p6 = pneg %p5632_p0 }
 0x175   : > { %p5640_p12 = pnand %p5639_p11, %p5633_p6 }
 0x177   : > { %5643 = shalt.err (!%p5640_p12)
}
 0x178   : > { %4983 = dma.hbm_to_vmem [thread:$0]  (%p7813_p10), %s7870_s6, 2048, %s1322_s8, [#allocation45], %s7801_s29, %s7801_s29, %s7803_s12  }
 0x179   : > { %s6460_s0 = smov [#allocation47]   ;;  %s6461_s11 = smov [#allocation50]  }
 0x17a   : > { %s1347_s16 = sshll.u32 %s6460_s0, 4  ;;  %s1371_s19 = sshll.u32 %s6461_s11, 4  ;;  %s1348_s16 = int_to_ptr.vmem [resolvable:$true] %s1347_s16  ;;  %s1372_s19 = int_to_ptr.vmem [resolvable:$true] %s1371_s19 }
 0x17b   : > { %s5644_s1 = scalar_lea.hbm %s7862_s24, 4096 }
 0x17c   : > { %p5645_p1 = scmp.ne.s32.totalorder %s7862_s24, %s5644_s1  ;;  %p5650_p4 = scmp.lt.u32.totalorder %s5644_s1, %s7862_s24 }
 0x17e   : > { %p5646_p2 = pnand %p5645_p1, %p7813_p10 }
 0x180   : > { %p5647_p3 = pneg %p5646_p2 }
 0x182   : > { %p5652_p5 = pnand %p5650_p4, %p5647_p3 }
 0x184   : > { %5655 = shalt.err (!%p5652_p5)
}
 0x185   : > { %s5656_s15 = scalar_lea.vmem %s1348_s16, 4096  ;;  %p5663_p7 = scmp.lt.s32.totalorder %s1348_s16, %s1348_s16 }
 0x186   : > { %p5657_p13 = scmp.ne.s32.totalorder %s1348_s16, %s5656_s15  ;;  %p5664_p9 = scmp.lt.s32.totalorder %s5656_s15, %s5656_s15 }
 0x188   : > { %p5658_p0 = pnand %p5657_p13, %p7813_p10  ;;  %p5665_p11 = por %p5664_p9, %p5663_p7 }
 0x18a   : > { %p5659_p6 = pneg %p5658_p0 }
 0x18c   : > { %p5666_p12 = pnand %p5665_p11, %p5659_p6 }
 0x18e   : > { %5669 = shalt.err (!%p5666_p12)
}
 0x18f   : > { %4987 = dma.hbm_to_vmem [thread:$0]  (%p7813_p10), %s7862_s24, 4096, %s1348_s16, [#allocation48], %s7801_s29, %s7801_s29, %s7803_s12  }
 0x190   : > { %s5670_s8 = scalar_lea.hbm %s7868_s14, 2048 }
 0x191   : > { %p5671_p1 = scmp.ne.s32.totalorder %s7868_s14, %s5670_s8  ;;  %p5676_p4 = scmp.lt.u32.totalorder %s5670_s8, %s7868_s14 }
 0x193   : > { %p5672_p2 = pnand %p5671_p1, %p7813_p10 }
 0x195   : > { %p5673_p3 = pneg %p5672_p2 }
 0x197   : > { %p5678_p5 = pnand %p5676_p4, %p5673_p3 }
 0x199   : > { %5681 = shalt.err (!%p5678_p5)
}
 0x19a   : > { %s5682_s0 = scalar_lea.vmem %s1372_s19, 2048  ;;  %p5689_p7 = scmp.lt.s32.totalorder %s1372_s19, %s1372_s19 }
 0x19b   : > { %p5683_p13 = scmp.ne.s32.totalorder %s1372_s19, %s5682_s0  ;;  %p5690_p9 = scmp.lt.s32.totalorder %s5682_s0, %s5682_s0 }
 0x19d   : > { %p5684_p0 = pnand %p5683_p13, %p7813_p10  ;;  %p5691_p11 = por %p5690_p9, %p5689_p7 }
 0x19f   : > { %p5685_p6 = pneg %p5684_p0 }
 0x1a1   : > { %p5692_p12 = pnand %p5691_p11, %p5685_p6 }
 0x1a3   : > { %5695 = shalt.err (!%p5692_p12)
}
 0x1a4   : > { %s7881_s16 = sld [smem:[#allocation113_spill]]  ;;  %s6462_s11 = smov [#allocation53]  }
 0x1a5   : > { %4991 = dma.hbm_to_vmem [thread:$0]  (%p7813_p10), %s7868_s14, 2048, %s1372_s19, [#allocation51], %s7801_s29, %s7801_s29, %s7803_s12  }
 0x1a6   : > { %s1399_s1 = sshll.u32 %s6462_s11, 4  ;;  %s6463_s15 = smov [#allocation56]   ;;  %s1400_s1 = int_to_ptr.vmem [resolvable:$true] %s1399_s1 }
 0x1a7   : > { %s1422_s8 = sshll.u32 %s6463_s15, 4  ;;  %s1423_s8 = int_to_ptr.vmem [resolvable:$true] %s1422_s8 }
 0x1aa   : > { %s5696_s0 = scalar_lea.hbm %s7881_s16, 16 }
 0x1ab   : > { %p5697_p1 = scmp.ne.s32.totalorder %s7881_s16, %s5696_s0  ;;  %p5702_p4 = scmp.lt.u32.totalorder %s5696_s0, %s7881_s16 }
 0x1ad   : > { %p5698_p2 = pnand %p5697_p1, %p7813_p10 }
 0x1af   : > { %p5699_p3 = pneg %p5698_p2 }
 0x1b1   : > { %p5704_p5 = pnand %p5702_p4, %p5699_p3 }
 0x1b3   : > { %5707 = shalt.err (!%p5704_p5)
}
 0x1b4   : > { %s5708_s6 = scalar_lea.vmem %s1400_s1, 16  ;;  %s5714_s19 = scalar_lea.vmem %s1400_s1, 32 }
 0x1b5   : > { %p5709_p13 = scmp.ne.s32.totalorder %s1400_s1, %s5708_s6  ;;  %p5715_p7 = scmp.lt.s32.totalorder %s1400_s1, %s1400_s1 }
 0x1b6   : > { %p5716_p9 = scmp.lt.s32.totalorder %s5714_s19, %s5708_s6 }
 0x1b7   : > { %p5710_p0 = pnand %p5709_p13, %p7813_p10 }
 0x1b8   : > { %p5717_p11 = por %p5716_p9, %p5715_p7 }
 0x1b9   : > { %p5711_p6 = pneg %p5710_p0 }
 0x1bb   : > { %p5718_p12 = pnand %p5717_p11, %p5711_p6 }
 0x1bd   : > { %5721 = shalt.err (!%p5718_p12)
}
 0x1be   : > { %4995 = dma.hbm_to_vmem [thread:$0]  (%p7813_p10), %s7881_s16, 16, %s1400_s1, [#allocation54]  }
 0x1bf   : > { %s5722_s11 = scalar_lea.hbm %s7867_s3, 768 }
 0x1c0   : > { %p5723_p1 = scmp.ne.s32.totalorder %s7867_s3, %s5722_s11  ;;  %p5728_p4 = scmp.lt.u32.totalorder %s5722_s11, %s7867_s3 }
 0x1c2   : > { %p5724_p2 = pnand %p5723_p1, %p7813_p10 }
 0x1c4   : > { %p5725_p3 = pneg %p5724_p2 }
 0x1c6   : > { %p5730_p5 = pnand %p5728_p4, %p5725_p3 }
 0x1c8   : > { %5733 = shalt.err (!%p5730_p5)
}
 0x1c9   : > { %s5734_s6 = scalar_lea.vmem %s1423_s8, 768  ;;  %p5741_p7 = scmp.lt.s32.totalorder %s1423_s8, %s1423_s8 }
 0x1ca   : > { %p5735_p13 = scmp.ne.s32.totalorder %s1423_s8, %s5734_s6  ;;  %p5742_p9 = scmp.lt.s32.totalorder %s5734_s6, %s5734_s6 }
 0x1cc   : > { %p5736_p0 = pnand %p5735_p13, %p7813_p10  ;;  %p5743_p11 = por %p5742_p9, %p5741_p7 }
 0x1ce   : > { %p5737_p6 = pneg %p5736_p0 }
 0x1d0   : > { %p5744_p12 = pnand %p5743_p11, %p5737_p6 }
 0x1d2   : > { %5747 = shalt.err (!%p5744_p12)
}
 0x1d3   : > { %s7882_s1 = sld [smem:[#allocation80_spill]]  ;;  %s6464_s0 = smov [#allocation8]  }
 0x1d4   : > { %4999 = dma.hbm_to_vmem [thread:$0]  (%p7813_p10), %s7867_s3, 768, %s1423_s8, [#allocation57], %s7801_s29, %s7801_s29, %s7803_s12  }
 0x1d5   : > { %s1041_s19 = sshll.u32 %s6464_s0, 4  ;;  %s6465_s11 = smov [#allocation13]   ;;  %s1042_s19 = int_to_ptr.vmem [resolvable:$true] %s1041_s19 }
 0x1d6   : > { %s1057_s13 = sshll.u32 %s6465_s11, 4  ;;  %s6990_s13 = int_to_ptr.vmem [resolvable:$true] %s1057_s13 }
 0x1d9   : > { %s7883_s15 = smov %s7882_s1  ;;  %s5748_s6 = scalar_lea.hbm %s7882_s1, 256 }
 0x1da   : > { %p5749_p1 = scmp.ne.s32.totalorder %s7883_s15, %s5748_s6  ;;  %p5754_p4 = scmp.lt.u32.totalorder %s5748_s6, %s7883_s15 }
 0x1dc   : > { %p5750_p2 = pnand %p5749_p1, %p7813_p10 }
 0x1de   : > { %p5751_p3 = pneg %p5750_p2 }
 0x1e0   : > { %p5756_p5 = pnand %p5754_p4, %p5751_p3 }
 0x1e2   : > { %5759 = shalt.err (!%p5756_p5)
}
 0x1e3   : > { %s5760_s14 = scalar_lea.vmem %s1042_s19, 256  ;;  %p5767_p7 = scmp.lt.s32.totalorder %s1042_s19, %s1042_s19 }
 0x1e4   : > { %p5761_p13 = scmp.ne.s32.totalorder %s1042_s19, %s5760_s14  ;;  %p5768_p9 = scmp.lt.s32.totalorder %s5760_s14, %s5760_s14 }
 0x1e6   : > { %p5762_p0 = pnand %p5761_p13, %p7813_p10  ;;  %p5769_p11 = por %p5768_p9, %p5767_p7 }
 0x1e8   : > { %p5763_p6 = pneg %p5762_p0 }
 0x1ea   : > { %p5770_p12 = pnand %p5769_p11, %p5763_p6 }
 0x1ec   : > { %5773 = shalt.err (!%p5770_p12)
}
 0x1ed   : > { %s7884_s8 = sld [smem:[#allocation85_spill]] }
 0x1ee   : > { %4939 = dma.hbm_to_vmem [thread:$0]  (%p7813_p10), %s7883_s15, 256, %s1042_s19, [#allocation9]  }
 0x1f3   : > { %s5774_s1 = scalar_lea.hbm %s7884_s8, 2048 }
 0x1f4   : > { %p5775_p1 = scmp.ne.s32.totalorder %s7884_s8, %s5774_s1  ;;  %p5780_p4 = scmp.lt.u32.totalorder %s5774_s1, %s7884_s8 }
 0x1f6   : > { %p5776_p2 = pnand %p5775_p1, %p7813_p10 }
 0x1f8   : > { %p5777_p3 = pneg %p5776_p2 }
 0x1fa   : > { %p5782_p5 = pnand %p5780_p4, %p5777_p3 }
 0x1fc   : > { %5785 = shalt.err (!%p5782_p5)
}
 0x1fd   : > { %s5786_s14 = scalar_lea.vmem %s6990_s13, 2048  ;;  %p5793_p7 = scmp.lt.s32.totalorder %s6990_s13, %s6990_s13 }
 0x1fe   : > { %p5787_p13 = scmp.ne.s32.totalorder %s6990_s13, %s5786_s14  ;;  %p5794_p9 = scmp.lt.s32.totalorder %s5786_s14, %s5786_s14 }
 0x200   : > { %p5788_p0 = pnand %p5787_p13, %p7813_p10  ;;  %p5795_p11 = por %p5794_p9, %p5793_p7 }
 0x202   : > { %p5789_p6 = pneg %p5788_p0 }
 0x204   : > { %p5796_p12 = pnand %p5795_p11, %p5789_p6 }
 0x206   : > { %5799 = shalt.err (!%p5796_p12)
}
 0x207   : > { %s7885_s0 = sld [smem:[#allocation88_spill]]  ;;  %s6466_s11 = smov [#allocation16]  }
 0x208   : > { %4941 = dma.hbm_to_vmem [thread:$0]  (%p7813_p10), %s7884_s8, 2048, %s6990_s13, [#allocation12], %s7801_s29, %s7801_s29, %s7803_s12  }
 0x209   : > { %s1084_s6 = sshll.u32 %s6466_s11, 4  ;;  %s6467_s1 = smov [#allocation19]   ;;  %s1085_s6 = int_to_ptr.vmem [resolvable:$true] %s1084_s6 }
 0x20a   : > { %s1108_s3 = sshll.u32 %s6467_s1, 4  ;;  %s7020_s3 = int_to_ptr.vmem [resolvable:$true] %s1108_s3 }
 0x20d   : > { %s7886_s19 = smov %s7885_s0  ;;  %s5800_s14 = scalar_lea.hbm %s7885_s0, 2048 }
 0x20e   : > { %p5801_p1 = scmp.ne.s32.totalorder %s7886_s19, %s5800_s14  ;;  %p5806_p4 = scmp.lt.u32.totalorder %s5800_s14, %s7886_s19 }
 0x210   : > { %p5802_p2 = pnand %p5801_p1, %p7813_p10 }
 0x212   : > { %p5803_p3 = pneg %p5802_p2 }
 0x214   : > { %p5808_p5 = pnand %p5806_p4, %p5803_p3 }
 0x216   : > { %5811 = shalt.err (!%p5808_p5)
}
 0x217   : > { %s5812_s15 = scalar_lea.vmem %s1085_s6, 2048  ;;  %p5819_p7 = scmp.lt.s32.totalorder %s1085_s6, %s1085_s6 }
 0x218   : > { %p5813_p13 = scmp.ne.s32.totalorder %s1085_s6, %s5812_s15  ;;  %p5820_p9 = scmp.lt.s32.totalorder %s5812_s15, %s5812_s15 }
 0x21a   : > { %p5814_p0 = pnand %p5813_p13, %p7813_p10  ;;  %p5821_p11 = por %p5820_p9, %p5819_p7 }
 0x21c   : > { %p5815_p6 = pneg %p5814_p0 }
 0x21e   : > { %p5822_p12 = pnand %p5821_p11, %p5815_p6 }
 0x220   : > { %5825 = shalt.err (!%p5822_p12)
}
 0x221   : > { %s7887_s13 = sld [smem:[#allocation90_spill]] }
 0x222   : > { %4945 = dma.hbm_to_vmem [thread:$0]  (%p7813_p10), %s7886_s19, 2048, %s1085_s6, [#allocation15], %s7801_s29, %s7801_s29, %s7803_s12  }
 0x227   : > { %s5826_s0 = scalar_lea.hbm %s7887_s13, 2048 }
 0x228   : > { %p5827_p1 = scmp.ne.s32.totalorder %s7887_s13, %s5826_s0  ;;  %p5832_p4 = scmp.lt.u32.totalorder %s5826_s0, %s7887_s13 }
 0x22a   : > { %p5828_p2 = pnand %p5827_p1, %p7813_p10 }
 0x22c   : > { %p5829_p3 = pneg %p5828_p2 }
 0x22e   : > { %p5834_p5 = pnand %p5832_p4, %p5829_p3 }
 0x230   : > { %5837 = shalt.err (!%p5834_p5)
}
 0x231   : > { %s5838_s15 = scalar_lea.vmem %s7020_s3, 2048  ;;  %p5845_p7 = scmp.lt.s32.totalorder %s7020_s3, %s7020_s3 }
 0x232   : > { %p5839_p13 = scmp.ne.s32.totalorder %s7020_s3, %s5838_s15  ;;  %p5846_p9 = scmp.lt.s32.totalorder %s5838_s15, %s5838_s15 }
 0x234   : > { %p5840_p0 = pnand %p5839_p13, %p7813_p10  ;;  %p5847_p11 = por %p5846_p9, %p5845_p7 }
 0x236   : > { %p5841_p6 = pneg %p5840_p0 }
 0x238   : > { %p5848_p12 = pnand %p5847_p11, %p5841_p6 }
 0x23a   : > { %5851 = shalt.err (!%p5848_p12)
}
 0x23b   : > { %s7888_s11 = sld [smem:[#allocation91_spill]]  ;;  %s6468_s6 = smov [#allocation22]  }
 0x23c   : > { %4949 = dma.hbm_to_vmem [thread:$0]  (%p7813_p10), %s7887_s13, 2048, %s7020_s3, [#allocation18], %s7801_s29, %s7801_s29, %s7803_s12  }
 0x23d   : > { %s1132_s1 = sshll.u32 %s6468_s6, 4  ;;  %s6469_s14 = smov [#allocation25]   ;;  %s1133_s1 = int_to_ptr.vmem [resolvable:$true] %s1132_s1 }
 0x23e   : > { %s1156_s0 = sshll.u32 %s6469_s14, 4  ;;  %s7053_s0 = int_to_ptr.vmem [resolvable:$true] %s1156_s0 }
 0x241   : > { %s5852_s15 = scalar_lea.hbm %s7888_s11, 2048 }
 0x242   : > { %p5853_p1 = scmp.ne.s32.totalorder %s7888_s11, %s5852_s15  ;;  %p5858_p4 = scmp.lt.u32.totalorder %s5852_s15, %s7888_s11 }
 0x244   : > { %p5854_p2 = pnand %p5853_p1, %p7813_p10 }
 0x246   : > { %p5855_p3 = pneg %p5854_p2 }
 0x248   : > { %p5860_p5 = pnand %p5858_p4, %p5855_p3 }
 0x24a   : > { %5863 = shalt.err (!%p5860_p5)
}
 0x24b   : > { %s5864_s8 = scalar_lea.vmem %s1133_s1, 2048  ;;  %p5871_p7 = scmp.lt.s32.totalorder %s1133_s1, %s1133_s1 }
 0x24c   : > { %p5865_p13 = scmp.ne.s32.totalorder %s1133_s1, %s5864_s8  ;;  %p5872_p9 = scmp.lt.s32.totalorder %s5864_s8, %s5864_s8 }
 0x24e   : > { %p5866_p0 = pnand %p5865_p13, %p7813_p10  ;;  %p5873_p11 = por %p5872_p9, %p5871_p7 }
 0x250   : > { %p5867_p6 = pneg %p5866_p0 }
 0x252   : > { %p5874_p12 = pnand %p5873_p11, %p5867_p6 }
 0x254   : > { %5877 = shalt.err (!%p5874_p12)
}
 0x255   : > { %s7889_s3 = sld [smem:[#allocation93_spill]] }
 0x256   : > { %4953 = dma.hbm_to_vmem [thread:$0]  (%p7813_p10), %s7888_s11, 2048, %s1133_s1, [#allocation21], %s7801_s29, %s7801_s29, %s7803_s12  }
 0x25b   : > { %s5878_s6 = scalar_lea.hbm %s7889_s3, 2048 }
 0x25c   : > { %p5879_p1 = scmp.ne.s32.totalorder %s7889_s3, %s5878_s6  ;;  %p5884_p4 = scmp.lt.u32.totalorder %s5878_s6, %s7889_s3 }
 0x25e   : > { %p5880_p2 = pnand %p5879_p1, %p7813_p10 }
 0x260   : > { %p5881_p3 = pneg %p5880_p2 }
 0x262   : > { %p5886_p5 = pnand %p5884_p4, %p5881_p3 }
 0x264   : > { %5889 = shalt.err (!%p5886_p5)
}
 0x265   : > { %s5890_s8 = scalar_lea.vmem %s7053_s0, 2048  ;;  %p5897_p7 = scmp.lt.s32.totalorder %s7053_s0, %s7053_s0 }
 0x266   : > { %p5891_p13 = scmp.ne.s32.totalorder %s7053_s0, %s5890_s8  ;;  %p5898_p9 = scmp.lt.s32.totalorder %s5890_s8, %s5890_s8 }
 0x268   : > { %p5892_p0 = pnand %p5891_p13, %p7813_p10  ;;  %p5899_p11 = por %p5898_p9, %p5897_p7 }
 0x26a   : > { %p5893_p6 = pneg %p5892_p0 }
 0x26c   : > { %p5900_p12 = pnand %p5899_p11, %p5893_p6 }
 0x26e   : > { %5903 = shalt.err (!%p5900_p12)
}
 0x26f   : > { %s7890_s1 = sld [smem:[#allocation95_spill]]  ;;  %s6470_s15 = smov [#allocation28]  }
 0x270   : > { %4957 = dma.hbm_to_vmem [thread:$0]  (%p7813_p10), %s7889_s3, 2048, %s7053_s0, [#allocation24], %s7801_s29, %s7801_s29, %s7803_s12  }
 0x271   : > { %s1184_s6 = sshll.u32 %s6470_s15, 4  ;;  %s6471_s11 = smov [#allocation31]   ;;  %s1185_s6 = int_to_ptr.vmem [resolvable:$true] %s1184_s6 }
 0x272   : > { %s1210_s13 = sshll.u32 %s6471_s11, 4  ;;  %s7086_s13 = int_to_ptr.vmem [resolvable:$true] %s1210_s13 }
 0x275   : > { %s7891_s14 = smov %s7890_s1  ;;  %s5904_s8 = scalar_lea.hbm %s7890_s1, 16 }
 0x276   : > { %p5905_p1 = scmp.ne.s32.totalorder %s7891_s14, %s5904_s8  ;;  %p5910_p4 = scmp.lt.u32.totalorder %s5904_s8, %s7891_s14 }
 0x278   : > { %p5906_p2 = pnand %p5905_p1, %p7813_p10 }
 0x27a   : > { %p5907_p3 = pneg %p5906_p2 }
 0x27c   : > { %p5912_p5 = pnand %p5910_p4, %p5907_p3 }
 0x27e   : > { %5915 = shalt.err (!%p5912_p5)
}
 0x27f   : > { %s5916_s16 = scalar_lea.vmem %s1185_s6, 16  ;;  %s5922_s0 = scalar_lea.vmem %s1185_s6, 32 }
 0x280   : > { %p5917_p13 = scmp.ne.s32.totalorder %s1185_s6, %s5916_s16  ;;  %p5923_p7 = scmp.lt.s32.totalorder %s1185_s6, %s1185_s6 }
 0x281   : > { %p5924_p9 = scmp.lt.s32.totalorder %s5922_s0, %s5916_s16 }
 0x282   : > { %p5918_p0 = pnand %p5917_p13, %p7813_p10 }
 0x283   : > { %p5925_p11 = por %p5924_p9, %p5923_p7 }
 0x284   : > { %p5919_p6 = pneg %p5918_p0 }
 0x286   : > { %p5926_p12 = pnand %p5925_p11, %p5919_p6 }
 0x288   : > { %5929 = shalt.err (!%p5926_p12)
}
 0x289   : > { %s7892_s11 = sld [smem:[#allocation97_spill]] }
 0x28a   : > { %4961 = dma.hbm_to_vmem [thread:$0]  (%p7813_p10), %s7891_s14, 16, %s1185_s6, [#allocation27]  }
 0x28f   : > { %s5930_s1 = scalar_lea.hbm %s7892_s11, 384 }
 0x290   : > { %p5931_p1 = scmp.ne.s32.totalorder %s7892_s11, %s5930_s1  ;;  %p5936_p4 = scmp.lt.u32.totalorder %s5930_s1, %s7892_s11 }
 0x292   : > { %p5932_p2 = pnand %p5931_p1, %p7813_p10 }
 0x294   : > { %p5933_p3 = pneg %p5932_p2 }
 0x296   : > { %p5938_p5 = pnand %p5936_p4, %p5933_p3 }
 0x298   : > { %5941 = shalt.err (!%p5938_p5)
}
 0x299   : > { %s5942_s16 = scalar_lea.vmem %s7086_s13, 384  ;;  %p5949_p7 = scmp.lt.s32.totalorder %s7086_s13, %s7086_s13 }
 0x29a   : > { %p5943_p13 = scmp.ne.s32.totalorder %s7086_s13, %s5942_s16  ;;  %p5950_p9 = scmp.lt.s32.totalorder %s5942_s16, %s5942_s16 }
 0x29c   : > { %p5944_p0 = pnand %p5943_p13, %p7813_p10  ;;  %p5951_p11 = por %p5950_p9, %p5949_p7 }
 0x29e   : > { %p5945_p6 = pneg %p5944_p0 }
 0x2a0   : > { %p5952_p12 = pnand %p5951_p11, %p5945_p6 }
 0x2a2   : > { %5955 = shalt.err (!%p5952_p12)
}
 0x2a3   : > { %s7893_s15 = sld [smem:[#allocation99_spill]]  ;;  %s6472_s6 = smov [#allocation34]  }
 0x2a4   : > { %4965 = dma.hbm_to_vmem [thread:$0]  (%p7813_p10), %s7892_s11, 384, %s7086_s13, [#allocation30], %s7801_s29, %s7801_s29, %s7803_s12  }
 0x2a5   : > { %s1236_s8 = sshll.u32 %s6472_s6, 4  ;;  %s6473_s0 = smov [#allocation37]   ;;  %s1237_s8 = int_to_ptr.vmem [resolvable:$true] %s1236_s8 }
 0x2a6   : > { %s1263_s1 = sshll.u32 %s6473_s0, 4  ;;  %s7116_s1 = int_to_ptr.vmem [resolvable:$true] %s1263_s1 }
 0x2a9   : > { %s5956_s16 = scalar_lea.hbm %s7893_s15, 2048 }
 0x2aa   : > { %p5957_p1 = scmp.ne.s32.totalorder %s7893_s15, %s5956_s16  ;;  %p5962_p4 = scmp.lt.u32.totalorder %s5956_s16, %s7893_s15 }
 0x2ac   : > { %p5958_p2 = pnand %p5957_p1, %p7813_p10 }
 0x2ae   : > { %p5959_p3 = pneg %p5958_p2 }
 0x2b0   : > { %p5964_p5 = pnand %p5962_p4, %p5959_p3 }
 0x2b2   : > { %5967 = shalt.err (!%p5964_p5)
}
 0x2b3   : > { %s5968_s3 = scalar_lea.vmem %s1237_s8, 2048  ;;  %p5975_p7 = scmp.lt.s32.totalorder %s1237_s8, %s1237_s8 }
 0x2b4   : > { %p5969_p13 = scmp.ne.s32.totalorder %s1237_s8, %s5968_s3  ;;  %p5976_p9 = scmp.lt.s32.totalorder %s5968_s3, %s5968_s3 }
 0x2b6   : > { %p5970_p0 = pnand %p5969_p13, %p7813_p10  ;;  %p5977_p11 = por %p5976_p9, %p5975_p7 }
 0x2b8   : > { %p5971_p6 = pneg %p5970_p0 }
 0x2ba   : > { %p5978_p12 = pnand %p5977_p11, %p5971_p6 }
 0x2bc   : > { %5981 = shalt.err (!%p5978_p12)
}
 0x2bd   : > { %s7894_s13 = sld [smem:[#allocation101_spill]] }
 0x2be   : > { %4969 = dma.hbm_to_vmem [thread:$0]  (%p7813_p10), %s7893_s15, 2048, %s1237_s8, [#allocation33], %s7801_s29, %s7801_s29, %s7803_s12  }
 0x2c3   : > { %s5982_s6 = scalar_lea.hbm %s7894_s13, 16 }
 0x2c4   : > { %p5983_p1 = scmp.ne.s32.totalorder %s7894_s13, %s5982_s6  ;;  %p5988_p4 = scmp.lt.u32.totalorder %s5982_s6, %s7894_s13 }
 0x2c6   : > { %p5984_p2 = pnand %p5983_p1, %p7813_p10 }
 0x2c8   : > { %p5985_p3 = pneg %p5984_p2 }
 0x2ca   : > { %p5990_p5 = pnand %p5988_p4, %p5985_p3 }
 0x2cc   : > { %5993 = shalt.err (!%p5990_p5)
}
 0x2cd   : > { %s5994_s3 = scalar_lea.vmem %s7116_s1, 16  ;;  %s6000_s0 = scalar_lea.vmem %s7116_s1, 32 }
 0x2ce   : > { %p5995_p13 = scmp.ne.s32.totalorder %s7116_s1, %s5994_s3  ;;  %p6001_p7 = scmp.lt.s32.totalorder %s7116_s1, %s7116_s1 }
 0x2cf   : > { %p6002_p9 = scmp.lt.s32.totalorder %s6000_s0, %s5994_s3 }
 0x2d0   : > { %p5996_p0 = pnand %p5995_p13, %p7813_p10 }
 0x2d1   : > { %p6003_p11 = por %p6002_p9, %p6001_p7 }
 0x2d2   : > { %p5997_p6 = pneg %p5996_p0 }
 0x2d4   : > { %p6004_p12 = pnand %p6003_p11, %p5997_p6 }
 0x2d6   : > { %6007 = shalt.err (!%p6004_p12)
}
 0x2d7   : > { %s7895_s8 = sld [smem:[#allocation103_spill]]  ;;  %s6474_s16 = smov [#allocation40]  }
 0x2d8   : > { %4973 = dma.hbm_to_vmem [thread:$0]  (%p7813_p10), %s7894_s13, 16, %s7116_s1, [#allocation36]  }
 0x2d9   : > { %s1287_s6 = sshll.u32 %s6474_s16, 4  ;;  %s6475_s29 = smov [#allocation43]   ;;  %s1288_s6 = int_to_ptr.vmem [resolvable:$true] %s1287_s6 }
 0x2da   : > { %s1311_s12 = sshll.u32 %s6475_s29, 4  ;;  %s7147_s12 = int_to_ptr.vmem [resolvable:$true] %s1311_s12 }
 0x2dd   : > { %s6008_s3 = scalar_lea.hbm %s7895_s8, 16 }
 0x2de   : > { %p6009_p1 = scmp.ne.s32.totalorder %s7895_s8, %s6008_s3  ;;  %p6014_p4 = scmp.lt.u32.totalorder %s6008_s3, %s7895_s8 }
 0x2e0   : > { %p6010_p2 = pnand %p6009_p1, %p7813_p10 }
 0x2e2   : > { %p6011_p3 = pneg %p6010_p2 }
 0x2e4   : > { %p6016_p5 = pnand %p6014_p4, %p6011_p3 }
 0x2e6   : > { %6019 = shalt.err (!%p6016_p5)
}
 0x2e7   : > { %s6020_s0 = scalar_lea.vmem %s1288_s6, 16  ;;  %s6026_s1 = scalar_lea.vmem %s1288_s6, 32 }
 0x2e8   : > { %p6021_p13 = scmp.ne.s32.totalorder %s1288_s6, %s6020_s0  ;;  %p6027_p7 = scmp.lt.s32.totalorder %s1288_s6, %s1288_s6 }
 0x2e9   : > { %p6028_p9 = scmp.lt.s32.totalorder %s6026_s1, %s6020_s0 }
 0x2ea   : > { %p6022_p0 = pnand %p6021_p13, %p7813_p10 }
 0x2eb   : > { %p6029_p11 = por %p6028_p9, %p6027_p7 }
 0x2ec   : > { %p6023_p6 = pneg %p6022_p0 }
 0x2ee   : > { %p6030_p12 = pnand %p6029_p11, %p6023_p6 }
 0x2f0   : > { %6033 = shalt.err (!%p6030_p12)
}
 0x2f1   : > { %s7896_s29 = sld [smem:[#allocation105_spill]] }
 0x2f2   : > { %4977 = dma.hbm_to_vmem [thread:$0]  (%p7813_p10), %s7895_s8, 16, %s1288_s6, [#allocation39]  }
 0x2f7   : > { %s6034_s16 = scalar_lea.hbm %s7896_s29, 16 }
 0x2f8   : > { %p6035_p1 = scmp.ne.s32.totalorder %s7896_s29, %s6034_s16  ;;  %p6040_p4 = scmp.lt.u32.totalorder %s6034_s16, %s7896_s29 }
 0x2fa   : > { %p6036_p2 = pnand %p6035_p1, %p7813_p10 }
 0x2fc   : > { %p6037_p3 = pneg %p6036_p2 }
 0x2fe   : > { %p6042_p5 = pnand %p6040_p4, %p6037_p3 }
 0x300   : > { %6045 = shalt.err (!%p6042_p5)
}
 0x301   : > { %s6046_s3 = scalar_lea.vmem %s7147_s12, 16  ;;  %s6052_s0 = scalar_lea.vmem %s7147_s12, 32 }
 0x302   : > { %p6047_p13 = scmp.ne.s32.totalorder %s7147_s12, %s6046_s3  ;;  %p6053_p7 = scmp.lt.s32.totalorder %s7147_s12, %s7147_s12 }
 0x303   : > { %p6054_p9 = scmp.lt.s32.totalorder %s6052_s0, %s6046_s3 }
 0x304   : > { %p6048_p0 = pnand %p6047_p13, %p7813_p10 }
 0x305   : > { %p6055_p11 = por %p6054_p9, %p6053_p7 }
 0x306   : > { %p6049_p6 = pneg %p6048_p0 }
 0x308   : > { %p6056_p12 = pnand %p6055_p11, %p6049_p6 }
 0x30a   : > { %6059 = shalt.err (!%p6056_p12)
}
 0x30b   : > { %s7897_s6 = sld [smem:[#allocation107_spill]]  ;;  %s6476_s1 = smov [#allocation46]  }
 0x30c   : > { %4981 = dma.hbm_to_vmem [thread:$0]  (%p7813_p10), %s7896_s29, 16, %s7147_s12, [#allocation42]  }
 0x30d   : > { %s1334_s16 = sshll.u32 %s6476_s1, 4  ;;  %s6477_s8 = smov [#allocation49]   ;;  %s1335_s16 = int_to_ptr.vmem [resolvable:$true] %s1334_s16 }
 0x30e   : > { %s1361_s11 = sshll.u32 %s6477_s8, 4  ;;  %s7175_s11 = int_to_ptr.vmem [resolvable:$true] %s1361_s11 }
 0x311   : > { %s6060_s3 = scalar_lea.hbm %s7897_s6, 2048 }
 0x312   : > { %p6061_p1 = scmp.ne.s32.totalorder %s7897_s6, %s6060_s3  ;;  %p6066_p4 = scmp.lt.u32.totalorder %s6060_s3, %s7897_s6 }
 0x314   : > { %p6062_p2 = pnand %p6061_p1, %p7813_p10 }
 0x316   : > { %p6063_p3 = pneg %p6062_p2 }
 0x318   : > { %p6068_p5 = pnand %p6066_p4, %p6063_p3 }
 0x31a   : > { %6071 = shalt.err (!%p6068_p5)
}
 0x31b   : > { %s6072_s0 = scalar_lea.vmem %s1335_s16, 2048  ;;  %p6079_p7 = scmp.lt.s32.totalorder %s1335_s16, %s1335_s16 }
 0x31c   : > { %p6073_p13 = scmp.ne.s32.totalorder %s1335_s16, %s6072_s0  ;;  %p6080_p9 = scmp.lt.s32.totalorder %s6072_s0, %s6072_s0 }
 0x31e   : > { %p6074_p0 = pnand %p6073_p13, %p7813_p10  ;;  %p6081_p11 = por %p6080_p9, %p6079_p7 }
 0x320   : > { %p6075_p6 = pneg %p6074_p0 }
 0x322   : > { %p6082_p12 = pnand %p6081_p11, %p6075_p6 }
 0x324   : > { %6085 = shalt.err (!%p6082_p12)
}
 0x325   : > { %s7898_s12 = smov 8   ;;  %s7899_s8 = smov 128  }
 0x326   : > { %s7900_s1 = sld [smem:[#allocation109_spill]] }
 0x327   : > { %4985 = dma.hbm_to_vmem [thread:$0]  (%p7813_p10), %s7897_s6, 2048, %s1335_s16, [#allocation45], %s7899_s8, %s7899_s8, %s7898_s12  }
 0x32c   : > { %s7901_s3 = smov %s7900_s1  ;;  %s6086_s13 = scalar_lea.hbm %s7900_s1, 16 }
 0x32d   : > { %p6087_p1 = scmp.ne.s32.totalorder %s7901_s3, %s6086_s13  ;;  %p6092_p4 = scmp.lt.u32.totalorder %s6086_s13, %s7901_s3 }
 0x32f   : > { %p6088_p2 = pnand %p6087_p1, %p7813_p10 }
 0x331   : > { %p6089_p3 = pneg %p6088_p2 }
 0x333   : > { %p6094_p5 = pnand %p6092_p4, %p6089_p3 }
 0x335   : > { %6097 = shalt.err (!%p6094_p5)
}
 0x336   : > { %s6098_s0 = scalar_lea.vmem %s7175_s11, 16  ;;  %s6104_s14 = scalar_lea.vmem %s7175_s11, 32 }
 0x337   : > { %p6099_p13 = scmp.ne.s32.totalorder %s7175_s11, %s6098_s0  ;;  %p6105_p7 = scmp.lt.s32.totalorder %s7175_s11, %s7175_s11 }
 0x338   : > { %p6106_p9 = scmp.lt.s32.totalorder %s6104_s14, %s6098_s0 }
 0x339   : > { %p6100_p0 = pnand %p6099_p13, %p7813_p10 }
 0x33a   : > { %p6107_p11 = por %p6106_p9, %p6105_p7 }
 0x33b   : > { %p6101_p6 = pneg %p6100_p0 }
 0x33d   : > { %p6108_p12 = pnand %p6107_p11, %p6101_p6 }
 0x33f   : > { %6111 = shalt.err (!%p6108_p12)
}
 0x340   : > { %s7902_s13 = sld [smem:[#allocation111_spill]]  ;;  %s6478_s16 = smov [#allocation52]  }
 0x341   : > { %4989 = dma.hbm_to_vmem [thread:$0]  (%p7813_p10), %s7901_s3, 16, %s7175_s11, [#allocation48]  }
 0x342   : > { %s1385_s1 = sshll.u32 %s6478_s16, 4  ;;  %s6479_s6 = smov [#allocation55]   ;;  %s1386_s1 = int_to_ptr.vmem [resolvable:$true] %s1385_s1 }
 0x343   : > { %s1409_s15 = sshll.u32 %s6479_s6, 4  ;;  %s7206_s15 = int_to_ptr.vmem [resolvable:$true] %s1409_s15 }
 0x346   : > { %s6112_s14 = scalar_lea.hbm %s7902_s13, 16 }
 0x347   : > { %p6113_p1 = scmp.ne.s32.totalorder %s7902_s13, %s6112_s14  ;;  %p6118_p4 = scmp.lt.u32.totalorder %s6112_s14, %s7902_s13 }
 0x349   : > { %p6114_p2 = pnand %p6113_p1, %p7813_p10 }
 0x34b   : > { %p6115_p3 = pneg %p6114_p2 }
 0x34d   : > { %p6120_p5 = pnand %p6118_p4, %p6115_p3 }
 0x34f   : > { %6123 = shalt.err (!%p6120_p5)
}
 0x350   : > { %s6124_s0 = scalar_lea.vmem %s1386_s1, 16  ;;  %s6130_s11 = scalar_lea.vmem %s1386_s1, 32 }
 0x351   : > { %p6125_p13 = scmp.ne.s32.totalorder %s1386_s1, %s6124_s0  ;;  %p6131_p7 = scmp.lt.s32.totalorder %s1386_s1, %s1386_s1 }
 0x352   : > { %p6132_p9 = scmp.lt.s32.totalorder %s6130_s11, %s6124_s0 }
 0x353   : > { %p6126_p0 = pnand %p6125_p13, %p7813_p10 }
 0x354   : > { %p6133_p11 = por %p6132_p9, %p6131_p7 }
 0x355   : > { %p6127_p6 = pneg %p6126_p0 }
 0x357   : > { %p6134_p12 = pnand %p6133_p11, %p6127_p6 }
 0x359   : > { %6137 = shalt.err (!%p6134_p12)
}
 0x35a   : > { %s7903_s6 = sld [smem:[#allocation114_spill]] }
 0x35b   : > { %4993 = dma.hbm_to_vmem [thread:$0]  (%p7813_p10), %s7902_s13, 16, %s1386_s1, [#allocation51]  }
 0x360   : > { %s6138_s16 = scalar_lea.hbm %s7903_s6, 768 }
 0x361   : > { %p6139_p1 = scmp.ne.s32.totalorder %s7903_s6, %s6138_s16  ;;  %p6144_p4 = scmp.lt.u32.totalorder %s6138_s16, %s7903_s6 }
 0x363   : > { %p6140_p2 = pnand %p6139_p1, %p7813_p10 }
 0x365   : > { %p6141_p3 = pneg %p6140_p2 }
 0x367   : > { %p6146_p5 = pnand %p6144_p4, %p6141_p3 }
 0x369   : > { %6149 = shalt.err (!%p6146_p5)
}
 0x36a   : > { %s6150_s14 = scalar_lea.vmem %s7206_s15, 768  ;;  %p6157_p7 = scmp.lt.s32.totalorder %s7206_s15, %s7206_s15 }
 0x36b   : > { %p6151_p13 = scmp.ne.s32.totalorder %s7206_s15, %s6150_s14  ;;  %p6158_p9 = scmp.lt.s32.totalorder %s6150_s14, %s6150_s14 }
 0x36d   : > { %p6152_p0 = pnand %p6151_p13, %p7813_p10  ;;  %p6159_p11 = por %p6158_p9, %p6157_p7 }
 0x36f   : > { %p6153_p6 = pneg %p6152_p0 }
 0x371   : > { %p6160_p12 = pnand %p6159_p11, %p6153_p6 }
 0x373   : > { %6163 = shalt.err (!%p6160_p12)
}
 0x374   : > { %4997 = dma.hbm_to_vmem [thread:$0]  (%p7813_p10), %s7903_s6, 768, %s7206_s15, [#allocation54], %s7899_s8, %s7899_s8, %s7898_s12  }
 0x375   : > { %s6480_s1 = smov [#allocation58]   ;;  %s6164_s11 = scalar_lea.hbm %s7866_s7, 4608 }
 0x376   : > { %s1438_s0 = sshll.u32 %s6480_s1, 4  ;;  %p6165_p1 = scmp.ne.s32.totalorder %s7866_s7, %s6164_s11  ;;  %s1439_s0 = int_to_ptr.vmem [resolvable:$true] %s1438_s0 }
 0x377   : > { %p6170_p4 = scmp.lt.u32.totalorder %s6164_s11, %s7866_s7 }
 0x378   : > { %p6166_p2 = pnand %p6165_p1, %p7813_p10 }
 0x37a   : > { %p6167_p3 = pneg %p6166_p2 }
 0x37c   : > { %p6172_p5 = pnand %p6170_p4, %p6167_p3 }
 0x37e   : > { %6175 = shalt.err (!%p6172_p5)
}
 0x37f   : > { %s6176_s16 = scalar_lea.vmem %s1439_s0, 4608  ;;  %p6183_p7 = scmp.lt.s32.totalorder %s1439_s0, %s1439_s0 }
 0x380   : > { %p6177_p13 = scmp.ne.s32.totalorder %s1439_s0, %s6176_s16  ;;  %p6184_p9 = scmp.lt.s32.totalorder %s6176_s16, %s6176_s16 }
 0x382   : > { %p6178_p0 = pnand %p6177_p13, %p7813_p10  ;;  %p6185_p11 = por %p6184_p9, %p6183_p7 }
 0x384   : > { %p6179_p6 = pneg %p6178_p0 }
 0x386   : > { %p6186_p12 = pnand %p6185_p11, %p6179_p6 }
 0x388   : > { %6189 = shalt.err (!%p6186_p12)
}
 0x389   : > { %s6481_s15 = smov 768   ;;  %s6482_s12 = smov 48  }
 0x38a   : > { %5001 = dma.hbm_to_vmem [thread:$0]  (%p7813_p10), %s7866_s7, 4608, %s1439_s0, [#allocation57], %s6481_s15, %s6481_s15, %s6482_s12  }
 0x38b PF: > { %s7904_s8 = sld [smem:[#allocation81_spill]]  ;;  %p5108_p1 = scmp.lt.s32.totalorder %s6394_s2, 8 }
 0x38c   : > { %s1452_s14 = sand.u32 1, %s6394_s2   ;;  %s1454_s1 = sand.u32 1, %s6374_s28  }
 0x38d   : > { %s4293_s11 = sshll.u32 %s1454_s1, 3  ;;  %s4294_s16 = sshll.u32 %s6386_s26, 7 }
 0x38e   : > { %s1456_s0 = scalar_lea.vmem [#allocation11], %s4293_s11  ;;  %p7257_p2 = pnand %p5108_p1, %p6772_p8 }
 0x38f   : > { %s1463_s15 = sshll.u32 %s1456_s0, 4  ;;  %s1453_s6 = scalar_lea.sflag [#allocation12], %s1452_s14  ;;  %s7253_s15 = int_to_ptr.vmem [resolvable:$true] %s1463_s15 }
 0x390   : > { %p6192_p4 = pneg %p7257_p2 }
 0x391   : > { %s7251_s3 = scalar_lea.hbm %s7904_s8, %s4294_s16  ;;  %s6195_s11 = scalar_lea.hbm %s7904_s8, 256 }
 0x392   : > { %s6190_s1 = scalar_lea.hbm %s7251_s3, 128  ;;  %p6196_p0 = scmp.lt.u32.totalorder %s7251_s3, %s7904_s8 }
 0x393   : > { %p6191_p3 = scmp.ne.s32.totalorder %s7251_s3, %s6190_s1  ;;  %p6197_p6 = scmp.lt.u32.totalorder %s6195_s11, %s6190_s1 }
 0x394   : > { %p6199_p9 = scmp.lt.u32.totalorder %s6190_s1, %s7251_s3 }
 0x395   : > { %p6193_p5 = pnand %p6192_p4, %p6191_p3  ;;  %p6198_p7 = por %p6197_p6, %p6196_p0 }
 0x397   : > { %p6194_p13 = pneg %p6193_p5  ;;  %p6200_p8 = por %p6199_p9, %p6198_p7 }
 0x399   : > { %p6201_p11 = pnand %p6200_p8, %p6194_p13 }
 0x39b   : > { %6204 = shalt.err (!%p6201_p11)
}
 0x39c   : > { %s6205_s23 = scalar_lea.vmem %s7253_s15, 128  ;;  %s6483_s14 = smov [#allocation11]  }
 0x39d   : > { %p6206_p12 = scmp.ne.s32.totalorder %s7253_s15, %s6205_s23  ;;  %s6210_s16 = sshll.u32 %s6483_s14, 4  ;;  %s6211_s16 = int_to_ptr.vmem [resolvable:$false] %s6210_s16 }
 0x39e   : > { %s6212_s0 = scalar_lea.vmem %s6211_s16, 256  ;;  %p6213_p3 = scmp.lt.s32.totalorder %s7253_s15, %s6211_s16 }
 0x39f   : > { %p6208_p1 = pnand %p6206_p12, %p6192_p4  ;;  %p6214_p5 = scmp.lt.s32.totalorder %s6212_s0, %s6205_s23 }
 0x3a1   : > { %p6209_p10 = pneg %p6208_p1  ;;  %p6215_p0 = por %p6214_p5, %p6213_p3 }
 0x3a3   : > { %p6216_p6 = pnand %p6215_p0, %p6209_p10 }
 0x3a5   : > { %6219 = shalt.err (!%p6216_p6)
}
 0x3a6   : > { %5075 = dma.hbm_to_vmem [thread:$0]  (!%p7257_p2), %s7251_s3, 128, %s7253_s15, %s1453_s6  }
 0x3a7   : > { %p7906_p13 = scmp.ne.s32.totalorder %s7880_s4, 0 }
 0x3a8   : > { %p7907_p4 = scmp.eq.s32.totalorder (!%p7906_p13), %s6759_s10, 0 }
 0x3a9   : > { %1479 = sbr.rel (%p7906_p13) target bundleno = 4293 (0x10c5), region = 184 }
 0x3b0   : > { %6289 = dma.done.wait (%p7907_p4), [#allocation9], 256   ;;  %p7908_p7 = pmov %p7907_p4 }
 0x3b1   : > { %s1485_s1 = sand.u32 1, %s6759_s10   ;;  %s1487_s11 = sand.u32 1, %s6370_s5  }
 0x3b2   : > { %6291 = vsyncadd (%p7908_p7), [#allocation9], 4294967040  ;;  %s7290_s23 = sshll.u32 %s1487_s11, 3  ;;  %s1486_s12 = scalar_lea.sflag [#allocation12], %s1485_s1 }
 0x3b3   : > { %p7909_p10 = scmp.ne.s32.totalorder %s7879_s9, 0 }
 0x3b5   : > { %6293 = dma.done.wait (%p7909_p10), %s1486_s12, 128  }
 0x3b6   : > { %6295 = vsyncadd (%p7909_p10), %s1486_s12, 4294967168  ;;  %p7910_p2 = pmov %p7907_p4 }
 0x3b8   : > { %6297 = dma.done.wait (%p7910_p2), [#allocation12], 2048   ;;  %p7911_p9 = pmov %p7910_p2 }
 0x3b9   : > { %p7912_p8 = pmov %p7910_p2 }
 0x3ba   : > { %6299 = vsyncadd (%p7911_p9), [#allocation12], 4294965248 }
 0x3bb   : > { %6301 = dma.done.wait (%p7912_p8), [#allocation15], 2064   ;;  %p7913_p11 = pmov %p7910_p2 }
 0x3bc   : > { %p7914_p12 = pmov %p7910_p2 }
 0x3bd   : > { %6303 = vsyncadd (%p7913_p11), [#allocation15], 4294965232 }
 0x3be   : > { %6305 = dma.done.wait (%p7914_p12), [#allocation18], 2064   ;;  %p7915_p1 = pmov %p7910_p2 }
 0x3c0   : > { %6307 = vsyncadd (%p7915_p1), [#allocation18], 4294965232  ;;  %p7916_p3 = pmov %p7915_p1 }
 0x3c1   : > { %p7917_p5 = pmov %p7915_p1 }
 0x3c2   : > { %6309 = dma.done.wait (%p7916_p3), [#allocation21], 2064  }
 0x3c3   : > { %6311 = vsyncadd (%p7917_p5), [#allocation21], 4294965232  ;;  %p7918_p0 = pmov %p7915_p1 }
 0x3c5   : > { %6313 = dma.done.wait (%p7918_p0), [#allocation24], 2064   ;;  %p7919_p6 = pmov %p7918_p0 }
 0x3c6   : > { %p7920_p13 = pmov %p7918_p0 }
 0x3c7   : > { %6315 = vsyncadd (%p7919_p6), [#allocation24], 4294965232 }
 0x3c8   : > { %6317 = dma.done.wait (%p7920_p13), [#allocation27], 32   ;;  %p7921_p4 = pmov %p7918_p0 }
 0x3c9   : > { %p7922_p7 = pmov %p7918_p0 }
 0x3ca   : > { %6319 = vsyncadd (%p7921_p4), [#allocation27], 4294967264 }
 0x3cb   : > { %6321 = dma.done.wait (%p7922_p7), [#allocation30], 1152   ;;  %p7923_p10 = pmov %p7918_p0 }
 0x3cc   : > { %p7924_p2 = pmov %p7918_p0 }
 0x3cd   : > { %6323 = vsyncadd (%p7923_p10), [#allocation30], 4294966144 }
 0x3ce   : > { %6325 = dma.done.wait (%p7924_p2), [#allocation33], 4096   ;;  %p7925_p9 = pmov %p7918_p0 }
 0x3cf   : > { %p7926_p8 = pmov %p7918_p0 }
 0x3d0   : > { %6327 = vsyncadd (%p7925_p9), [#allocation33], 4294963200 }
 0x3d1   : > { %6329 = dma.done.wait (%p7926_p8), [#allocation36], 4112   ;;  %p7927_p11 = pmov %p7918_p0 }
 0x3d2   : > { %p7928_p12 = pmov %p7918_p0 }
 0x3d3   : > { %6331 = vsyncadd (%p7927_p11), [#allocation36], 4294963184 }
 0x3d4   : > { %6333 = dma.done.wait (%p7928_p12), [#allocation39], 2064   ;;  %p7929_p1 = pmov %p7918_p0 }
 0x3d5   : > { %p7930_p3 = pmov %p7918_p0 }
 0x3d6   : > { %6335 = vsyncadd (%p7929_p1), [#allocation39], 4294965232 }
 0x3d7   : > { %6337 = dma.done.wait (%p7930_p3), [#allocation42], 2064   ;;  %p7931_p5 = pmov %p7918_p0 }
 0x3d9   : > { %6339 = vsyncadd (%p7931_p5), [#allocation42], 4294965232 }
 0x3da   : > { %6341 = dma.done.wait (%p7918_p0), [#allocation45], 4096   ;;  %p7932_p6 = pmov %p7918_p0 }
 0x3db   : > { %p7933_p13 = pmov %p7918_p0 }
 0x3dc   : > { %6343 = vsyncadd (%p7932_p6), [#allocation45], 4294963200 }
 0x3dd   : > { %6345 = dma.done.wait (%p7933_p13), [#allocation48], 4112   ;;  %p7934_p4 = pmov %p7918_p0 }
 0x3de   : > { %p7935_p7 = pmov %p7918_p0 }
 0x3df   : > { %6347 = vsyncadd (%p7934_p4), [#allocation48], 4294963184 }
 0x3e0   : > { %6349 = dma.done.wait (%p7935_p7), [#allocation51], 2064   ;;  %p7936_p10 = pmov %p7918_p0 }
 0x3e1   : > { %p7937_p2 = pmov %p7918_p0 }
 0x3e2   : > { %6351 = vsyncadd (%p7936_p10), [#allocation51], 4294965232 }
 0x3e3   : > { %6353 = dma.done.wait (%p7937_p2), [#allocation54], 784   ;;  %p7938_p9 = pmov %p7918_p0 }
 0x3e4   : > { %p7939_p8 = pmov %p7918_p0 }
 0x3e5   : > { %6355 = vsyncadd (%p7938_p9), [#allocation54], 4294966512 }
 0x3e6   : > { %6357 = dma.done.wait (%p7939_p8), [#allocation57], 5376   ;;  %p7940_p11 = pmov %p7918_p0 }
 0x3e7   : > { %s7941_s9 = sld [smem:[#allocation82_spill]]  ;;  %p1711_p12 = scmp.lt.s32.totalorder %s6378_s18, 1 }
 0x3e8   : > { %6359 = vsyncadd (%p7940_p11), [#allocation57], 4294961920  ;;  %p1716_p1 = scmp.eq.s32.totalorder %s6382_s22, 0  ;;  %p1717_p3 = scmp.eq.s32.totalorder %s6378_s18, 0 }
 0x3e9   : > { %s1712_s4 = scalar_select %p1711_p12, %s6378_s18, 1 }
 0x3ea   : > { %p1718_p5 = pnand %p1717_p3, %p1716_p1 }
 0x3eb   : > { %s4329_s3 = sshll.u32 %s1712_s4, 3  ;;  %v1722_v0 = vld [vmem:[#allocation8] sm:$0xff] (!%p1718_p5)  ;;  %v1723_v1 = vld [vmem:[#allocation8 + $0x8] sm:$0xff] (!%p1718_p5)  ;;  %vm1725_vm0 = vcmask (!%p1718_p5), 392192  }
 0x3ec   : > { %1721 = sbr.rel (%p1718_p5) target bundleno = 1011 (0x3f3), region = 320  ;;  %1724 = vst [vmem:[#allocation59] sm:$0xff] (!%p1718_p5), %v1722_v0  ;;  %1726 = vst.msk [vmem:[#allocation59 + $0x8] sm:$0xff] (!%p1718_p5), %vm1725_vm0, %v1723_v1 }
 0x3ed   : > { %s7366_s6 = scalar_lea.vmem %s7941_s9, %s4329_s3 }
 0x3f3 PF: > { %p4330_p0 = scmp.ne.s32.totalorder %s6378_s18, 0 }
 0x3f4   : > { %vm1731_vm1 = vcmask (!%p4330_p0), 392192   ;;  %v6484_v2 = vmov (!%p4330_p0), 0.0  }
 0x3f5   : > { %1729 = sbr.rel (%p4330_p0) target bundleno = 1020 (0x3fc), region = 324  ;;  %1730 = vst [vmem:[#allocation5] sm:$0xff] (!%p4330_p0), %v6484_v2  ;;  %1732 = vst.msk [vmem:[#allocation5 + $0x8] sm:$0xff] (!%p4330_p0), %vm1731_vm1, %v6484_v2 }
 0x3fc PF: > { %s7369_s22 = smov 0  }
 0x3fd LB: >> { %s7821_s15 = sshll.u32 %s6378_s18, 3  ;;  %s1763_s0 = sshra.s32 %s6398_s22, 3  ;;  %v1759_v3 = vlaneseq  ;;  %s6398_s22 = sphi %s7369_s22, %s1738_s22  }
 0x3fe   : >> { %s1740_s16 = sadd.s32 %s6398_s22, %s7821_s15  ;;  %s1766_s12 = sand.u32 7, %s6398_s22 }
 0x3ff   : >> { %s1741_s1 = sld [smem:[#allocation7 + %s1740_s16]]  ;;  %s1742_s11 = sshra.s32 %s1740_s16, 7  ;;  %vm7380_vm2 = vcmp.lt.s32.totalorder %v1759_v3, 176 }
 0x400   : >> { %s4376_s9 = sshll.u32 %s1763_s0, 4  ;;  %s4373_s4 = sshll.u32 %s1742_s11, 7 }
 0x401   : >> { %s4374_s3 = sadd.s32 128, %s4373_s4  ;;  %s1747_s14 = sand.u32 127, %s1740_s16 }
 0x402   : >> { %s1769_s7 = sadd.s32 %s4376_s9, %s1766_s12  ;;  %s1748_s8 = sadd.s32 %s4374_s3, %s1747_s14 }
 0x403   : >> { %s1749_s20 = sld [smem:[#allocation7 + %s1748_s8]]  ;;  %s1770_s24 = scalar_lea.vmem [#allocation2], %s1769_s7 }
 0x404   : >> { %s1738_s22 = sadd.s32 1, %s6398_s22  }
 0x405   : >> { %s1750_s13 = sshra.s32 %s1741_s1, 3  ;;  %s1753_s17 = sand.u32 7, %s1741_s1 }
 0x406   : >> { %s4375_s19 = sshll.u32 %s1750_s13, 4  ;;  %s1782_s1 = scalar_lea.vmem [#allocation3], %s1769_s7 }
 0x407   : >> { %s1756_s21 = sadd.s32 %s4375_s19, %s1753_s17  ;;  %p1735_p6 = scmp.ge.s32.totalorder %s1738_s22, 8  }
 0x408   : >> { %s1757_s15 = scalar_lea.vmem [#allocation59], %s1756_s21  ;;  %v1816_v7 = vld [vmem:[#allocation13] sm:$0xff] (%p1735_p6)  ;;  %s7944_s17 = sld [smem:[#allocation84_spill]] (%p1735_p6)  ;;  %v1817_v8 = vld [vmem:[#allocation13 + $0x8] sm:$0xff] (%p1735_p6)  ;;  %v6485_v10 = vmov (%p1735_p6), 0.0   ;;  %v1818_v13 = vld [vmem:[#allocation13 + $0x10] sm:$0xff] (%p1735_p6) }
 0x409   : >> { %v1758_v5 = vld [vmem:[%s1757_s15] ss:$8 sm:$0x3]  ;;  %s1773_s0 = sshra.s32 %s1749_s20, 3  ;;  %s1776_s11 = sand.u32 7, %s1749_s20  ;;  %4578 = vmatprep.subr.bf16.mxu0 (%p1735_p6), %v6485_v10  ;;  %4598 = vmatprep.subr.bf16.mxu1 (%p1735_p6), %v6485_v10  ;;  %v1833_v11 = vpack.c.bf16 (%p1735_p6), %v1817_v8, %v1816_v7  ;;  %v1819_v14 = vld [vmem:[#allocation13 + $0x18] sm:$0xff] (%p1735_p6) }
 0x40a   : >> { %1771 = vst.msk [vmem:[%s1770_s24] ss:$8 sm:$0x3] %vm7380_vm2, %v1758_v5  ;;  %s4377_s16 = sshll.u32 %s1773_s0, 4  ;;  %1737 = sbr.rel (!%p1735_p6) target bundleno = 1021 (0x3fd), region = 427  ;;  %vm6486_vm3 = vmmov (%p1735_p6), 0   ;;  %v1834_v18 = vpack.c.bf16 (%p1735_p6), %v1819_v14, %v1818_v13 }
 0x40b   : >> { %s1779_s12 = sadd.s32 %s4377_s16, %s1776_s11  ;;  %4594 = vmatprep.mubr.msk.bf16.mxu0 (%p1735_p6), %vm6486_vm3, %v6485_v10  ;;  %4614 = vmatprep.mubr.msk.bf16.mxu1 (%p1735_p6), %vm6486_vm3, %v6485_v10  ;;  %v6487_v19 = vmov (%p1735_p6), 0   ;;  %v1820_v21 = vld [vmem:[#allocation13 + $0x20] sm:$0xff] (%p1735_p6)  ;;  %v1821_v22 = vld [vmem:[#allocation13 + $0x28] sm:$0xff] (%p1735_p6)  ;;  %v1822_v27 = vld [vmem:[#allocation13 + $0x30] sm:$0xff] (%p1735_p6)  ;;  %s7945_s21 = sld [smem:[#allocation86_spill]] (%p1735_p6)  ;;  %vm2358_vm4 = vcmask (%p1735_p6), 392192  }
 0x40c   : >> { %s1780_s14 = scalar_lea.vmem [#allocation59], %s1779_s12  ;;  %4579 = vmatpush3.bf16.msra.mxu0 (%p1735_p6), %v1833_v11  ;;  %5314 = vset.pattern.permute.xlu0 (%p1735_p6), %v6487_v19  ;;  %v1835_v25 = vpack.c.bf16 (%p1735_p6), %v1821_v22, %v1820_v21  ;;  %v1823_v28 = vld [vmem:[#allocation13 + $0x38] sm:$0xff] (%p1735_p6)  ;;  %v1789_v32 = vld [vmem:[%s7366_s6] sm:$0xff] (%p1735_p6)  ;;  %v1825_v35 = vld [vmem:[#allocation13 + $0x48] sm:$0xff] (%p1735_p6)  ;;  %s7946_s24 = sld [smem:[#allocation94_spill]] (%p1735_p6)  ;;  %vm2455_vm5 = vcmask (%p1735_p6), 1040384  }
 0x40d   : >> { %v1781_v6 = vld [vmem:[%s1780_s14] ss:$8 sm:$0x3]  ;;  %4580 = vmatprep.subr.bf16.mxu0 (%p1735_p6), %v6485_v10  ;;  %v1836_v31 = vpack.c.bf16 (%p1735_p6), %v1823_v28, %v1822_v27  ;;  %1924 = vperm.xlu0 (%p1735_p6), %5314, %v1789_v32   ;;  %v1826_v40 = vld [vmem:[#allocation13 + $0x50] sm:$0xff] (%p1735_p6)  ;;  %v1827_v41 = vld [vmem:[#allocation13 + $0x58] sm:$0xff] (%p1735_p6)  ;;  %s7947_s20 = sld [smem:[#allocation96_spill]] (%p1735_p6) }
 0x40e   : >> { %1783 = vst.msk [vmem:[%s1782_s1] ss:$8 sm:$0x3] %vm7380_vm2, %v1781_v6  ;;  %v1791_v9 = vld [vmem:[%s7944_s17] sm:$0xff] (%p1735_p6)  ;;  %v1792_v12 = vld [vmem:[%s7944_s17 + $0x8] sm:$0xff] (%p1735_p6)  ;;  %v1793_v16 = vld [vmem:[%s7944_s17 + $0x10] sm:$0xff] (%p1735_p6)  ;;  %v1838_v44 = vpack.c.bf16 (%p1735_p6), %v1827_v41, %v1826_v40 }
 0x40f   : > { %v1808_v15 = vpack.c.bf16 (%p1735_p6), %v1792_v12, %v1791_v9  ;;  %v1794_v17 = vld [vmem:[%s7944_s17 + $0x18] sm:$0xff] (%p1735_p6)  ;;  %v1795_v23 = vld [vmem:[%s7944_s17 + $0x20] sm:$0xff] (%p1735_p6)  ;;  %v1796_v24 = vld [vmem:[%s7944_s17 + $0x28] sm:$0xff] (%p1735_p6)  ;;  %s7948_s7 = scalar_lea.vmem (%p1735_p6), [#allocation11], %s7290_s23  ;;  %vm2451_vm6 = vcmask (%p1735_p6), 146432   ;;  %s6488_s19 = smov (%p1735_p6), 32  }
 0x410   : > { %v1809_v20 = vpack.c.bf16 (%p1735_p6), %v1794_v17, %v1793_v16  ;;  %4581 = vmatpush3.bf16.msra.mxu0 (%p1735_p6), %v1834_v18  ;;  %v1810_v26 = vpack.c.bf16 (%p1735_p6), %v1796_v24, %v1795_v23  ;;  %v1797_v29 = vld [vmem:[%s7944_s17 + $0x30] sm:$0xff] (%p1735_p6)  ;;  %v1798_v30 = vld [vmem:[%s7944_s17 + $0x38] sm:$0xff] (%p1735_p6)  ;;  %v1824_v34 = vld [vmem:[#allocation13 + $0x40] sm:$0xff] (%p1735_p6)  ;;  %s6489_s13 = smov (%p1735_p6), 16   ;;  %vm2334_vm7 = vcmask (%p1735_p6), 130048   ;;  %vm2336_vm8 = vcmask (%p1735_p6), 261120  }
 0x411   : > { %4599 = vmatpush3.bf16.msra.mxu1 %v1808_v15  ;;  %4582 = vmatprep.subr.bf16.mxu0 %v6485_v10  ;;  %v1811_v33 = vpack.c.bf16 %v1798_v30, %v1797_v29  ;;  %v1799_v36 = vld [vmem:[%s7944_s17 + $0x40] sm:$0xff]  ;;  %v1800_v37 = vld [vmem:[%s7944_s17 + $0x48] sm:$0xff]  ;;  %v1837_v38 = vpack.c.bf16 %v1825_v35, %v1824_v34  ;;  %v1801_v42 = vld [vmem:[%s7944_s17 + $0x50] sm:$0xff]  ;;  %s6400_s8 = smov 0  }
 0x412   : > { %4600 = vmatprep.subr.bf16.mxu1 %v6485_v10  ;;  %v1812_v39 = vpack.c.bf16 %v1800_v37, %v1799_v36  ;;  %v1802_v43 = vld [vmem:[%s7944_s17 + $0x58] sm:$0xff]  ;;  %v1828_v46 = vld [vmem:[#allocation13 + $0x60] sm:$0xff]  ;;  %v1829_v47 = vld [vmem:[#allocation13 + $0x68] sm:$0xff] }
 0x413   : > { %v1813_v45 = vpack.c.bf16 %v1802_v43, %v1801_v42  ;;  %v1803_v48 = vld [vmem:[%s7944_s17 + $0x60] sm:$0xff]  ;;  %v1804_v49 = vld [vmem:[%s7944_s17 + $0x68] sm:$0xff]  ;;  %v1839_v50 = vpack.c.bf16 %v1829_v47, %v1828_v46  ;;  %v1830_v52 = vld [vmem:[#allocation13 + $0x70] sm:$0xff] }
 0x414   : > { %4583 = vmatpush3.bf16.msra.mxu0 %v1835_v25  ;;  %v1814_v51 = vpack.c.bf16 %v1804_v49, %v1803_v48  ;;  %v1831_v53 = vld [vmem:[#allocation13 + $0x78] sm:$0xff]  ;;  %v1805_v54 = vld [vmem:[%s7944_s17 + $0x70] sm:$0xff]  ;;  %v1785_v59 = vld [vmem:[#allocation2] sm:$0xff] }
 0x415   : > { %4601 = vmatpush3.bf16.msra.mxu1 %v1809_v20  ;;  %4584 = vmatprep.subr.bf16.mxu0 %v6485_v10  ;;  %v1806_v55 = vld [vmem:[%s7944_s17 + $0x78] sm:$0xff]  ;;  %v1840_v56 = vpack.c.bf16 %v1831_v53, %v1830_v52  ;;  %v1787_v57 = vld [vmem:[#allocation3] sm:$0xff]  ;;  %v1807_v61 = vpack.c.bf16 %v1785_v59, %v1785_v59  ;;  %v1949_v62 = vld [vmem:[#allocation16] sm:$0xff] }
 0x416   : > { %4602 = vmatprep.subr.bf16.mxu1 %v6485_v10  ;;  %v1815_v58 = vpack.c.bf16 %v1806_v55, %v1805_v54  ;;  %v1832_v60 = vpack.c.bf16 %v1787_v57, %v1787_v57  ;;  %v1950_v63 = vld [vmem:[#allocation16 + $0x8] sm:$0xff]  ;;  %v1951_v1 = vld [vmem:[#allocation16 + $0x10] sm:$0xff]  ;;  %v1952_v2 = vld [vmem:[#allocation16 + $0x18] sm:$0xff] }
 0x417   : > { %v1966_v0 = vpack.c.bf16 %v1950_v63, %v1949_v62  ;;  %v1967_v3 = vpack.c.bf16 %v1952_v2, %v1951_v1  ;;  %v1953_v5 = vld [vmem:[#allocation16 + $0x20] sm:$0xff]  ;;  %v1954_v6 = vld [vmem:[#allocation16 + $0x28] sm:$0xff]  ;;  %v1955_v8 = vld [vmem:[#allocation16 + $0x30] sm:$0xff] }
 0x418   : > { %4585 = vmatpush3.bf16.msra.mxu0 %v1836_v31  ;;  %v1968_v7 = vpack.c.bf16 %v1954_v6, %v1953_v5  ;;  %v1956_v9 = vld [vmem:[#allocation16 + $0x38] sm:$0xff]  ;;  %v1957_v12 = vld [vmem:[#allocation16 + $0x40] sm:$0xff]  ;;  %v1958_v13 = vld [vmem:[#allocation16 + $0x48] sm:$0xff] }
 0x419   : > { %4603 = vmatpush3.bf16.msra.mxu1 %v1810_v26  ;;  %4586 = vmatprep.subr.bf16.mxu0 %v6485_v10  ;;  %v1969_v11 = vpack.c.bf16 %v1956_v9, %v1955_v8  ;;  %v1970_v14 = vpack.c.bf16 %v1958_v13, %v1957_v12  ;;  %v1959_v15 = vld [vmem:[#allocation16 + $0x50] sm:$0xff]  ;;  %v1960_v16 = vld [vmem:[#allocation16 + $0x58] sm:$0xff]  ;;  %v1961_v18 = vld [vmem:[#allocation16 + $0x60] sm:$0xff] }
 0x41a   : > { %4604 = vmatprep.subr.bf16.mxu1 %v6485_v10  ;;  %v1971_v17 = vpack.c.bf16 %v1960_v16, %v1959_v15  ;;  %v1962_v19 = vld [vmem:[#allocation16 + $0x68] sm:$0xff]  ;;  %v1963_v21 = vld [vmem:[#allocation16 + $0x70] sm:$0xff]  ;;  %v1964_v22 = vld [vmem:[#allocation16 + $0x78] sm:$0xff] }
 0x41b   : > { %v1972_v20 = vpack.c.bf16 %v1962_v19, %v1961_v18  ;;  %v1973_v23 = vpack.c.bf16 %v1964_v22, %v1963_v21  ;;  %v4339_v24 = vld [vmem:[%s7945_s21] ss:$0 sm:$0xff]  ;;  %v2027_v46 = vld [vmem:[#allocation19] sm:$0xff]  ;;  %v2028_v47 = vld [vmem:[#allocation19 + $0x8] sm:$0xff] }
 0x41c   : > { %4587 = vmatpush3.bf16.msra.mxu0 %v1837_v38  ;;  %v2044_v48 = vpack.c.bf16 %v2028_v47, %v2027_v46  ;;  %v2029_v49 = vld [vmem:[#allocation19 + $0x10] sm:$0xff]  ;;  %v2031_v52 = vld [vmem:[#allocation19 + $0x20] sm:$0xff]  ;;  %v2032_v53 = vld [vmem:[#allocation19 + $0x28] sm:$0xff] }
 0x41d   : > { %4605 = vmatpush3.bf16.msra.mxu1 %v1811_v33  ;;  %4588 = vmatprep.subr.bf16.mxu0 %v6485_v10  ;;  %v4340_v33 = vld [vmem:[#allocation14] ss:$0 sm:$0xff]  ;;  %v2046_v54 = vpack.c.bf16 %v2032_v53, %v2031_v52  ;;  %v2033_v55 = vld [vmem:[#allocation19 + $0x30] sm:$0xff]  ;;  %v2036_v59 = vld [vmem:[#allocation19 + $0x48] sm:$0xff] }
 0x41e   : > { %4606 = vmatprep.subr.bf16.mxu1 %v6485_v10  ;;  %v2038_v62 = vld [vmem:[#allocation19 + $0x58] sm:$0xff]  ;;  %v2040_v1 = vld [vmem:[#allocation19 + $0x68] sm:$0xff] }
 0x41f   : > { %v2042_v5 = vld [vmem:[#allocation19 + $0x78] sm:$0xff]  ;;  %v2100_v8 = vld [vmem:[#allocation22 + $0x8] sm:$0xff] }
 0x420   : > { %4589 = vmatpush3.bf16.msra.mxu0 %v1838_v44  ;;  %v2101_v9 = vld [vmem:[#allocation22 + $0x10] sm:$0xff]  ;;  %v2102_v12 = vld [vmem:[#allocation22 + $0x18] sm:$0xff]  ;;  %v2104_v15 = vld [vmem:[#allocation22 + $0x28] sm:$0xff] }
 0x421   : > { %4607 = vmatpush3.bf16.msra.mxu1 %v1812_v39  ;;  %4590 = vmatprep.subr.bf16.mxu0 %v6485_v10  ;;  %v2117_v13 = vpack.c.bf16 %v2102_v12, %v2101_v9  ;;  %v2106_v18 = vld [vmem:[#allocation22 + $0x38] sm:$0xff]  ;;  %v2108_v21 = vld [vmem:[#allocation22 + $0x48] sm:$0xff] }
 0x422   : > { %4608 = vmatprep.subr.bf16.mxu1 %v6485_v10  ;;  %v2177_v52 = vld [vmem:[#allocation25] sm:$0xff]  ;;  %v2178_v53 = vld [vmem:[#allocation25 + $0x8] sm:$0xff]  ;;  %v2192_v12 = vld [vmem:[#allocation25 + $0x78] sm:$0xff] }
 0x424   : > { %4591 = vmatpush3.bf16.msra.mxu0 %v1839_v50  ;;  %v2030_v50 = vld [vmem:[#allocation19 + $0x18] sm:$0xff] }
 0x425   : > { %4609 = vmatpush3.bf16.msra.mxu1 %v1813_v45  ;;  %4592 = vmatprep.subr.bf16.mxu0 %v6485_v10 }
 0x426   : > { %4610 = vmatprep.subr.bf16.mxu1 %v6485_v10 }
 0x428   : > { %4593 = vmatpush3.bf16.msra.mxu0 %v1840_v56  ;;  %v2034_v56 = vld [vmem:[#allocation19 + $0x38] sm:$0xff] }
 0x429   : > { %4611 = vmatpush3.bf16.msra.mxu1 %v1814_v51  ;;  %4618 = vmatprep.subr.bf16.mxu0 %v6485_v10  ;;  %v2045_v51 = vpack.c.bf16 %v2030_v50, %v2029_v49  ;;  %v2047_v57 = vpack.c.bf16 %v2034_v56, %v2033_v55  ;;  %v2179_v55 = vld [vmem:[#allocation25 + $0x10] sm:$0xff]  ;;  %v2180_v56 = vld [vmem:[#allocation25 + $0x18] sm:$0xff] }
 0x42a   : > { %4612 = vmatprep.subr.bf16.mxu1 %v6485_v10 }
 0x42b   : > { %4595 = vmatmul.mubr.bf16.vlgmr.msra.gmra.mrb[0].mxu0 %v1832_v60 }
 0x42c   : > { %4634 = vmatprep.mubr.msk.bf16.mxu0 %vm6486_vm3, %v6485_v10  ;;  %4619 = vmatpush3.bf16.msra.mxu0 %v1966_v0  ;;  %v2039_v0 = vld [vmem:[#allocation19 + $0x60] sm:$0xff] }
 0x42d   : > { %4613 = vmatpush3.bf16.msra.mxu1 %v1815_v58  ;;  %4620 = vmatprep.subr.bf16.mxu0 %v6485_v10  ;;  %v2035_v58 = vld [vmem:[#allocation19 + $0x40] sm:$0xff]  ;;  %v2050_v2 = vpack.c.bf16 %v2040_v1, %v2039_v0  ;;  %v2186_v1 = vld [vmem:[#allocation25 + $0x48] sm:$0xff] }
 0x42e   : > { %4638 = vmatprep.subr.bf16.mxu1 %v6485_v10  ;;  %v2048_v60 = vpack.c.bf16 %v2036_v59, %v2035_v58  ;;  %v2181_v58 = vld [vmem:[#allocation25 + $0x20] sm:$0xff]  ;;  %v2182_v59 = vld [vmem:[#allocation25 + $0x28] sm:$0xff] }
 0x42f   : > { %v2185_v0 = vld [vmem:[#allocation25 + $0x40] sm:$0xff] }
 0x430   : > { %4615 = vmatmul.mubr.bf16.vlgmr.msra.gmra.mrb[0].mxu1 %v1807_v61  ;;  %4621 = vmatpush3.bf16.msra.mxu0 %v1967_v3  ;;  %v2037_v61 = vld [vmem:[#allocation19 + $0x50] sm:$0xff] }
 0x431   : > { %4654 = vmatprep.mubr.msk.bf16.mxu1 %vm6486_vm3, %v6485_v10  ;;  %4622 = vmatprep.subr.bf16.mxu0 %v6485_v10  ;;  %v2049_v63 = vpack.c.bf16 %v2038_v62, %v2037_v61  ;;  %v2041_v3 = vld [vmem:[#allocation19 + $0x70] sm:$0xff]  ;;  %v2184_v62 = vld [vmem:[#allocation25 + $0x38] sm:$0xff] }
 0x432   : > { %4639 = vmatpush3.bf16.msra.mxu1 %v2044_v48  ;;  %v2051_v6 = vpack.c.bf16 %v2042_v5, %v2041_v3  ;;  %v2183_v61 = vld [vmem:[#allocation25 + $0x30] sm:$0xff]  ;;  %v2188_v5 = vld [vmem:[#allocation25 + $0x58] sm:$0xff] }
 0x433   : > { %4640 = vmatprep.subr.bf16.mxu1 %v6485_v10  ;;  %v2187_v3 = vld [vmem:[#allocation25 + $0x50] sm:$0xff] }
 0x434   : > { %4623 = vmatpush3.bf16.msra.mxu0 %v1968_v7  ;;  %v2099_v7 = vld [vmem:[#allocation22] sm:$0xff] }
 0x435   : > { %4624 = vmatprep.subr.bf16.mxu0 %v6485_v10 }
 0x436   : > { %4641 = vmatpush3.bf16.msra.mxu1 %v2045_v51 }
 0x437   : > { %4642 = vmatprep.subr.bf16.mxu1 %v6485_v10 }
 0x438   : > { %4625 = vmatpush3.bf16.msra.mxu0 %v1969_v11  ;;  %v2116_v11 = vpack.c.bf16 %v2100_v8, %v2099_v7  ;;  %v2189_v7 = vld [vmem:[#allocation25 + $0x60] sm:$0xff]  ;;  %v2190_v8 = vld [vmem:[#allocation25 + $0x68] sm:$0xff] }
 0x439   : > { %4626 = vmatprep.subr.bf16.mxu0 %v6485_v10  ;;  %v2200_v9 = vpack.c.bf16 %v2190_v8, %v2189_v7  ;;  %v1786_v8 = vld [vmem:[#allocation2 + $0x8] sm:$0xff] }
 0x43a   : > { %4643 = vmatpush3.bf16.msra.mxu1 %v2046_v54  ;;  %v2194_v54 = vpack.c.bf16 %v2178_v53, %v2177_v52  ;;  %v2349_v52 = vld [vmem:[#allocation29 + $0x8] sm:$0xff]  ;;  %v2350_v53 = vld [vmem:[#allocation29 + $0x10] sm:$0xff] }
 0x43b   : > { %4644 = vmatprep.subr.bf16.mxu1 %v6485_v10 }
 0x43c   : > { %4627 = vmatpush3.bf16.msra.mxu0 %v1970_v14  ;;  %v2103_v14 = vld [vmem:[#allocation22 + $0x20] sm:$0xff] }
 0x43d   : > { %4628 = vmatprep.subr.bf16.mxu0 %v6485_v10  ;;  %v2118_v16 = vpack.c.bf16 %v2104_v15, %v2103_v14  ;;  %v4343_v14 = vld [vmem:[#allocation23] ss:$0 sm:$0xff] }
 0x43e   : > { %4645 = vmatpush3.bf16.msra.mxu1 %v2047_v57  ;;  %v2195_v57 = vpack.c.bf16 %v2180_v56, %v2179_v55  ;;  %v2351_v55 = vld [vmem:[#allocation29 + $0x18] sm:$0xff] }
 0x43f   : > { %4646 = vmatprep.subr.bf16.mxu1 %v6485_v10  ;;  %v2356_v56 = vpack.c.bf16 %v2351_v55, %v2350_v53 }
 0x440   : > { %4629 = vmatpush3.bf16.msra.mxu0 %v1971_v17  ;;  %v2105_v17 = vld [vmem:[#allocation22 + $0x30] sm:$0xff] }
 0x441   : > { %4630 = vmatprep.subr.bf16.mxu0 %v6485_v10  ;;  %v2119_v19 = vpack.c.bf16 %v2106_v18, %v2105_v17 }
 0x442   : > { %4647 = vmatpush3.bf16.msra.mxu1 %v2048_v60  ;;  %v2196_v60 = vpack.c.bf16 %v2182_v59, %v2181_v58  ;;  %v2353_v58 = vld [vmem:[#allocation29 + $0x28] sm:$0xff] }
 0x443   : > { %4648 = vmatprep.subr.bf16.mxu1 %v6485_v10 }
 0x444   : > { %4631 = vmatpush3.bf16.msra.mxu0 %v1972_v20  ;;  %v2107_v20 = vld [vmem:[#allocation22 + $0x40] sm:$0xff] }
 0x445   : > { %4632 = vmatprep.subr.bf16.mxu0 %v6485_v10  ;;  %v2120_v22 = vpack.c.bf16 %v2108_v21, %v2107_v20 }
 0x446   : > { %4649 = vmatpush3.bf16.msra.mxu1 %v2049_v63  ;;  %v2197_v63 = vpack.c.bf16 %v2184_v62, %v2183_v61  ;;  %v2338_v61 = vld [vmem:[%s7947_s20] sm:$0xff]  ;;  %v2339_v62 = vld [vmem:[%s7947_s20 + $0x8] sm:$0xff] }
 0x447   : > { %4650 = vmatprep.subr.bf16.mxu1 %v6485_v10 }
 0x448   : > { %4633 = vmatpush3.bf16.msra.mxu0 %v1973_v23  ;;  %v2109_v23 = vld [vmem:[#allocation22 + $0x50] sm:$0xff] }
 0x449   : > { %4658 = vmatprep.subr.bf16.mxu0 %v6485_v10 }
 0x44a   : > { %4651 = vmatpush3.bf16.msra.mxu1 %v2050_v2  ;;  %v2198_v2 = vpack.c.bf16 %v2186_v1, %v2185_v0  ;;  %v2345_v0 = vpack.c.bf16 %v2339_v62, %v2338_v61  ;;  %v2340_v1 = vld [vmem:[%s7947_s20 + $0x10] sm:$0xff] }
 0x44b   : > { %4652 = vmatprep.subr.bf16.mxu1 %v6485_v10 }
 0x44e   : > { %4653 = vmatpush3.bf16.msra.mxu1 %v2051_v6  ;;  %v2199_v6 = vpack.c.bf16 %v2188_v5, %v2187_v3  ;;  %v2342_v5 = vld [vmem:[%s7947_s20 + $0x20] sm:$0xff] }
 0x44f   : > { %4678 = vmatprep.subr.bf16.mxu1 %v6485_v10 }
 0x48c   : > { %v1925_v25 = vpop.permute.xlu0 %1924 }
 0x48d   : > { %v1933_v26 = vmul.f32 %v4339_v24, %v1925_v25  ;;  %v2110_v24 = vld [vmem:[#allocation22 + $0x58] sm:$0xff] }
 0x48e   : > { %v2121_v25 = vpack.c.bf16 %v2110_v24, %v2109_v23 }
 0x4fe   : > { %v1875_v27 = vpop.f32.mrb[0].mxu0 }
 0x4ff   : > { %v4596_v29 = vpop.f32.mrb[1].mxu0 }
 0x500   : > { %v1878_v32 = vpop.f32.mrb[2].mxu0  ;;  %v4341_v29 = vld [vmem:[#allocation17] ss:$0 sm:$0xff] }
 0x501   : > { %v4597_v35 = vpop.f32.mrb[3].mxu0 }
 0x503   : > { %v1915_v28 = vpop.f32.mrb[0].mxu1 }
 0x504   : > { %v1916_v30 = vadd.f32 %v1915_v28, %v1875_v27  ;;  %v4616_v31 = vpop.f32.mrb[1].mxu1  ;;  %v2112_v27 = vld [vmem:[#allocation22 + $0x68] sm:$0xff] }
 0x505   : > { %v1918_v34 = vpop.f32.mrb[2].mxu1 }
 0x506   : > { %v1934_v36 = vadd.f32 %v1933_v26, %v1916_v30  ;;  %v4617_v37 = vpop.f32.mrb[3].mxu1  ;;  %v2111_v26 = vld [vmem:[#allocation22 + $0x60] sm:$0xff] }
 0x507   : > { %v2122_v28 = vpack.c.bf16 %v2112_v27, %v2111_v26  ;;  %v2255_v27 = vld [vmem:[%s7946_s24] sm:$0xff] }
 0x508   : > { %v1942_v38 = vadd.f32 %v4340_v33, %v1934_v36 }
 0x50a   : > { %v1943_v39 = vsub.f32 0.0, %v1942_v38 }
 0x50c   : > { %v1944_v40 = vmul.f32 1.442695, %v1943_v39 }
 0x50e   : > { %5315 = vpow2.f32 %v1944_v40 }
 0x518   : > { %v5316_v41 = vpop.eup %5315 }
 0x519   : > { %v1946_v42 = vadd.f32 1.0, %v5316_v41 }
 0x51b   : > { %5317 = vrcp.f32 %v1946_v42  ;;  %v2113_v42 = vld [vmem:[#allocation22 + $0x70] sm:$0xff] }
 0x525   : > { %v5318_v43 = vpop.eup %5317 }
 0x526   : > { %v1948_v44 = vmul.f32 %v5318_v43, %v1942_v38  ;;  %v2114_v43 = vld [vmem:[#allocation22 + $0x78] sm:$0xff] }
 0x528   : > { %v1965_v45 = vpack.c.bf16 %v1948_v44, %v1948_v44  ;;  %v2123_v44 = vpack.c.bf16 %v2114_v43, %v2113_v42  ;;  %v2265_v42 = vld [vmem:[%s7946_s24 + $0x50] sm:$0xff]  ;;  %v2266_v43 = vld [vmem:[%s7946_s24 + $0x58] sm:$0xff] }
 0x52a   : > { %4635 = vmatmul.mubr.bf16.vlgmr.msra.gmra.mrb[4].mxu0 %v1965_v45  ;;  %v4342_v45 = vld [vmem:[#allocation20] ss:$0 sm:$0xff] }
 0x52b   : > { %4674 = vmatprep.mubr.msk.bf16.mxu0 %vm6486_vm3, %v6485_v10  ;;  %4659 = vmatpush3.bf16.msra.mxu0 %v2116_v11  ;;  %v2191_v11 = vld [vmem:[#allocation25 + $0x70] sm:$0xff] }
 0x52c   : > { %4660 = vmatprep.subr.bf16.mxu0 %v6485_v10 }
 0x52f   : > { %4661 = vmatpush3.bf16.msra.mxu0 %v2117_v13  ;;  %v2201_v13 = vpack.c.bf16 %v2192_v12, %v2191_v11  ;;  %v2446_v11 = vld [vmem:[#allocation31 + $0x8] sm:$0xff]  ;;  %v2447_v12 = vld [vmem:[#allocation31 + $0x10] sm:$0x3] }
 0x530   : > { %4662 = vmatprep.subr.bf16.mxu0 %v6485_v10 }
 0x533   : > { %4663 = vmatpush3.bf16.msra.mxu0 %v2118_v16 }
 0x534   : > { %4664 = vmatprep.subr.bf16.mxu0 %v6485_v10 }
 0x537   : > { %4665 = vmatpush3.bf16.msra.mxu0 %v2119_v19 }
 0x538   : > { %4666 = vmatprep.subr.bf16.mxu0 %v6485_v10 }
 0x53b   : > { %4667 = vmatpush3.bf16.msra.mxu0 %v2120_v22 }
 0x53c   : > { %4668 = vmatprep.subr.bf16.mxu0 %v6485_v10 }
 0x53f   : > { %4669 = vmatpush3.bf16.msra.mxu0 %v2121_v25 }
 0x540   : > { %4670 = vmatprep.subr.bf16.mxu0 %v6485_v10 }
 0x543   : > { %4671 = vmatpush3.bf16.msra.mxu0 %v2122_v28  ;;  %v2256_v28 = vld [vmem:[%s7946_s24 + $0x8] sm:$0xff] }
 0x544   : > { %4672 = vmatprep.subr.bf16.mxu0 %v6485_v10 }
 0x547   : > { %4673 = vmatpush3.bf16.msra.mxu0 %v2123_v44  ;;  %v2277_v44 = vpack.c.bf16 %v2266_v43, %v2265_v42 }
 0x548   : > { %4698 = vmatprep.subr.bf16.mxu0 %v6485_v10 }
 0x5fd   : > { %v2015_v30 = vpop.f32.mrb[4].mxu0 }
 0x5fe   : > { %v2016_v31 = vadd.f32 %v4341_v29, %v2015_v30  ;;  %v4636_v32 = vpop.f32.mrb[5].mxu0  ;;  %v2272_v29 = vpack.c.bf16 %v2256_v28, %v2255_v27  ;;  %v2257_v30 = vld [vmem:[%s7946_s24 + $0x10] sm:$0xff] }
 0x5ff   : > { %v2018_v33 = vpop.f32.mrb[6].mxu0 }
 0x600   : > { %v2021_v34 = vsub.f32 0.0, %v2016_v31  ;;  %v4637_v35 = vpop.f32.mrb[7].mxu0  ;;  %v2259_v33 = vld [vmem:[%s7946_s24 + $0x20] sm:$0xff] }
 0x602   : > { %v2022_v36 = vmul.f32 1.442695, %v2021_v34  ;;  %v2260_v34 = vld [vmem:[%s7946_s24 + $0x28] sm:$0xff] }
 0x603   : > { %v2274_v35 = vpack.c.bf16 %v2260_v34, %v2259_v33 }
 0x604   : > { %5319 = vpow2.f32 %v2022_v36  ;;  %v2261_v36 = vld [vmem:[%s7946_s24 + $0x30] sm:$0xff] }
 0x60e   : > { %v5320_v37 = vpop.eup %5319 }
 0x60f   : > { %v2024_v38 = vadd.f32 1.0, %v5320_v37  ;;  %v2262_v37 = vld [vmem:[%s7946_s24 + $0x38] sm:$0xff] }
 0x611   : > { %5321 = vrcp.f32 %v2024_v38  ;;  %v2275_v38 = vpack.c.bf16 %v2262_v37, %v2261_v36 }
 0x61b   : > { %v5322_v39 = vpop.eup %5321 }
 0x61c   : > { %v2026_v40 = vmul.f32 %v5322_v39, %v2016_v31  ;;  %v2258_v31 = vld [vmem:[%s7946_s24 + $0x18] sm:$0xff]  ;;  %v2263_v39 = vld [vmem:[%s7946_s24 + $0x40] sm:$0xff] }
 0x61d   : > { %v2273_v32 = vpack.c.bf16 %v2258_v31, %v2257_v30 }
 0x61e   : > { %v2043_v41 = vpack.c.bf16 %v2026_v40, %v2026_v40  ;;  %v2264_v40 = vld [vmem:[%s7946_s24 + $0x48] sm:$0xff] }
 0x620   : > { %4655 = vmatmul.mubr.bf16.vlgmr.msra.gmra.mrb[4].mxu1 %v2043_v41  ;;  %v2276_v41 = vpack.c.bf16 %v2264_v40, %v2263_v39 }
 0x621   : > { %4694 = vmatprep.mubr.msk.bf16.mxu1 %vm6486_vm3, %v6485_v10  ;;  %4679 = vmatpush3.bf16.msra.mxu1 %v2194_v54 }
 0x622   : > { %4680 = vmatprep.subr.bf16.mxu1 %v6485_v10 }
 0x625   : > { %4681 = vmatpush3.bf16.msra.mxu1 %v2195_v57  ;;  %v2352_v57 = vld [vmem:[#allocation29 + $0x20] sm:$0xff] }
 0x626   : > { %4682 = vmatprep.subr.bf16.mxu1 %v6485_v10  ;;  %v2357_v59 = vpack.c.bf16 %v2353_v58, %v2352_v57 }
 0x629   : > { %4683 = vmatpush3.bf16.msra.mxu1 %v2196_v60  ;;  %v1788_v60 = vld [vmem:[#allocation3 + $0x8] sm:$0xff] }
 0x62a   : > { %4684 = vmatprep.subr.bf16.mxu1 %v6485_v10 }
 0x62d   : > { %4685 = vmatpush3.bf16.msra.mxu1 %v2197_v63  ;;  %v2354_v63 = vpack.c.bf16 %v1788_v60, %v1788_v60 }
 0x62e   : > { %4686 = vmatprep.subr.bf16.mxu1 %v6485_v10 }
 0x631   : > { %4687 = vmatpush3.bf16.msra.mxu1 %v2198_v2  ;;  %v2341_v2 = vld [vmem:[%s7947_s20 + $0x18] sm:$0xff] }
 0x632   : > { %4688 = vmatprep.subr.bf16.mxu1 %v6485_v10  ;;  %v2346_v3 = vpack.c.bf16 %v2341_v2, %v2340_v1 }
 0x635   : > { %4689 = vmatpush3.bf16.msra.mxu1 %v2199_v6  ;;  %v2343_v6 = vld [vmem:[%s7947_s20 + $0x28] sm:$0xff] }
 0x636   : > { %4690 = vmatprep.subr.bf16.mxu1 %v6485_v10  ;;  %v2347_v7 = vpack.c.bf16 %v2343_v6, %v2342_v5 }
 0x639   : > { %4691 = vmatpush3.bf16.msra.mxu1 %v2200_v9  ;;  %v2445_v9 = vld [vmem:[#allocation31] sm:$0xff] }
 0x63a   : > { %4692 = vmatprep.subr.bf16.mxu1 %v6485_v10 }
 0x63d   : > { %4693 = vmatpush3.bf16.msra.mxu1 %v2201_v13  ;;  %v2344_v13 = vpack.c.bf16 %v1786_v8, %v1786_v8 }
 0x63e   : > { %4718 = vmatprep.subr.bf16.mxu1 %v6485_v10 }
 0x6f3   : > { %v2093_v46 = vpop.f32.mrb[4].mxu1 }
 0x6f4   : > { %v2094_v47 = vadd.f32 %v4342_v45, %v2093_v46  ;;  %v4656_v48 = vpop.f32.mrb[5].mxu1  ;;  %v2267_v45 = vld [vmem:[%s7946_s24 + $0x60] sm:$0xff]  ;;  %v2268_v46 = vld [vmem:[%s7946_s24 + $0x68] sm:$0xff] }
 0x6f5   : > { %v2096_v49 = vpop.f32.mrb[6].mxu1  ;;  %v2269_v48 = vld [vmem:[%s7946_s24 + $0x70] sm:$0xff] }
 0x6f6   : > { %v2115_v50 = vpack.c.bf16 %v2094_v47, %v2094_v47  ;;  %2501 = vst [vmem:[#allocation4] sm:$0xff] %v2094_v47  ;;  %v4657_v51 = vpop.f32.mrb[7].mxu1  ;;  %v2278_v47 = vpack.c.bf16 %v2268_v46, %v2267_v45  ;;  %v2270_v49 = vld [vmem:[%s7946_s24 + $0x78] sm:$0xff] }
 0x6f7   : > { %v2348_v51 = vld [vmem:[#allocation29] sm:$0xff] }
 0x6f8   : > { %4675 = vmatmul.mubr.bf16.vlgmr.msra.gmra.mrb[8].mxu0 %v2115_v50  ;;  %v2279_v50 = vpack.c.bf16 %v2270_v49, %v2269_v48  ;;  %v2355_v54 = vpack.c.bf16 %v2349_v52, %v2348_v51 }
 0x6f9   : > { %4714 = vmatprep.mubr.msk.bf16.mxu0 %vm6486_vm3, %v6485_v10  ;;  %4699 = vmatpush3.bf16.msra.mxu0 %v2272_v29 }
 0x6fa   : > { %4700 = vmatprep.subr.bf16.mxu0 %v6485_v10 }
 0x6fd   : > { %4701 = vmatpush3.bf16.msra.mxu0 %v2273_v32 }
 0x6fe   : > { %4702 = vmatprep.subr.bf16.mxu0 %v6485_v10 }
 0x701   : > { %4703 = vmatpush3.bf16.msra.mxu0 %v2274_v35  ;;  %v4345_v35 = vld [vmem:[#allocation28] ss:$0 sm:$0xff] }
 0x702   : > { %4704 = vmatprep.subr.bf16.mxu0 %v6485_v10 }
 0x705   : > { %4705 = vmatpush3.bf16.msra.mxu0 %v2275_v38 }
 0x706   : > { %4706 = vmatprep.subr.bf16.mxu0 %v6485_v10 }
 0x709   : > { %4707 = vmatpush3.bf16.msra.mxu0 %v2276_v41 }
 0x70a   : > { %4708 = vmatprep.subr.bf16.mxu0 %v6485_v10 }
 0x70d   : > { %4709 = vmatpush3.bf16.msra.mxu0 %v2277_v44 }
 0x70e   : > { %4710 = vmatprep.subr.bf16.mxu0 %v6485_v10 }
 0x711   : > { %4711 = vmatpush3.bf16.msra.mxu0 %v2278_v47 }
 0x712   : > { %4712 = vmatprep.subr.bf16.mxu0 %v6485_v10 }
 0x715   : > { %4713 = vmatpush3.bf16.msra.mxu0 %v2279_v50 }
 0x7cb   : > { %v2165_v15 = vpop.f32.mrb[8].mxu0 }
 0x7cc   : > { %v2166_v16 = vadd.f32 %v4343_v14, %v2165_v15  ;;  %v4676_v17 = vpop.f32.mrb[9].mxu0  ;;  %v2449_v14 = vpack.c.bf16 %v2446_v11, %v2445_v9  ;;  %v2450_v15 = vpack.c.bf16 %v2447_v12, %v2447_v12 }
 0x7cd   : > { %v2168_v18 = vpop.f32.mrb[10].mxu0  ;;  %v1790_v17 = vld [vmem:[%s7948_s7] sm:$0xff] }
 0x7ce   : > { %v2171_v19 = vsub.f32 0.0, %v2166_v16  ;;  %v4677_v20 = vpop.f32.mrb[11].mxu0  ;;  %v2448_v18 = vpack.c.bf16 %v1790_v17, %v1790_v17 }
 0x7d0   : > { %v2172_v21 = vmul.f32 1.442695, %v2171_v19  ;;  %v4344_v19 = vld [vmem:[#allocation26] ss:$0 sm:$0xff] }
 0x7d2   : > { %5323 = vpow2.f32 %v2172_v21 }
 0x7dc   : > { %v5324_v22 = vpop.eup %5323 }
 0x7dd   : > { %v2174_v23 = vadd.f32 1.0, %v5324_v22 }
 0x7df   : > { %5325 = vrcp.f32 %v2174_v23 }
 0x7e9   : > { %v5326_v24 = vpop.eup %5325 }
 0x7ea   : > { %v2176_v25 = vmul.f32 %v5326_v24, %v2166_v16  ;;  %v2457_v16 = vsel %vm2455_vm5, %v2450_v15, 0 }
 0x7ec   : > { %v2193_v26 = vpack.c.bf16 %v2176_v25, %v2176_v25 }
 0x7ee   : > { %4695 = vmatmul.mubr.bf16.vlgmr.msra.gmra.mrb[8].mxu1 %v2193_v26 }
 0x7ef   : > { %4724 = vmatprep.mubr.msk.bf16.mxu1 %vm6486_vm3, %v6485_v10  ;;  %4719 = vmatpush3.bf16.msra.mxu1 %v2355_v54 }
 0x7f0   : > { %4720 = vmatprep.subr.bf16.mxu1 %v6485_v10 }
 0x7f3   : > { %4721 = vmatpush3.bf16.msra.mxu1 %v2356_v56 }
 0x7f4   : > { %4722 = vmatprep.subr.bf16.mxu1 %v6485_v10 }
 0x7f7   : > { %4723 = vmatpush3.bf16.msra.mxu1 %v2357_v59 }
 0x7f8   : > { %4728 = vmatprep.subr.bf16.mxu1 %v6485_v10 }
 0x7fa   : > { %4725 = vmatmul.mubr.msk.bf16.vlgmr.msra.gmra.mrb[12].mxu1 %vm2358_vm4, %v2354_v63 }
 0x7fb   : > { %4729 = vmatpush3.bf16.msra.mxu1 %v2345_v0  ;;  %4734 = vmatprep.mubr.msk.bf16.mxu1 %vm6486_vm3, %v6485_v10 }
 0x7fc   : > { %4730 = vmatprep.subr.bf16.mxu1 %v6485_v10 }
 0x7ff   : > { %4731 = vmatpush3.bf16.msra.mxu1 %v2346_v3 }
 0x800   : > { %4732 = vmatprep.subr.bf16.mxu1 %v6485_v10 }
 0x803   : > { %4733 = vmatpush3.bf16.msra.mxu1 %v2347_v7 }
 0x804   : > { %4738 = vmatprep.subr.bf16.mxu1 %v6485_v10 }
 0x806   : > { %4735 = vmatmul.mubr.msk.bf16.vlgmr.msra.gmra.mrb[12].mxu1 %vm2358_vm4, %v2344_v13 }
 0x807   : > { %4739 = vmatpush3.bf16.msra.mxu1 %v2449_v14  ;;  %4742 = vmatprep.mubr.msk.bf16.mxu1 %vm6486_vm3, %v6485_v10 }
 0x808   : > { %4740 = vmatprep.subr.bf16.mxu1 %v6485_v10 }
 0x80b   : > { %4741 = vmatpush3.bf16.msra.mxu1 %v2457_v16 }
 0x812   : > { %4743 = vmatmul.mubr.msk.bf16.vlgmr.msra.gmra.mrb[12].mxu1 %vm2451_vm6, %v2448_v18 }
 0x8c1   : > { %v2243_v20 = vpop.f32.mrb[8].mxu1 }
 0x8c2   : > { %v2244_v21 = vadd.f32 %v4344_v19, %v2243_v20  ;;  %v4696_v22 = vpop.f32.mrb[9].mxu1 }
 0x8c3   : > { %v2246_v23 = vpop.f32.mrb[10].mxu1 }
 0x8c4   : > { %v2249_v24 = vsub.f32 0.0, %v2244_v21  ;;  %v4697_v25 = vpop.f32.mrb[11].mxu1 }
 0x8c6   : > { %v2250_v26 = vmul.f32 1.442695, %v2249_v24 }
 0x8c8   : > { %5327 = vpow2.f32 %v2250_v26 }
 0x8d2   : > { %v5328_v27 = vpop.eup %5327 }
 0x8d3   : > { %v2252_v28 = vadd.f32 1.0, %v5328_v27 }
 0x8d5   : > { %5329 = vrcp.f32 %v2252_v28 }
 0x8df   : > { %v5330_v10 = vpop.eup %5329 }
 0x8e0   : > { %v2254_v29 = vmul.f32 %v5330_v10, %v2244_v21 }
 0x8e2   : > { %v2271_v30 = vpack.c.bf16 %v2254_v29, %v2254_v29 }
 0x8e4   : > { %4715 = vmatmul.mubr.bf16.vlgmr.msra.gmra.mrb[12].mxu0 %v2271_v30 }
 0x8e5   : > { %v2493_v31 = vpop.f32.mrb[12].mxu1 }
 0x8e6   : > { %v4744_v32 = vpop.f32.mrb[13].mxu1 }
 0x8e7   : > { %v2496_v33 = vpop.f32.mrb[14].mxu1 }
 0x8e8   : > { %v4745_v34 = vpop.f32.mrb[15].mxu1 }
 0x9b7   : > { %v2321_v36 = vpop.f32.mrb[12].mxu0 }
 0x9b8   : > { %v2322_v37 = vadd.f32 %v4345_v35, %v2321_v36  ;;  %v4716_v38 = vpop.f32.mrb[13].mxu0 }
 0x9b9   : > { %v2324_v39 = vpop.f32.mrb[14].mxu0 }
 0x9ba   : > { %2331 = vrot.lane.b32.xlu1 %v2322_v37, %s6488_s19  ;;  %2328 = vrot.lane.b32.xlu0 %v2322_v37, %s6489_s13  ;;  %v4717_v40 = vpop.f32.mrb[15].mxu0 }
 0xa2c   : > { %v2332_v41 = vpop.permute.xlu1 %2331  ;;  %v2329_v42 = vpop.permute.xlu0 %2328 }
 0xa2d   : > { %v2335_v43 = vsel %vm2334_vm7, %v2322_v37, %v2329_v42 }
 0xa2e   : > { %v2337_v44 = vsel %vm2336_vm8, %v2335_v43, %v2332_v41 }
 0xa2f   : > { %v2500_v45 = vmul.f32 %v2493_v31, %v2337_v44 }
 0xa31   : > { %2502 = vst.msk [vmem:[#allocation4 + $0x8] sm:$0xff] %vm2358_vm4, %v2500_v45 }
 0xa32 LB: >> { %s7949_s23 = sshll.u32 %s6378_s18, 3  ;;  %s2521_s22 = sshra.s32 %s6402_s8, 3  ;;  %s6402_s8 = sphi %s6400_s8, %s2508_s8  }
 0xa33   : >> { %s2510_s6 = sadd.s32 %s6402_s8, %s7949_s23  ;;  %s2524_s9 = sand.u32 7, %s6402_s8 }
 0xa34   : >> { %s2511_s15 = sld [smem:[#allocation7 + %s2510_s6]]  ;;  %s4379_s4 = sshll.u32 %s2521_s22, 4 }
 0xa35   : >> { %s2527_s3 = sadd.s32 %s4379_s4, %s2524_s9  ;;  %s2508_s8 = sadd.s32 1, %s6402_s8  }
 0xa36   : >> { %s2528_s14 = scalar_lea.vmem [#allocation4], %s2527_s3  ;;  %p2505_p13 = scmp.ge.s32.totalorder %s2508_s8, 8  }
 0xa37   : > { %p4354_p4 = scmp.ne.s32.totalorder (%p2505_p13), %s6378_s18, 1 }
 0xa38   : >> { %v2529_v46 = vld [vmem:[%s2528_s14] ss:$8 sm:$0x3] }
 0xa3a   : >> { %s2512_s0 = sshra.s32 %s2511_s15, 3  ;;  %s2515_s11 = sand.u32 7, %s2511_s15 }
 0xa3b   : >> { %s4378_s16 = sshll.u32 %s2512_s0, 4  ;;  %2507 = sbr.rel (!%p2505_p13) target bundleno = 2610 (0xa32), region = 438 }
 0xa3c   : >> { %s2518_s12 = sadd.s32 %s4378_s16, %s2515_s11 }
 0xa3d   : >> { %s2519_s1 = scalar_lea.vmem [#allocation5], %s2518_s12 }
 0xa3e   : >> { %v2520_v47 = vld [vmem:[%s2519_s1] ss:$8 sm:$0x3] }
 0xa3f   : >> { %v2530_v48 = vadd.f32 %v2529_v46, %v2520_v47 }
 0xa41   : >> { %2535 = vst.msk [vmem:[%s2519_s1] ss:$8 sm:$0x3] %vm7380_vm2, %v2530_v48 }
 0xa42   : > { %2540 = sbr.rel (%p4354_p4) target bundleno = 4262 (0x10a6), region = 342  ;;  %s7950_s21 = sld [smem:[#allocation116_spill]] (!%p4354_p4)  ;;  %v6490_v55 = vmov (!%p4354_p4), 0   ;;  %v2542_v22 = vld [vmem:[#allocation59 + $0x8] sm:$0xff] (!%p4354_p4)  ;;  %v2737_v27 = vld [vmem:[#allocation58 + $0x18] sm:$0xff] (!%p4354_p4)  ;;  %v2736_v31 = vld [vmem:[#allocation58 + $0x10] sm:$0xff] (!%p4354_p4) }
 0xa43   : > { %2643 = vmatprep.mubr.bf16.mxu1 (!%p4354_p4), %v6490_v55  ;;  %2725 = vmatprep.mubr.bf16.mxu0 (!%p4354_p4), %v6490_v55  ;;  %v2743_v28 = vld [vmem:[#allocation58 + $0x48] sm:$0xff] (!%p4354_p4)  ;;  %v2742_v32 = vld [vmem:[#allocation58 + $0x40] sm:$0xff] (!%p4354_p4)  ;;  %v7558_v33 = vpack.c.bf16 (!%p4354_p4), %v2542_v22, %v2542_v22  ;;  %v2749_v36 = vld [vmem:[#allocation58 + $0x78] sm:$0xff] (!%p4354_p4)  ;;  %s7951_s18 = sld [smem:[#allocation83_spill]] (!%p4354_p4)  ;;  %vm6492_vm9 = vmmov (!%p4354_p4), 0   ;;  %s7952_s7 = sld [smem:[#allocation112_spill]] (!%p4354_p4) }
 0xa44   : > { %5331 = vset.pattern.permute.xlu0 (!%p4354_p4), %v6490_v55  ;;  %v2773_v29 = vpack.c.bf16 (!%p4354_p4), %v2743_v28, %v2737_v27  ;;  %v2755_v38 = vld [vmem:[#allocation58 + $0xa8] sm:$0xff] (!%p4354_p4)  ;;  %v2772_v39 = vpack.c.bf16 (!%p4354_p4), %v2742_v32, %v2736_v31  ;;  %v2748_v43 = vld [vmem:[#allocation58 + $0x70] sm:$0xff] (!%p4354_p4)  ;;  %v2754_v45 = vld [vmem:[#allocation58 + $0xa0] sm:$0xff] (!%p4354_p4)  ;;  %s6493_s19 = smov (!%p4354_p4), 32   ;;  %s6494_s13 = smov (!%p4354_p4), 16  }
 0xa45   : > { %v2779_v44 = vpack.c.bf16 (!%p4354_p4), %v2755_v38, %v2749_v36  ;;  %v2761_v48 = vld [vmem:[#allocation58 + $0xd8] sm:$0xff] (!%p4354_p4)  ;;  %v2739_v22 = vld [vmem:[#allocation58 + $0x28] sm:$0xff] (!%p4354_p4)  ;;  %v2750_v38 = vld [vmem:[#allocation58 + $0x80] sm:$0xff] (!%p4354_p4) }
 0xa46   : > { %v2757_v31 = vld [vmem:[#allocation58 + $0xb8] sm:$0xff] (!%p4354_p4) }
 0xa48   : > { %v2554_v49 = vld [vmem:[%s7950_s21 + $0x8] sm:$0xff] (!%p4354_p4)  ;;  %v2560_v50 = vld [vmem:[%s7950_s21 + $0x38] sm:$0xff] (!%p4354_p4)  ;;  %v2553_v4 = vld [vmem:[%s7950_s21] sm:$0xff] (!%p4354_p4) }
 0xa49   : > { %v2558_v51 = vld [vmem:[%s7950_s21 + $0x28] sm:$0xff]  ;;  %v2591_v52 = vpack.c.bf16 %v2560_v50, %v2554_v49  ;;  %v2564_v53 = vld [vmem:[%s7950_s21 + $0x58] sm:$0xff]  ;;  %v2559_v54 = vld [vmem:[%s7950_s21 + $0x30] sm:$0xff] }
 0xa4a   : > { %v2595_v56 = vpack.c.bf16 %v2564_v53, %v2558_v51  ;;  %v2590_v57 = vpack.c.bf16 %v2559_v54, %v2553_v4  ;;  %v2557_v58 = vld [vmem:[%s7950_s21 + $0x20] sm:$0xff]  ;;  %v2563_v59 = vld [vmem:[%s7950_s21 + $0x50] sm:$0xff]  ;;  %v2566_v60 = vld [vmem:[%s7950_s21 + $0x68] sm:$0xff]  ;;  %v2778_v51 = vpack.c.bf16 %v2754_v45, %v2748_v43 }
 0xa4b   : > { %2611 = vmatprep.subr.bf16.mxu1 %v2591_v52  ;;  %v2594_v61 = vpack.c.bf16 %v2563_v59, %v2557_v58  ;;  %v2572_v62 = vld [vmem:[%s7950_s21 + $0x98] sm:$0xff]  ;;  %v2570_v63 = vld [vmem:[%s7950_s21 + $0x88] sm:$0xff]  ;;  %v2565_v3 = vld [vmem:[%s7950_s21 + $0x60] sm:$0xff] }
 0xa4c   : > { %v2576_v0 = vld [vmem:[%s7950_s21 + $0xb8] sm:$0xff]  ;;  %2693 = vmatprep.subr.bf16.mxu0 %v2595_v56  ;;  %2612 = vmatpush1.bf16.msra.mxu1 %v2590_v57  ;;  %v2597_v1 = vpack.c.bf16 %v2572_v62, %v2566_v60  ;;  %v2571_v5 = vld [vmem:[%s7950_s21 + $0x90] sm:$0xff]  ;;  %v2569_v6 = vld [vmem:[%s7950_s21 + $0x80] sm:$0xff] }
 0xa4d   : > { %v2601_v2 = vpack.c.bf16 %v2576_v0, %v2570_v63  ;;  %2694 = vmatpush1.bf16.msra.mxu0 %v2594_v61  ;;  %v2596_v7 = vpack.c.bf16 %v2571_v5, %v2565_v3  ;;  %v2575_v8 = vld [vmem:[%s7950_s21 + $0xb0] sm:$0xff]  ;;  %v2578_v9 = vld [vmem:[%s7950_s21 + $0xc8] sm:$0xff]  ;;  %v2584_v11 = vld [vmem:[%s7950_s21 + $0xf8] sm:$0xff] }
 0xa4e   : > { %2613 = vmatprep.subr.bf16.mxu1 %v2597_v1  ;;  %v2600_v12 = vpack.c.bf16 %v2575_v8, %v2569_v6  ;;  %v2603_v13 = vpack.c.bf16 %v2584_v11, %v2578_v9  ;;  %v2582_v14 = vld [vmem:[%s7950_s21 + $0xe8] sm:$0xff]  ;;  %v2588_v15 = vld [vmem:[%s7950_s21 + $0x118] sm:$0xff]  ;;  %v2577_v16 = vld [vmem:[%s7950_s21 + $0xc0] sm:$0xff] }
 0xa4f   : > { %2695 = vmatprep.subr.bf16.mxu0 %v2601_v2  ;;  %v2607_v17 = vpack.c.bf16 %v2588_v15, %v2582_v14  ;;  %v2583_v18 = vld [vmem:[%s7950_s21 + $0xf0] sm:$0xff]  ;;  %v2581_v19 = vld [vmem:[%s7950_s21 + $0xe0] sm:$0xff]  ;;  %v2556_v23 = vld [vmem:[%s7950_s21 + $0x18] sm:$0xff]  ;;  %v6491_v14 = vmov 0.0  }
 0xa50   : > { %v2587_v20 = vld [vmem:[%s7950_s21 + $0x110] sm:$0xff]  ;;  %2614 = vmatpush1.bf16.msra.mxu1 %v2596_v7  ;;  %v2602_v21 = vpack.c.bf16 %v2583_v18, %v2577_v16  ;;  %v2562_v24 = vld [vmem:[%s7950_s21 + $0x48] sm:$0xff]  ;;  %v2561_v30 = vld [vmem:[%s7950_s21 + $0x40] sm:$0xff] }
 0xa51   : > { %2696 = vmatpush1.bf16.msra.mxu0 %v2600_v12  ;;  %2615 = vmatprep.subr.bf16.mxu1 %v2603_v13  ;;  %v2606_v25 = vpack.c.bf16 %v2587_v20, %v2581_v19  ;;  %v2593_v26 = vpack.c.bf16 %v2562_v24, %v2556_v23  ;;  %v2555_v10 = vld [vmem:[%s7950_s21 + $0x10] sm:$0xff]  ;;  %v2568_v34 = vld [vmem:[%s7950_s21 + $0x78] sm:$0xff]  ;;  %v2574_v35 = vld [vmem:[%s7950_s21 + $0xa8] sm:$0xff] }
 0xa52   : > { %2697 = vmatprep.subr.bf16.mxu0 %v2607_v17  ;;  %v2592_v37 = vpack.c.bf16 %v2561_v30, %v2555_v10  ;;  %v2599_v40 = vpack.c.bf16 %v2574_v35, %v2568_v34  ;;  %v2567_v41 = vld [vmem:[%s7950_s21 + $0x70] sm:$0xff]  ;;  %v2573_v42 = vld [vmem:[%s7950_s21 + $0xa0] sm:$0xff]  ;;  %v2580_v46 = vld [vmem:[%s7950_s21 + $0xd8] sm:$0xff] }
 0xa53   : > { %v2586_v47 = vld [vmem:[%s7950_s21 + $0x108] sm:$0xff]  ;;  %v2598_v50 = vpack.c.bf16 %v2573_v42, %v2567_v41  ;;  %v2579_v53 = vld [vmem:[%s7950_s21 + $0xd0] sm:$0xff]  ;;  %v2585_v4 = vld [vmem:[%s7950_s21 + $0x100] sm:$0xff] }
 0xa54   : > { %2616 = vmatpush1.bf16.msra.mxu1 %v2602_v21  ;;  %v2767_v49 = vld [vmem:[#allocation58 + $0x108] sm:$0xff]  ;;  %v2605_v52 = vpack.c.bf16 %v2586_v47, %v2580_v46  ;;  %v2760_v54 = vld [vmem:[#allocation58 + $0xd0] sm:$0xff]  ;;  %v2766_v57 = vld [vmem:[#allocation58 + $0x100] sm:$0xff]  ;;  %v2604_v60 = vpack.c.bf16 %v2585_v4, %v2579_v53 }
 0xa55   : > { %2698 = vmatpush1.bf16.msra.mxu0 %v2606_v25  ;;  %2652 = vmatprep.subr.bf16.mxu1 %v2593_v26  ;;  %v2785_v56 = vpack.c.bf16 %v2767_v49, %v2761_v48  ;;  %v2735_v58 = vld [vmem:[#allocation58 + $0x8] sm:$0xff]  ;;  %v2741_v59 = vld [vmem:[#allocation58 + $0x38] sm:$0xff]  ;;  %v2784_v61 = vpack.c.bf16 %v2766_v57, %v2760_v54  ;;  %v2734_v63 = vld [vmem:[#allocation58] sm:$0xff] }
 0xa56   : > { %2829 = vmatprep.subr.bf16.mxu0 %v2773_v29  ;;  %v2771_v62 = vpack.c.bf16 %v2741_v59, %v2735_v58  ;;  %v2740_v0 = vld [vmem:[#allocation58 + $0x30] sm:$0xff]  ;;  %v2747_v1 = vld [vmem:[#allocation58 + $0x68] sm:$0xff]  ;;  %v2753_v2 = vld [vmem:[#allocation58 + $0x98] sm:$0xff] }
 0xa57   : > { %4355 = vmatmul.mubr.msk.bf16.vlgmr.msra.gmra.mrb[0].mxu1 %vm2358_vm4, %v7558_v33  ;;  %v2770_v3 = vpack.c.bf16 %v2740_v0, %v2734_v63  ;;  %v2545_v5 = vld [vmem:[%s7951_s18] sm:$0xff]  ;;  %v2946_v6 = vld [vmem:[#allocation34] sm:$0xff]  ;;  %v2777_v7 = vpack.c.bf16 %v2753_v2, %v2747_v1  ;;  %v2759_v12 = vld [vmem:[#allocation58 + $0xc8] sm:$0xff] }
 0xa58   : > { %2653 = vmatpush1.bf16.msra.mxu1 %v2592_v37  ;;  %4357 = vmatmul.mubr.msk.bf16.vlgmr.msra.gmra.mrb[0].mxu0 %vm2358_vm4, %v7558_v33  ;;  %v2746_v8 = vld [vmem:[#allocation58 + $0x60] sm:$0xff]  ;;  %v2752_v9 = vld [vmem:[#allocation58 + $0x90] sm:$0xff]  ;;  %v2765_v13 = vld [vmem:[#allocation58 + $0xf8] sm:$0xff] }
 0xa59   : > { %2830 = vmatpush1.bf16.msra.mxu0 %v2772_v39  ;;  %2654 = vmatprep.subr.bf16.mxu1 %v2599_v40  ;;  %v2947_v11 = vld [vmem:[#allocation34 + $0x8] sm:$0xff]  ;;  %v2948_v16 = vld [vmem:[#allocation34 + $0x10] sm:$0xff]  ;;  %v2949_v17 = vld [vmem:[#allocation34 + $0x18] sm:$0xff]  ;;  %v2776_v18 = vpack.c.bf16 %v2752_v9, %v2746_v8  ;;  %v2783_v19 = vpack.c.bf16 %v2765_v13, %v2759_v12 }
 0xa5a   : > { %2831 = vmatprep.subr.bf16.mxu0 %v2779_v44  ;;  %2684 = vmatprep.mubr.bf16.mxu1 %v6490_v55  ;;  %v2963_v15 = vpack.c.bf16 %v2947_v11, %v2946_v6  ;;  %v2758_v20 = vld [vmem:[#allocation58 + $0xc0] sm:$0xff]  ;;  %v2764_v21 = vld [vmem:[#allocation58 + $0xf0] sm:$0xff]  ;;  %v2745_v23 = vld [vmem:[#allocation58 + $0x58] sm:$0xff]  ;;  %v2964_v24 = vpack.c.bf16 %v2949_v17, %v2948_v16 }
 0xa5b   : > { %2861 = vmatprep.mubr.bf16.mxu0 %v6490_v55  ;;  %2548 = vperm.xlu0 %5331, %v2545_v5   ;;  %v2950_v25 = vld [vmem:[#allocation34 + $0x20] sm:$0xff]  ;;  %v2951_v26 = vld [vmem:[#allocation34 + $0x28] sm:$0xff]  ;;  %v2782_v27 = vpack.c.bf16 %v2764_v21, %v2758_v20  ;;  %v2775_v28 = vpack.c.bf16 %v2745_v23, %v2739_v22  ;;  %v2751_v30 = vld [vmem:[#allocation58 + $0x88] sm:$0xff] }
 0xa5c   : > { %2655 = vmatpush1.bf16.msra.mxu1 %v2598_v50  ;;  %v2738_v10 = vld [vmem:[#allocation58 + $0x20] sm:$0xff]  ;;  %v2744_v29 = vld [vmem:[#allocation58 + $0x50] sm:$0xff]  ;;  %v2965_v32 = vpack.c.bf16 %v2951_v26, %v2950_v25  ;;  %v2781_v37 = vpack.c.bf16 %v2757_v31, %v2751_v30  ;;  %v2763_v40 = vld [vmem:[#allocation58 + $0xe8] sm:$0xff] }
 0xa5d   : > { %2832 = vmatpush1.bf16.msra.mxu0 %v2778_v51  ;;  %2656 = vmatprep.subr.bf16.mxu1 %v2605_v52  ;;  %v2952_v34 = vld [vmem:[#allocation34 + $0x30] sm:$0xff]  ;;  %v2953_v35 = vld [vmem:[#allocation34 + $0x38] sm:$0xff]  ;;  %v2774_v36 = vpack.c.bf16 %v2744_v29, %v2738_v10  ;;  %v2769_v41 = vld [vmem:[#allocation58 + $0x118] sm:$0xff] }
 0xa5e   : > { %2833 = vmatprep.subr.bf16.mxu0 %v2785_v56  ;;  %v2756_v39 = vld [vmem:[#allocation58 + $0xb0] sm:$0xff]  ;;  %v2966_v42 = vpack.c.bf16 %v2953_v35, %v2952_v34  ;;  %v2955_v44 = vld [vmem:[#allocation34 + $0x48] sm:$0xff]  ;;  %v2787_v46 = vpack.c.bf16 %v2769_v41, %v2763_v40  ;;  %v2927_v59 = vld [vmem:[#allocation32 + $0x30] sm:$0xff] }
 0xa5f   : > { %v2954_v43 = vld [vmem:[#allocation34 + $0x40] sm:$0xff]  ;;  %v2780_v45 = vpack.c.bf16 %v2756_v39, %v2750_v38  ;;  %v2762_v47 = vld [vmem:[#allocation58 + $0xe0] sm:$0xff]  ;;  %v2924_v4 = vld [vmem:[#allocation32 + $0x18] sm:$0xff] }
 0xa60   : > { %2657 = vmatpush1.bf16.msra.mxu1 %v2604_v60  ;;  %v2768_v48 = vld [vmem:[#allocation58 + $0x110] sm:$0xff]  ;;  %v2967_v49 = vpack.c.bf16 %v2955_v44, %v2954_v43  ;;  %v2922_v52 = vld [vmem:[#allocation32 + $0x8] sm:$0xff]  ;;  %v2956_v1 = vld [vmem:[#allocation34 + $0x50] sm:$0xff] }
 0xa61   : > { %2834 = vmatpush1.bf16.msra.mxu0 %v2784_v61  ;;  %2788 = vmatprep.subr.bf16.mxu1 %v2771_v62  ;;  %v2786_v50 = vpack.c.bf16 %v2768_v48, %v2762_v47  ;;  %v2921_v51 = vld [vmem:[#allocation32] sm:$0xff]  ;;  %v2926_v57 = vld [vmem:[#allocation32 + $0x28] sm:$0xff]  ;;  %v2928_v60 = vld [vmem:[#allocation32 + $0x38] sm:$0xff] }
 0xa62   : > { %4746 = vmatprep.subr.bf16.mxu0 %v6491_v14  ;;  %v2938_v53 = vpack.c.bf16 %v2922_v52, %v2921_v51  ;;  %v2925_v56 = vld [vmem:[#allocation32 + $0x20] sm:$0xff]  ;;  %v2941_v61 = vpack.c.bf16 %v2928_v60, %v2927_v59  ;;  %v2930_v63 = vld [vmem:[#allocation32 + $0x48] sm:$0xff]  ;;  %v2957_v2 = vld [vmem:[#allocation34 + $0x58] sm:$0xff] }
 0xa63   : > { %4356 = vmatmul.mubr.msk.bf16.vlgmr.msra.gmra.mrb[4].mxu1 %vm2358_vm4, %v7558_v33  ;;  %v2940_v58 = vpack.c.bf16 %v2926_v57, %v2925_v56  ;;  %v2929_v62 = vld [vmem:[#allocation32 + $0x40] sm:$0xff]  ;;  %v2931_v5 = vld [vmem:[#allocation32 + $0x50] sm:$0xff]  ;;  %v2932_v6 = vld [vmem:[#allocation32 + $0x58] sm:$0xff] }
 0xa64   : > { %4359 = vmatmul.mubr.msk.bf16.vlgmr.msra.gmra.mrb[4].mxu0 %vm2358_vm4, %v7558_v33  ;;  %2789 = vmatpush1.bf16.msra.mxu1 %v2770_v3  ;;  %v2942_v0 = vpack.c.bf16 %v2930_v63, %v2929_v62  ;;  %v2968_v3 = vpack.c.bf16 %v2957_v2, %v2956_v1  ;;  %v2958_v8 = vld [vmem:[#allocation34 + $0x60] sm:$0xff]  ;;  %v2959_v9 = vld [vmem:[#allocation34 + $0x68] sm:$0xff]  ;;  %v2961_v16 = vld [vmem:[#allocation34 + $0x78] sm:$0xff] }
 0xa65   : > { %2790 = vmatprep.subr.bf16.mxu1 %v2777_v7  ;;  %2820 = vmatprep.mubr.bf16.mxu1 %v6490_v55  ;;  %v2943_v7 = vpack.c.bf16 %v2932_v6, %v2931_v5  ;;  %v2969_v11 = vpack.c.bf16 %v2959_v9, %v2958_v8  ;;  %v2933_v12 = vld [vmem:[#allocation32 + $0x60] sm:$0xff]  ;;  %v2934_v13 = vld [vmem:[#allocation32 + $0x68] sm:$0xff]  ;;  %v2936_v20 = vld [vmem:[#allocation32 + $0x78] sm:$0xff] }
 0xa66   : > { %4747 = vmatpush3.bf16.msra.mxu0 %v2963_v15  ;;  %v2960_v15 = vld [vmem:[#allocation34 + $0x70] sm:$0xff]  ;;  %4762 = vmatprep.mubr.msk.bf16.mxu0 %vm6492_vm9, %v6491_v14  ;;  %v2944_v17 = vpack.c.bf16 %v2934_v13, %v2933_v12  ;;  %v3067_v22 = vld [vmem:[#allocation35 + $0x80] sm:$0xff]  ;;  %v3068_v23 = vld [vmem:[#allocation35 + $0x88] sm:$0xff] }
 0xa67   : > { %4748 = vmatprep.subr.bf16.mxu0 %v6491_v14  ;;  %v2541_v25 = vld [vmem:[#allocation59] sm:$0xff]  ;;  %v3070_v31 = vld [vmem:[#allocation35 + $0x98] sm:$0xff]  ;;  %v3071_v39 = vld [vmem:[#allocation35 + $0xa0] sm:$0xff] }
 0xa68   : > { %2791 = vmatpush1.bf16.msra.mxu1 %v2776_v18  ;;  %v2970_v18 = vpack.c.bf16 %v2961_v16, %v2960_v15  ;;  %v7605_v26 = vpack.c.bf16 %v2541_v25, %v2541_v25  ;;  %v3052_v10 = vld [vmem:[#allocation35 + $0x8] sm:$0xff]  ;;  %v3069_v30 = vld [vmem:[#allocation35 + $0x90] sm:$0xff]  ;;  %v3054_v38 = vld [vmem:[#allocation35 + $0x18] sm:$0xff] }
 0xa69   : > { %2792 = vmatprep.subr.bf16.mxu1 %v2783_v19  ;;  %v2935_v19 = vld [vmem:[#allocation32 + $0x70] sm:$0xff]  ;;  %v3072_v40 = vld [vmem:[#allocation35 + $0xa8] sm:$0xff]  ;;  %v3055_v43 = vld [vmem:[#allocation35 + $0x20] sm:$0xff] }
 0xa6a   : > { %4749 = vmatpush3.bf16.msra.mxu0 %v2964_v24  ;;  %v2945_v21 = vpack.c.bf16 %v2936_v20, %v2935_v19  ;;  %v3093_v24 = vpack.c.bf16 %v3068_v23, %v3067_v22  ;;  %v3056_v44 = vld [vmem:[#allocation35 + $0x28] sm:$0xff]  ;;  %v3075_v51 = vld [vmem:[#allocation35 + $0xc0] sm:$0xff]  ;;  %v3077_v56 = vld [vmem:[#allocation35 + $0xd0] sm:$0xff] }
 0xa6b   : > { %4750 = vmatprep.subr.bf16.mxu0 %v6491_v14  ;;  %v3087_v47 = vpack.c.bf16 %v3056_v44, %v3055_v43  ;;  %v3076_v52 = vld [vmem:[#allocation35 + $0xc8] sm:$0xff]  ;;  %v3078_v57 = vld [vmem:[#allocation35 + $0xd8] sm:$0xff]  ;;  %v3061_v60 = vld [vmem:[#allocation35 + $0x50] sm:$0xff] }
 0xa6c   : > { %2793 = vmatpush1.bf16.msra.mxu1 %v2782_v27  ;;  %v2543_v27 = vld [vmem:[#allocation5] sm:$0xff]  ;;  %v3098_v59 = vpack.c.bf16 %v3078_v57, %v3077_v56  ;;  %v3080_v63 = vld [vmem:[#allocation35 + $0xe8] sm:$0xff]  ;;  %v3081_v5 = vld [vmem:[#allocation35 + $0xf0] sm:$0xff] }
 0xa6d   : > { %2870 = vmatprep.subr.bf16.mxu1 %v2775_v28  ;;  %v3051_v28 = vld [vmem:[#allocation35] sm:$0xff]  ;;  %v3082_v6 = vld [vmem:[#allocation35 + $0xf8] sm:$0xff]  ;;  %v3065_v9 = vld [vmem:[#allocation35 + $0x70] sm:$0xff] }
 0xa6e   : > { %4751 = vmatpush3.bf16.msra.mxu0 %v2965_v32  ;;  %v3085_v34 = vpack.c.bf16 %v3052_v10, %v3051_v28  ;;  %v3079_v62 = vld [vmem:[#allocation35 + $0xe0] sm:$0xff]  ;;  %v3100_v8 = vpack.c.bf16 %v3082_v6, %v3081_v5  ;;  %v3157_v57 = vld [vmem:[#allocation38 + $0x8] sm:$0xff] }
 0xa6f   : > { %4358 = vmatmul.mubr.msk.bf16.vlgmr.msra.gmra.mrb[8].mxu1 %vm2358_vm4, %v7558_v33  ;;  %4752 = vmatprep.subr.bf16.mxu0 %v6491_v14  ;;  %v3099_v1 = vpack.c.bf16 %v3080_v63, %v3079_v62  ;;  %v3063_v2 = vld [vmem:[#allocation35 + $0x60] sm:$0xff]  ;;  %v3161_v63 = vld [vmem:[#allocation38 + $0x28] sm:$0xff] }
 0xa70   : > { %2871 = vmatpush1.bf16.msra.mxu1 %v2774_v36  ;;  %2902 = vmatprep.mubr.bf16.mxu1 %v6490_v55  ;;  %v2923_v55 = vld [vmem:[#allocation32 + $0x10] sm:$0xff]  ;;  %v3094_v36 = vpack.c.bf16 %v3070_v31, %v3069_v30  ;;  %v3156_v56 = vld [vmem:[#allocation38] sm:$0xff] }
 0xa71   : > { %2872 = vmatprep.subr.bf16.mxu1 %v2781_v37  ;;  %v2939_v54 = vpack.c.bf16 %v2924_v4, %v2923_v55  ;;  %v3053_v37 = vld [vmem:[#allocation35 + $0x10] sm:$0xff]  ;;  %v3097_v55 = vpack.c.bf16 %v3076_v52, %v3075_v51  ;;  %v3059_v4 = vld [vmem:[#allocation35 + $0x40] sm:$0xff] }
 0xa72   : > { %4753 = vmatpush3.bf16.msra.mxu0 %v2966_v42  ;;  %v3086_v41 = vpack.c.bf16 %v3054_v38, %v3053_v37  ;;  %v3095_v42 = vpack.c.bf16 %v3072_v40, %v3071_v39  ;;  %v3160_v62 = vld [vmem:[#allocation38 + $0x20] sm:$0xff] }
 0xa73   : > { %4754 = vmatprep.subr.bf16.mxu0 %v6491_v14 }
 0xa74   : > { %2873 = vmatpush1.bf16.msra.mxu1 %v2780_v45  ;;  %v3073_v45 = vld [vmem:[#allocation35 + $0xb0] sm:$0xff] }
 0xa75   : > { %2874 = vmatprep.subr.bf16.mxu1 %v2787_v46  ;;  %v3074_v46 = vld [vmem:[#allocation35 + $0xb8] sm:$0xff] }
 0xa76   : > { %4755 = vmatpush3.bf16.msra.mxu0 %v2967_v49  ;;  %v3096_v48 = vpack.c.bf16 %v3074_v46, %v3073_v45  ;;  %v3057_v49 = vld [vmem:[#allocation35 + $0x30] sm:$0xff] }
 0xa77   : > { %4756 = vmatprep.subr.bf16.mxu0 %v6491_v14 }
 0xa78   : > { %2875 = vmatpush1.bf16.msra.mxu1 %v2786_v50  ;;  %v3058_v50 = vld [vmem:[#allocation35 + $0x38] sm:$0xff] }
 0xa79   : > { %4766 = vmatprep.subr.bf16.mxu1 %v6491_v14 }
 0xa7a   : > { %4757 = vmatpush3.bf16.msra.mxu0 %v2968_v3  ;;  %v3064_v3 = vld [vmem:[#allocation35 + $0x68] sm:$0xff] }
 0xa7b   : > { %4360 = vmatmul.mubr.msk.bf16.vlgmr.msra.gmra.mrb[12].mxu1 %vm2358_vm4, %v7558_v33  ;;  %4758 = vmatprep.subr.bf16.mxu0 %v6491_v14 }
 0xa7c   : > { %4767 = vmatpush3.bf16.msra.mxu1 %v2938_v53  ;;  %4782 = vmatprep.mubr.msk.bf16.mxu1 %vm6492_vm9, %v6491_v14  ;;  %v3088_v53 = vpack.c.bf16 %v3058_v50, %v3057_v49 }
 0xa7d   : > { %4768 = vmatprep.subr.bf16.mxu1 %v6491_v14 }
 0xa7e   : > { %4759 = vmatpush3.bf16.msra.mxu0 %v2969_v11  ;;  %v3066_v11 = vld [vmem:[#allocation35 + $0x78] sm:$0xff] }
 0xa7f   : > { %4760 = vmatprep.subr.bf16.mxu0 %v6491_v14  ;;  %v3092_v12 = vpack.c.bf16 %v3066_v11, %v3065_v9  ;;  %v3164_v11 = vld [vmem:[#allocation38 + $0x40] sm:$0xff] }
 0xa80   : > { %4769 = vmatpush3.bf16.msra.mxu1 %v2939_v54  ;;  %v3060_v54 = vld [vmem:[#allocation35 + $0x48] sm:$0xff] }
 0xa81   : > { %4770 = vmatprep.subr.bf16.mxu1 %v6491_v14 }
 0xa82   : > { %4761 = vmatpush3.bf16.msra.mxu0 %v2970_v18 }
 0xa83   : > { %4472 = vmatprep.subr.bf16.mxu0 %v3093_v24 }
 0xa84   : > { %4771 = vmatpush3.bf16.msra.mxu1 %v2940_v58  ;;  %v3089_v58 = vpack.c.bf16 %v3060_v54, %v3059_v4 }
 0xa85   : > { %4772 = vmatprep.subr.bf16.mxu1 %v6491_v14 }
 0xa88   : > { %4773 = vmatpush3.bf16.msra.mxu1 %v2941_v61  ;;  %v3062_v61 = vld [vmem:[#allocation35 + $0x58] sm:$0xff] }
 0xa89   : > { %4774 = vmatprep.subr.bf16.mxu1 %v6491_v14 }
 0xa8c   : > { %4775 = vmatpush3.bf16.msra.mxu1 %v2942_v0  ;;  %v3090_v0 = vpack.c.bf16 %v3062_v61, %v3061_v60  ;;  %v3159_v60 = vld [vmem:[#allocation38 + $0x18] sm:$0xff] }
 0xa8d   : > { %4776 = vmatprep.subr.bf16.mxu1 %v6491_v14 }
 0xa90   : > { %4777 = vmatpush3.bf16.msra.mxu1 %v2943_v7  ;;  %v3091_v7 = vpack.c.bf16 %v3064_v3, %v3063_v2 }
 0xa91   : > { %4778 = vmatprep.subr.bf16.mxu1 %v6491_v14 }
 0xa94   : > { %4779 = vmatpush3.bf16.msra.mxu1 %v2944_v17 }
 0xa95   : > { %4780 = vmatprep.subr.bf16.mxu1 %v6491_v14 }
 0xa98   : > { %4781 = vmatpush3.bf16.msra.mxu1 %v2945_v21 }
 0xa99   : > { %4786 = vmatprep.subr.bf16.mxu1 %v6491_v14 }
 0xa9b   : > { %4783 = vmatmul.mubr.bf16.vlgmr.msra.gmra.mrb[16].mxu1 %v7605_v26 }
 0xa9c   : > { %4802 = vmatprep.mubr.msk.bf16.mxu1 %vm6492_vm9, %v6491_v14 }
 0xada   : > { %v7611_v29 = vpop.permute.xlu0 %2548 }
 0xadb   : > { %v2551_v32 = vmul.f32 %v7611_v29, %v2543_v27 }
 0xadd   : > { %v7614_v35 = vpack.c.bf16 %v2551_v32, %v2551_v32 }
 0xadf   : > { %4763 = vmatmul.mubr.bf16.vlgmr.msra.gmra.mrb[8].mxu0 %v7614_v35 }
 0xae0   : > { %4473 = vmatpush3.bf16.msra.mxu0 %v3085_v34 }
 0xae1   : > { %4474 = vmatprep.subr.bf16.mxu0 %v3094_v36 }
 0xae4   : > { %4475 = vmatpush3.bf16.msra.mxu0 %v3086_v41 }
 0xae5   : > { %4476 = vmatprep.subr.bf16.mxu0 %v3095_v42 }
 0xae8   : > { %4477 = vmatpush3.bf16.msra.mxu0 %v3087_v47 }
 0xae9   : > { %4478 = vmatprep.subr.bf16.mxu0 %v3096_v48 }
 0xaec   : > { %4479 = vmatpush3.bf16.msra.mxu0 %v3088_v53 }
 0xaed   : > { %4480 = vmatprep.subr.bf16.mxu0 %v3097_v55 }
 0xaf0   : > { %4481 = vmatpush3.bf16.msra.mxu0 %v3089_v58  ;;  %v3173_v58 = vpack.c.bf16 %v3157_v57, %v3156_v56  ;;  %v3339_v56 = vld [vmem:[#allocation46 + $0x48] sm:$0xff] }
 0xaf1   : > { %4482 = vmatprep.subr.bf16.mxu0 %v3098_v59  ;;  %v3158_v59 = vld [vmem:[#allocation38 + $0x10] sm:$0xff] }
 0xaf2   : > { %4787 = vmatpush3.bf16.msra.mxu1 %v3173_v58  ;;  %v3174_v61 = vpack.c.bf16 %v3159_v60, %v3158_v59  ;;  %v3340_v58 = vld [vmem:[#allocation46 + $0x50] sm:$0xff]  ;;  %v3341_v59 = vld [vmem:[#allocation46 + $0x58] sm:$0xff] }
 0xaf3   : > { %4788 = vmatprep.subr.bf16.mxu1 %v6491_v14  ;;  %v3351_v60 = vpack.c.bf16 %v3341_v59, %v3340_v58  ;;  %v3236_v59 = vld [vmem:[#allocation41 + $0x10] sm:$0xff] }
 0xaf4   : > { %4483 = vmatpush3.bf16.msra.mxu0 %v3090_v0 }
 0xaf5   : > { %4484 = vmatprep.subr.bf16.mxu0 %v3099_v1  ;;  %v3175_v1 = vpack.c.bf16 %v3161_v63, %v3160_v62  ;;  %v3343_v62 = vld [vmem:[#allocation46 + $0x68] sm:$0xff] }
 0xaf6   : > { %4789 = vmatpush3.bf16.msra.mxu1 %v3174_v61  ;;  %v3342_v61 = vld [vmem:[#allocation46 + $0x60] sm:$0xff] }
 0xaf7   : > { %4790 = vmatprep.subr.bf16.mxu1 %v6491_v14  ;;  %v3352_v63 = vpack.c.bf16 %v3343_v62, %v3342_v61  ;;  %v3238_v62 = vld [vmem:[#allocation41 + $0x20] sm:$0xff] }
 0xaf8   : > { %4485 = vmatpush3.bf16.msra.mxu0 %v3091_v7  ;;  %v3162_v7 = vld [vmem:[#allocation38 + $0x30] sm:$0xff] }
 0xaf9   : > { %4486 = vmatprep.subr.bf16.mxu0 %v3100_v8  ;;  %v3163_v8 = vld [vmem:[#allocation38 + $0x38] sm:$0xff] }
 0xafa   : > { %4791 = vmatpush3.bf16.msra.mxu1 %v3175_v1  ;;  %v3176_v9 = vpack.c.bf16 %v3163_v8, %v3162_v7  ;;  %v3345_v1 = vld [vmem:[#allocation46 + $0x78] sm:$0xff]  ;;  %v3434_v7 = vld [vmem:[#allocation47] sm:$0xff]  ;;  %v3435_v8 = vld [vmem:[#allocation47 + $0x8] sm:$0xff] }
 0xafb   : > { %4792 = vmatprep.subr.bf16.mxu1 %v6491_v14 }
 0xafc   : > { %4487 = vmatpush3.bf16.msra.mxu0 %v3092_v12  ;;  %v3165_v12 = vld [vmem:[#allocation38 + $0x48] sm:$0xff] }
 0xafd   : > { %4806 = vmatprep.subr.bf16.mxu0 %v6491_v14 }
 0xafe   : > { %4793 = vmatpush3.bf16.msra.mxu1 %v3176_v9  ;;  %v3452_v9 = vld [vmem:[#allocation47 + $0x90] sm:$0xff] }
 0xaff   : > { %4794 = vmatprep.subr.bf16.mxu1 %v6491_v14 }
 0xb2a   : > { %v2645_v13 = vpop.f32.mrb[0].mxu1 }
 0xb2b   : > { %v2647_v15 = vpop.f32.mrb[1].mxu1  ;;  %v2727_v16 = vpop.f32.mrb[0].mxu0 }
 0xb2c   : > { %v2649_v17 = vpop.f32.mrb[2].mxu1  ;;  %v2729_v18 = vpop.f32.mrb[1].mxu0 }
 0xb2d   : > { %v2650_v19 = vpop.f32.mrb[3].mxu1  ;;  %v2731_v20 = vpop.f32.mrb[2].mxu0 }
 0xb2e   : > { %v2732_v21 = vpop.f32.mrb[3].mxu0  ;;  %v3169_v19 = vld [vmem:[#allocation38 + $0x68] sm:$0xff] }
 0xb2f   : > { %v3170_v21 = vld [vmem:[#allocation38 + $0x70] sm:$0xff] }
 0xb36   : > { %v2686_v22 = vpop.f32.mrb[4].mxu1 }
 0xb37   : > { %v2863_v23 = vpop.f32.mrb[4].mxu0  ;;  %v2688_v24 = vpop.f32.mrb[5].mxu1 }
 0xb38   : > { %v2913_v25 = vmul.f32 %v2863_v23, %v2686_v22  ;;  %v2865_v27 = vpop.f32.mrb[5].mxu0  ;;  %v2690_v28 = vpop.f32.mrb[6].mxu1  ;;  %v3171_v22 = vld [vmem:[#allocation38 + $0x78] sm:$0xff] }
 0xb39   : > { %v2914_v10 = vmul.f32 %v2865_v27, %v2688_v24  ;;  %v2691_v30 = vpop.f32.mrb[7].mxu1  ;;  %v2867_v31 = vpop.f32.mrb[6].mxu0  ;;  %v3180_v23 = vpack.c.bf16 %v3171_v22, %v3170_v21  ;;  %v3438_v21 = vld [vmem:[#allocation47 + $0x20] sm:$0xff]  ;;  %v3439_v22 = vld [vmem:[#allocation47 + $0x28] sm:$0xff] }
 0xb3a   : > { %v2868_v32 = vpop.f32.mrb[7].mxu0 }
 0xb42   : > { %v2822_v34 = vpop.f32.mrb[8].mxu1 }
 0xb43   : > { %v2911_v36 = vmul.f32 %v2822_v34, %v2645_v13  ;;  %v2824_v37 = vpop.f32.mrb[9].mxu1  ;;  %v3177_v13 = vpack.c.bf16 %v3165_v12, %v3164_v11  ;;  %v3453_v11 = vld [vmem:[#allocation47 + $0x98] sm:$0xff]  ;;  %v3466_v12 = vpack.c.bf16 %v3435_v8, %v3434_v7  ;;  %v3244_v7 = vld [vmem:[#allocation41 + $0x50] sm:$0xff] }
 0xb44   : > { %v2912_v38 = vmul.f32 %v2824_v37, %v2647_v15  ;;  %v2826_v39 = vpop.f32.mrb[10].mxu1  ;;  %v3166_v15 = vld [vmem:[#allocation38 + $0x50] sm:$0xff]  ;;  %v3245_v8 = vld [vmem:[#allocation41 + $0x58] sm:$0xff] }
 0xb45   : > { %v2917_v40 = vadd.f32 %v2913_v25, %v2911_v36  ;;  %v2827_v41 = vpop.f32.mrb[11].mxu1  ;;  %4795 = vmatpush3.bf16.msra.mxu1 %v3177_v13  ;;  %v3330_v39 = vld [vmem:[#allocation46] sm:$0xff]  ;;  %v3475_v13 = vpack.c.bf16 %v3453_v11, %v3452_v9  ;;  %v3256_v9 = vpack.c.bf16 %v3245_v8, %v3244_v7 }
 0xb46   : > { %v2918_v42 = vadd.f32 %v2914_v10, %v2912_v38  ;;  %4796 = vmatprep.subr.bf16.mxu1 %v6491_v14  ;;  %v4361_v10 = vld [vmem:[#allocation37] ss:$0 sm:$0xff]  ;;  %v3246_v11 = vld [vmem:[#allocation41 + $0x60] sm:$0xff] }
 0xb47   : > { %v3541_v8 = vld [vmem:[#allocation50 + $0x20] sm:$0xff] }
 0xb4e   : > { %v2904_v43 = vpop.f32.mrb[12].mxu1 }
 0xb4f   : > { %v2915_v44 = vmul.f32 %v2904_v43, %v2727_v16  ;;  %v2906_v45 = vpop.f32.mrb[13].mxu1  ;;  %v3167_v16 = vld [vmem:[#allocation38 + $0x58] sm:$0xff] }
 0xb50   : > { %v2916_v46 = vmul.f32 %v2906_v45, %v2729_v18  ;;  %v2908_v47 = vpop.f32.mrb[14].mxu1  ;;  %v3178_v17 = vpack.c.bf16 %v3167_v16, %v3166_v15  ;;  %v3168_v18 = vld [vmem:[#allocation38 + $0x60] sm:$0xff]  ;;  %v3332_v45 = vld [vmem:[#allocation46 + $0x10] sm:$0xff] }
 0xb51   : > { %v2919_v48 = vadd.f32 %v2917_v40, %v2915_v44  ;;  %v2909_v49 = vpop.f32.mrb[15].mxu1  ;;  %v3179_v20 = vpack.c.bf16 %v3169_v19, %v3168_v18  ;;  %v3331_v40 = vld [vmem:[#allocation46 + $0x8] sm:$0xff]  ;;  %v3436_v15 = vld [vmem:[#allocation47 + $0x10] sm:$0xff]  ;;  %v3437_v16 = vld [vmem:[#allocation47 + $0x18] sm:$0xff] }
 0xb52   : > { %v2920_v50 = vadd.f32 %v2918_v42, %v2916_v46  ;;  %4797 = vmatpush3.bf16.msra.mxu1 %v3178_v17  ;;  %v3346_v43 = vpack.c.bf16 %v3331_v40, %v3330_v39  ;;  %v3333_v46 = vld [vmem:[#allocation46 + $0x18] sm:$0xff]  ;;  %v3335_v49 = vld [vmem:[#allocation46 + $0x28] sm:$0xff]  ;;  %v3454_v17 = vld [vmem:[#allocation47 + $0xa0] sm:$0xff]  ;;  %v3467_v19 = vpack.c.bf16 %v3437_v16, %v3436_v15 }
 0xb53   : > { %v7620_v52 = vpack.c.bf16 %v2919_v48, %v2919_v48  ;;  %4798 = vmatprep.subr.bf16.mxu1 %v6491_v14  ;;  %v3347_v47 = vpack.c.bf16 %v3333_v46, %v3332_v45  ;;  %v3334_v48 = vld [vmem:[#allocation46 + $0x20] sm:$0xff]  ;;  %v3455_v18 = vld [vmem:[#allocation47 + $0xa8] sm:$0xff]  ;;  %v3444_v40 = vld [vmem:[#allocation47 + $0x50] sm:$0xff] }
 0xb54   : > { %v7618_v51 = vpack.c.bf16 %v2920_v50, %v2920_v50  ;;  %v3348_v50 = vpack.c.bf16 %v3335_v49, %v3334_v48  ;;  %v3446_v46 = vld [vmem:[#allocation47 + $0x60] sm:$0xff]  ;;  %v3464_v48 = vld [vmem:[#allocation47 + $0xf0] sm:$0xff]  ;;  %v3465_v49 = vld [vmem:[#allocation47 + $0xf8] sm:$0xff] }
 0xb55   : > { %v3248_v15 = vld [vmem:[#allocation41 + $0x70] sm:$0xff]  ;;  %v3249_v16 = vld [vmem:[#allocation41 + $0x78] sm:$0xff] }
 0xb56   : > { %3133 = vmatprep.mubr.bf16.mxu0 %v7618_v51  ;;  %4799 = vmatpush3.bf16.msra.mxu1 %v3179_v20  ;;  %v3476_v20 = vpack.c.bf16 %v3455_v18, %v3454_v17  ;;  %v3258_v17 = vpack.c.bf16 %v3249_v16, %v3248_v15  ;;  %v4362_v18 = vld [vmem:[#allocation40] ss:$0 sm:$0xff]  ;;  %v3545_v15 = vld [vmem:[#allocation50 + $0x40] sm:$0xff]  ;;  %v3546_v16 = vld [vmem:[#allocation50 + $0x48] sm:$0xff] }
 0xb57   : > { %3134 = vmatmul.mubr.bf16.vlgmr.msra.gmra.mrb[12].mxu0 %v7620_v52  ;;  %4800 = vmatprep.subr.bf16.mxu1 %v6491_v14 }
 0xb58   : > { %4822 = vmatprep.mubr.msk.bf16.mxu0 %vm6492_vm9, %v6491_v14 }
 0xb5a   : > { %4801 = vmatpush3.bf16.msra.mxu1 %v3180_v23  ;;  %v3456_v23 = vld [vmem:[#allocation47 + $0xb0] sm:$0xff] }
 0xb5b   : > { %4826 = vmatprep.subr.bf16.mxu1 %v6491_v14 }
 0xb6e   : > { %v3045_v53 = vpop.f32.mrb[16].mxu1 }
 0xb6f   : > { %v4784_v55 = vpop.f32.mrb[17].mxu1 }
 0xb70   : > { %v3048_v4 = vpop.f32.mrb[18].mxu1  ;;  %v3337_v55 = vld [vmem:[#allocation46 + $0x38] sm:$0xff] }
 0xb71   : > { %v4785_v54 = vpop.f32.mrb[19].mxu1 }
 0xb72   : > { %v3338_v54 = vld [vmem:[#allocation46 + $0x40] sm:$0xff] }
 0xb73   : > { %v3350_v57 = vpack.c.bf16 %v3339_v56, %v3338_v54  ;;  %v3234_v56 = vld [vmem:[#allocation41] sm:$0xff] }
 0xbb2   : > { %v3005_v0 = vpop.f32.mrb[8].mxu0 }
 0xbb3   : > { %v4764_v2 = vpop.f32.mrb[9].mxu0  ;;  %v3046_v3 = vadd.f32 %v3045_v53, %v3005_v0  ;;  %v3336_v53 = vld [vmem:[#allocation46 + $0x30] sm:$0xff] }
 0xbb4   : > { %v3008_v5 = vpop.f32.mrb[10].mxu0  ;;  %v3349_v4 = vpack.c.bf16 %v3337_v55, %v3336_v53  ;;  %v3344_v0 = vld [vmem:[#allocation46 + $0x70] sm:$0xff]  ;;  %v3450_v2 = vld [vmem:[#allocation47 + $0x80] sm:$0xff]  ;;  %v3481_v53 = vpack.c.bf16 %v3465_v49, %v3464_v48  ;;  %v3315_v49 = vld [vmem:[#allocation44 + $0x48] sm:$0xff] }
 0xbb5   : > { %v4765_v6 = vpop.f32.mrb[11].mxu0  ;;  %v3353_v5 = vpack.c.bf16 %v3345_v1, %v3344_v0  ;;  %v3448_v55 = vld [vmem:[#allocation47 + $0x70] sm:$0xff]  ;;  %v3314_v48 = vld [vmem:[#allocation44 + $0x40] sm:$0xff] }
 0xbb6   : > { %v3241_v1 = vld [vmem:[#allocation41 + $0x38] sm:$0xff] }
 0xc2a   : > { %v4488_v24 = vpop.f32.mrb[12].mxu0 }
 0xc2b   : > { %v4489_v25 = vpop.f32.mrb[13].mxu0 }
 0xc2c   : > { %v4490_v27 = vadd.f32 %v4489_v25, %v4488_v24  ;;  %v4491_v28 = vpop.f32.mrb[14].mxu0  ;;  %v3457_v24 = vld [vmem:[#allocation47 + $0xb8] sm:$0xff]  ;;  %v3468_v25 = vpack.c.bf16 %v3439_v22, %v3438_v21 }
 0xc2d   : > { %v4492_v30 = vpop.f32.mrb[15].mxu0  ;;  %v3440_v28 = vld [vmem:[#allocation47 + $0x30] sm:$0xff] }
 0xc2e   : > { %v3141_v31 = vadd.f32 %v4490_v27, %v3046_v3  ;;  %v3451_v3 = vld [vmem:[#allocation47 + $0x88] sm:$0xff]  ;;  %v3477_v27 = vpack.c.bf16 %v3457_v24, %v3456_v23  ;;  %v3458_v30 = vld [vmem:[#allocation47 + $0xc0] sm:$0xff] }
 0xc2f   : > { %v3474_v6 = vpack.c.bf16 %v3451_v3, %v3450_v2  ;;  %v3242_v3 = vld [vmem:[#allocation41 + $0x40] sm:$0xff] }
 0xc30   : > { %v3149_v32 = vadd.f32 %v4361_v10, %v3141_v31  ;;  %v3441_v10 = vld [vmem:[#allocation47 + $0x38] sm:$0xff]  ;;  %v3459_v31 = vld [vmem:[#allocation47 + $0xc8] sm:$0xff] }
 0xc32   : > { %v3150_v34 = vsub.f32 0.0, %v3149_v32 }
 0xc34   : > { %v3151_v36 = vmul.f32 1.442695, %v3150_v34  ;;  %v3443_v34 = vld [vmem:[#allocation47 + $0x48] sm:$0xff] }
 0xc36   : > { %5332 = vpow2.f32 %v3151_v36  ;;  %v3460_v36 = vld [vmem:[#allocation47 + $0xd0] sm:$0xff] }
 0xc40   : > { %v5333_v37 = vpop.eup %5332 }
 0xc41   : > { %v3153_v38 = vadd.f32 1.0, %v5333_v37  ;;  %v3461_v37 = vld [vmem:[#allocation47 + $0xd8] sm:$0xff] }
 0xc42   : > { %v3479_v39 = vpack.c.bf16 %v3461_v37, %v3460_v36  ;;  %v3308_v37 = vld [vmem:[#allocation44 + $0x10] sm:$0xff] }
 0xc43   : > { %5334 = vrcp.f32 %v3153_v38 }
 0xc4d   : > { %v5335_v41 = vpop.eup %5334 }
 0xc4e   : > { %v3155_v42 = vmul.f32 %v5335_v41, %v3149_v32  ;;  %v3478_v32 = vpack.c.bf16 %v3459_v31, %v3458_v30  ;;  %v3445_v41 = vld [vmem:[#allocation47 + $0x58] sm:$0xff]  ;;  %v3307_v30 = vld [vmem:[#allocation44 + $0x8] sm:$0xff] }
 0xc50   : > { %v3172_v44 = vpack.c.bf16 %v3155_v42, %v3155_v42  ;;  %v3462_v42 = vld [vmem:[#allocation47 + $0xe0] sm:$0xff] }
 0xc52   : > { %4803 = vmatmul.mubr.bf16.vlgmr.msra.gmra.mrb[20].mxu1 %v3172_v44  ;;  %v3471_v44 = vpack.c.bf16 %v3445_v41, %v3444_v40 }
 0xc53   : > { %4827 = vmatpush3.bf16.msra.mxu1 %v3346_v43  ;;  %4842 = vmatprep.mubr.msk.bf16.mxu1 %vm6492_vm9, %v6491_v14  ;;  %v3463_v43 = vld [vmem:[#allocation47 + $0xe8] sm:$0xff] }
 0xc54   : > { %4828 = vmatprep.subr.bf16.mxu1 %v6491_v14  ;;  %v3480_v45 = vpack.c.bf16 %v3463_v43, %v3462_v42  ;;  %v3310_v42 = vld [vmem:[#allocation44 + $0x20] sm:$0xff]  ;;  %v3311_v43 = vld [vmem:[#allocation44 + $0x28] sm:$0xff] }
 0xc57   : > { %4829 = vmatpush3.bf16.msra.mxu1 %v3347_v47  ;;  %v3447_v47 = vld [vmem:[#allocation47 + $0x68] sm:$0xff] }
 0xc58   : > { %4830 = vmatprep.subr.bf16.mxu1 %v6491_v14 }
 0xc5b   : > { %4831 = vmatpush3.bf16.msra.mxu1 %v3348_v50  ;;  %v3472_v50 = vpack.c.bf16 %v3447_v47, %v3446_v46  ;;  %v3313_v46 = vld [vmem:[#allocation44 + $0x38] sm:$0xff] }
 0xc5c   : > { %4832 = vmatprep.subr.bf16.mxu1 %v6491_v14 }
 0xc5f   : > { %4833 = vmatpush3.bf16.msra.mxu1 %v3349_v4  ;;  %v3449_v4 = vld [vmem:[#allocation47 + $0x78] sm:$0xff] }
 0xc60   : > { %4834 = vmatprep.subr.bf16.mxu1 %v6491_v14  ;;  %v3473_v54 = vpack.c.bf16 %v3449_v4, %v3448_v55  ;;  %v3317_v55 = vld [vmem:[#allocation44 + $0x58] sm:$0xff] }
 0xc63   : > { %4835 = vmatpush3.bf16.msra.mxu1 %v3350_v57  ;;  %v3235_v57 = vld [vmem:[#allocation41 + $0x8] sm:$0xff] }
 0xc64   : > { %4836 = vmatprep.subr.bf16.mxu1 %v6491_v14  ;;  %v3251_v58 = vpack.c.bf16 %v3235_v57, %v3234_v56  ;;  %v3319_v56 = vld [vmem:[#allocation44 + $0x68] sm:$0xff] }
 0xc66   : > { %4807 = vmatpush3.bf16.msra.mxu0 %v3251_v58  ;;  %v3320_v58 = vld [vmem:[#allocation44 + $0x70] sm:$0xff] }
 0xc67   : > { %4837 = vmatpush3.bf16.msra.mxu1 %v3351_v60  ;;  %4808 = vmatprep.subr.bf16.mxu0 %v6491_v14  ;;  %v3237_v60 = vld [vmem:[#allocation41 + $0x18] sm:$0xff] }
 0xc68   : > { %4838 = vmatprep.subr.bf16.mxu1 %v6491_v14  ;;  %v3252_v61 = vpack.c.bf16 %v3237_v60, %v3236_v59  ;;  %v3321_v59 = vld [vmem:[#allocation44 + $0x78] sm:$0xff] }
 0xc69   : > { %v3329_v60 = vpack.c.bf16 %v3321_v59, %v3320_v58  ;;  %v2544_v58 = vld [vmem:[#allocation5 + $0x8] sm:$0xff] }
 0xc6a   : > { %4809 = vmatpush3.bf16.msra.mxu0 %v3252_v61 }
 0xc6b   : > { %4839 = vmatpush3.bf16.msra.mxu1 %v3352_v63  ;;  %4810 = vmatprep.subr.bf16.mxu0 %v6491_v14  ;;  %v3239_v63 = vld [vmem:[#allocation41 + $0x28] sm:$0xff] }
 0xc6c   : > { %4840 = vmatprep.subr.bf16.mxu1 %v6491_v14  ;;  %v3253_v0 = vpack.c.bf16 %v3239_v63, %v3238_v62 }
 0xc6e   : > { %4811 = vmatpush3.bf16.msra.mxu0 %v3253_v0 }
 0xc6f   : > { %4841 = vmatpush3.bf16.msra.mxu1 %v3353_v5  ;;  %4812 = vmatprep.subr.bf16.mxu0 %v6491_v14  ;;  %v3243_v5 = vld [vmem:[#allocation41 + $0x48] sm:$0xff] }
 0xc70   : > { %4530 = vmatprep.subr.bf16.mxu1 %v3474_v6  ;;  %v3255_v6 = vpack.c.bf16 %v3243_v5, %v3242_v3  ;;  %v3539_v5 = vld [vmem:[#allocation50 + $0x10] sm:$0xff] }
 0xc72   : > { %4843 = vmatmul.mubr.bf16.vlgmr.msra.gmra.mrb[24].mxu1 %v7614_v35  ;;  %v3469_v35 = vpack.c.bf16 %v3441_v10, %v3440_v28  ;;  %v3306_v10 = vld [vmem:[#allocation44] sm:$0xff] }
 0xc73   : > { %4531 = vmatpush3.bf16.msra.mxu1 %v3466_v12  ;;  %3514 = vmatprep.mubr.bf16.mxu1 %v7618_v51  ;;  %v3442_v51 = vld [vmem:[#allocation47 + $0x40] sm:$0xff] }
 0xc74   : > { %4532 = vmatprep.subr.bf16.mxu1 %v3475_v13  ;;  %v3470_v38 = vpack.c.bf16 %v3443_v34, %v3442_v51  ;;  %v3247_v12 = vld [vmem:[#allocation41 + $0x68] sm:$0xff]  ;;  %v3322_v51 = vpack.c.bf16 %v3307_v30, %v3306_v10 }
 0xc75   : > { %v3257_v13 = vpack.c.bf16 %v3247_v12, %v3246_v11  ;;  %v3544_v12 = vld [vmem:[#allocation50 + $0x38] sm:$0xff] }
 0xc77   : > { %4533 = vmatpush3.bf16.msra.mxu1 %v3467_v19 }
 0xc78   : > { %4534 = vmatprep.subr.bf16.mxu1 %v3476_v20 }
 0xc7b   : > { %4535 = vmatpush3.bf16.msra.mxu1 %v3468_v25 }
 0xc7c   : > { %4536 = vmatprep.subr.bf16.mxu1 %v3477_v27 }
 0xc7f   : > { %4537 = vmatpush3.bf16.msra.mxu1 %v3469_v35 }
 0xc80   : > { %4538 = vmatprep.subr.bf16.mxu1 %v3478_v32 }
 0xc83   : > { %4539 = vmatpush3.bf16.msra.mxu1 %v3470_v38  ;;  %v3309_v38 = vld [vmem:[#allocation44 + $0x18] sm:$0xff] }
 0xc84   : > { %4540 = vmatprep.subr.bf16.mxu1 %v3479_v39  ;;  %v3323_v41 = vpack.c.bf16 %v3309_v38, %v3308_v37  ;;  %v4364_v38 = vld [vmem:[#allocation49] ss:$0 sm:$0xff] }
 0xc87   : > { %4541 = vmatpush3.bf16.msra.mxu1 %v3471_v44  ;;  %v3324_v44 = vpack.c.bf16 %v3311_v43, %v3310_v42 }
 0xc88   : > { %4542 = vmatprep.subr.bf16.mxu1 %v3480_v45  ;;  %v3312_v45 = vld [vmem:[#allocation44 + $0x30] sm:$0xff] }
 0xc89   : > { %v3325_v47 = vpack.c.bf16 %v3313_v46, %v3312_v45 }
 0xc8b   : > { %4543 = vmatpush3.bf16.msra.mxu1 %v3472_v50  ;;  %v3326_v50 = vpack.c.bf16 %v3315_v49, %v3314_v48  ;;  %v3706_v48 = vld [vmem:[#allocation56 + $0x8] sm:$0xff] }
 0xc8c   : > { %4544 = vmatprep.subr.bf16.mxu1 %v3481_v53  ;;  %v3316_v53 = vld [vmem:[#allocation44 + $0x50] sm:$0xff] }
 0xc8d   : > { %v3327_v4 = vpack.c.bf16 %v3317_v55, %v3316_v53 }
 0xc8f   : > { %4545 = vmatpush3.bf16.msra.mxu1 %v3473_v54  ;;  %v3318_v54 = vld [vmem:[#allocation44 + $0x60] sm:$0xff] }
 0xc90   : > { %4886 = vmatprep.subr.bf16.mxu1 %v6491_v14  ;;  %v3328_v57 = vpack.c.bf16 %v3319_v56, %v3318_v54  ;;  %v3709_v56 = vld [vmem:[#allocation56 + $0x20] sm:$0xff] }
 0xc92   : > { %3515 = vmatmul.mubr.bf16.vlgmr.msra.gmra.mrb[28].mxu1 %v7620_v52  ;;  %v3240_v52 = vld [vmem:[#allocation41 + $0x30] sm:$0xff] }
 0xc93   : > { %4902 = vmatprep.mubr.msk.bf16.mxu1 %vm6492_vm9, %v6491_v14  ;;  %v3254_v2 = vpack.c.bf16 %v3241_v1, %v3240_v52  ;;  %v3537_v1 = vld [vmem:[#allocation50] sm:$0xff] }
 0xc95   : > { %4813 = vmatpush3.bf16.msra.mxu0 %v3254_v2  ;;  %v3538_v2 = vld [vmem:[#allocation50 + $0x8] sm:$0xff] }
 0xc96   : > { %4814 = vmatprep.subr.bf16.mxu0 %v6491_v14  ;;  %v3554_v3 = vpack.c.bf16 %v3538_v2, %v3537_v1  ;;  %v3699_v1 = vld [vmem:[#allocation55 + $0x18] sm:$0xff] }
 0xc99   : > { %4815 = vmatpush3.bf16.msra.mxu0 %v3255_v6  ;;  %v3540_v6 = vld [vmem:[#allocation50 + $0x18] sm:$0xff] }
 0xc9a   : > { %4816 = vmatprep.subr.bf16.mxu0 %v6491_v14  ;;  %v3555_v7 = vpack.c.bf16 %v3540_v6, %v3539_v5  ;;  %v3615_v6 = vld [vmem:[%s7952_s7] sm:$0xff] }
 0xc9d   : > { %4817 = vmatpush3.bf16.msra.mxu0 %v3256_v9  ;;  %v3542_v9 = vld [vmem:[#allocation50 + $0x28] sm:$0xff] }
 0xc9e   : > { %4818 = vmatprep.subr.bf16.mxu0 %v6491_v14  ;;  %v3556_v11 = vpack.c.bf16 %v3542_v9, %v3541_v8  ;;  %v3617_v9 = vld [vmem:[%s7952_s7 + $0x10] sm:$0xff] }
 0xca1   : > { %4819 = vmatpush3.bf16.msra.mxu0 %v3257_v13 }
 0xca2   : > { %4820 = vmatprep.subr.bf16.mxu0 %v6491_v14 }
 0xca5   : > { %4821 = vmatpush3.bf16.msra.mxu0 %v3258_v17  ;;  %v3558_v17 = vpack.c.bf16 %v3546_v16, %v3545_v15  ;;  %v3621_v15 = vld [vmem:[%s7952_s7 + $0x30] sm:$0xff]  ;;  %v3622_v16 = vld [vmem:[%s7952_s7 + $0x38] sm:$0xff] }
 0xca6   : > { %4846 = vmatprep.subr.bf16.mxu0 %v6491_v14 }
 0xd25   : > { %v3222_v19 = vpop.f32.mrb[20].mxu1 }
 0xd26   : > { %v3223_v20 = vadd.f32 %v4362_v18, %v3222_v19  ;;  %v4804_v21 = vpop.f32.mrb[21].mxu1  ;;  %v3547_v18 = vld [vmem:[#allocation50 + $0x50] sm:$0xff]  ;;  %v3548_v19 = vld [vmem:[#allocation50 + $0x58] sm:$0xff] }
 0xd27   : > { %v3225_v22 = vpop.f32.mrb[22].mxu1  ;;  %v3549_v21 = vld [vmem:[#allocation50 + $0x60] sm:$0xff] }
 0xd28   : > { %v3228_v23 = vsub.f32 0.0, %v3223_v20  ;;  %v4805_v24 = vpop.f32.mrb[23].mxu1  ;;  %v3550_v22 = vld [vmem:[#allocation50 + $0x68] sm:$0xff] }
 0xd29   : > { %v3551_v24 = vld [vmem:[#allocation50 + $0x70] sm:$0xff] }
 0xd2a   : > { %v3229_v25 = vmul.f32 1.442695, %v3228_v23  ;;  %v3560_v23 = vpack.c.bf16 %v3550_v22, %v3549_v21  ;;  %v3625_v21 = vld [vmem:[%s7952_s7 + $0x50] sm:$0xff]  ;;  %v3626_v22 = vld [vmem:[%s7952_s7 + $0x58] sm:$0xff] }
 0xd2c   : > { %5336 = vpow2.f32 %v3229_v25  ;;  %v3552_v25 = vld [vmem:[#allocation50 + $0x78] sm:$0xff] }
 0xd36   : > { %v5337_v27 = vpop.eup %5336 }
 0xd37   : > { %v3231_v28 = vadd.f32 1.0, %v5337_v27  ;;  %v3561_v27 = vpack.c.bf16 %v3552_v25, %v3551_v24  ;;  %v3627_v24 = vld [vmem:[%s7952_s7 + $0x60] sm:$0xff]  ;;  %v3628_v25 = vld [vmem:[%s7952_s7 + $0x68] sm:$0xff] }
 0xd39   : > { %5338 = vrcp.f32 %v3231_v28  ;;  %v4363_v28 = vld [vmem:[#allocation43] ss:$0 sm:$0xff] }
 0xd43   : > { %v5339_v31 = vpop.eup %5338 }
 0xd44   : > { %v3233_v35 = vmul.f32 %v5339_v31, %v3223_v20  ;;  %v3559_v20 = vpack.c.bf16 %v3548_v19, %v3547_v18  ;;  %v3623_v18 = vld [vmem:[%s7952_s7 + $0x40] sm:$0xff]  ;;  %v3624_v19 = vld [vmem:[%s7952_s7 + $0x48] sm:$0xff] }
 0xd45   : > { %v7657_v32 = vpop.f32.mrb[24].mxu1 }
 0xd46   : > { %v3250_v34 = vpack.c.bf16 %v3233_v35, %v3233_v35  ;;  %v4844_v36 = vpop.f32.mrb[25].mxu1 }
 0xd47   : > { %v3391_v39 = vpop.f32.mrb[26].mxu1 }
 0xd48   : > { %v4845_v40 = vpop.f32.mrb[27].mxu1  ;;  %4823 = vmatmul.mubr.bf16.vlgmr.msra.gmra.mrb[16].mxu0 %v3250_v34 }
 0xd49   : > { %4847 = vmatpush3.bf16.msra.mxu0 %v3322_v51  ;;  %4862 = vmatprep.mubr.msk.bf16.mxu0 %vm6492_vm9, %v6491_v14 }
 0xd4a   : > { %4848 = vmatprep.subr.bf16.mxu0 %v6491_v14 }
 0xd4d   : > { %4849 = vmatpush3.bf16.msra.mxu0 %v3323_v41 }
 0xd4e   : > { %4850 = vmatprep.subr.bf16.mxu0 %v6491_v14 }
 0xd51   : > { %4851 = vmatpush3.bf16.msra.mxu0 %v3324_v44 }
 0xd52   : > { %4852 = vmatprep.subr.bf16.mxu0 %v6491_v14 }
 0xd55   : > { %4853 = vmatpush3.bf16.msra.mxu0 %v3325_v47  ;;  %v3705_v47 = vld [vmem:[#allocation56] sm:$0xff] }
 0xd56   : > { %4854 = vmatprep.subr.bf16.mxu0 %v6491_v14  ;;  %v3712_v53 = vpack.c.bf16 %v3706_v48, %v3705_v47  ;;  %v4366_v48 = vld [vmem:[#allocation53] ss:$0 sm:$0xff] }
 0xd59   : > { %4855 = vmatpush3.bf16.msra.mxu0 %v3326_v50 }
 0xd5a   : > { %4856 = vmatprep.subr.bf16.mxu0 %v6491_v14 }
 0xd5d   : > { %4857 = vmatpush3.bf16.msra.mxu0 %v3327_v4  ;;  %v3707_v4 = vld [vmem:[#allocation56 + $0x10] sm:$0xff] }
 0xd5e   : > { %4858 = vmatprep.subr.bf16.mxu0 %v6491_v14 }
 0xd61   : > { %4859 = vmatpush3.bf16.msra.mxu0 %v3328_v57  ;;  %v3710_v57 = vld [vmem:[#allocation56 + $0x28] sm:$0xff] }
 0xd62   : > { %4860 = vmatprep.subr.bf16.mxu0 %v6491_v14  ;;  %v3714_v59 = vpack.c.bf16 %v3710_v57, %v3709_v56 }
 0xd65   : > { %4861 = vmatpush3.bf16.msra.mxu0 %v3329_v60  ;;  %v4546_v61 = vpop.f32.mrb[28].mxu1  ;;  %v2552_v60 = vmul.f32 %v7611_v29, %v2544_v58  ;;  %v3700_v29 = vld [vmem:[#allocation55 + $0x20] sm:$0xff] }
 0xd66   : > { %v4547_v62 = vpop.f32.mrb[29].mxu1  ;;  %4866 = vmatprep.subr.bf16.mxu0 %v6491_v14 }
 0xd67   : > { %v4548_v63 = vadd.f32 %v4547_v62, %v4546_v61  ;;  %v4549_v0 = vpop.f32.mrb[30].mxu1  ;;  %v3696_v61 = vld [vmem:[#allocation55] sm:$0xff]  ;;  %v3697_v62 = vld [vmem:[#allocation55 + $0x8] sm:$0xff] }
 0xd68   : > { %4863 = vmatmul.mubr.bf16.vlgmr.msra.gmra.mrb[20].mxu0 %v7605_v26  ;;  %v4550_v52 = vpop.f32.mrb[31].mxu1  ;;  %v3543_v26 = vld [vmem:[#allocation50 + $0x30] sm:$0xff]  ;;  %v3711_v0 = vpack.c.bf16 %v2552_v60, %v2552_v60 }
 0xd69   : > { %4882 = vmatprep.mubr.msk.bf16.mxu0 %vm6492_vm9, %v6491_v14  ;;  %4867 = vmatpush3.bf16.msra.mxu0 %v3554_v3  ;;  %v3557_v13 = vpack.c.bf16 %v3544_v12, %v3543_v26  ;;  %v3698_v52 = vld [vmem:[#allocation55 + $0x10] sm:$0xff]  ;;  %v3701_v3 = vld [vmem:[#allocation55 + $0x28] sm:$0xff]  ;;  %v3619_v12 = vld [vmem:[%s7952_s7 + $0x20] sm:$0xff] }
 0xd6a   : > { %4868 = vmatprep.subr.bf16.mxu0 %v6491_v14  ;;  %v3703_v2 = vpack.c.bf16 %v3699_v1, %v3698_v52  ;;  %v3704_v5 = vpack.c.bf16 %v3701_v3, %v3700_v29 }
 0xd6d   : > { %4869 = vmatpush3.bf16.msra.mxu0 %v3555_v7  ;;  %v3616_v7 = vld [vmem:[%s7952_s7 + $0x8] sm:$0xff] }
 0xd6e   : > { %4870 = vmatprep.subr.bf16.mxu0 %v6491_v14  ;;  %v3632_v8 = vpack.c.bf16 %v3616_v7, %v3615_v6 }
 0xd70   : > { %4887 = vmatpush3.bf16.msra.mxu1 %v3632_v8 }
 0xd71   : > { %4871 = vmatpush3.bf16.msra.mxu0 %v3556_v11  ;;  %4888 = vmatprep.subr.bf16.mxu1 %v6491_v14  ;;  %v3618_v11 = vld [vmem:[%s7952_s7 + $0x18] sm:$0xff] }
 0xd72   : > { %4872 = vmatprep.subr.bf16.mxu0 %v6491_v14  ;;  %v3633_v26 = vpack.c.bf16 %v3618_v11, %v3617_v9 }
 0xd74   : > { %4889 = vmatpush3.bf16.msra.mxu1 %v3633_v26 }
 0xd75   : > { %4873 = vmatpush3.bf16.msra.mxu0 %v3557_v13  ;;  %4890 = vmatprep.subr.bf16.mxu1 %v6491_v14 }
 0xd76   : > { %4874 = vmatprep.subr.bf16.mxu0 %v6491_v14 }
 0xd79   : > { %4875 = vmatpush3.bf16.msra.mxu0 %v3558_v17  ;;  %v3635_v17 = vpack.c.bf16 %v3622_v16, %v3621_v15 }
 0xd7a   : > { %4876 = vmatprep.subr.bf16.mxu0 %v6491_v14 }
 0xd7d   : > { %4877 = vmatpush3.bf16.msra.mxu0 %v3559_v20  ;;  %v3636_v20 = vpack.c.bf16 %v3624_v19, %v3623_v18 }
 0xd7e   : > { %4878 = vmatprep.subr.bf16.mxu0 %v6491_v14 }
 0xd81   : > { %4879 = vmatpush3.bf16.msra.mxu0 %v3560_v23  ;;  %v3637_v23 = vpack.c.bf16 %v3626_v22, %v3625_v21 }
 0xd82   : > { %4880 = vmatprep.subr.bf16.mxu0 %v6491_v14 }
 0xd85   : > { %4881 = vmatpush3.bf16.msra.mxu0 %v3561_v27  ;;  %v3638_v27 = vpack.c.bf16 %v3628_v25, %v3627_v24 }
 0xd86   : > { %4906 = vmatprep.subr.bf16.mxu0 %v6491_v14 }
 0xe1b   : > { %v3300_v10 = vpop.f32.mrb[16].mxu0 }
 0xe1c   : > { %v3301_v30 = vadd.f32 %v4363_v28, %v3300_v10  ;;  %v4824_v31 = vpop.f32.mrb[17].mxu0  ;;  %v3629_v28 = vld [vmem:[%s7952_s7 + $0x70] sm:$0xff]  ;;  %v3630_v10 = vld [vmem:[%s7952_s7 + $0x78] sm:$0xff] }
 0xe1d   : > { %v3303_v35 = vpop.f32.mrb[18].mxu0  ;;  %v4365_v31 = vld [vmem:[#allocation52] ss:$0 sm:$0xff] }
 0xe1e   : > { %3799 = vst [vmem:[#allocation59] sm:$0xff] %v3301_v30  ;;  %v4825_v51 = vpop.f32.mrb[19].mxu0  ;;  %v3639_v30 = vpack.c.bf16 %v3630_v10, %v3629_v28 }
 0xe3b   : > { %v3428_v34 = vpop.f32.mrb[20].mxu0 }
 0xe3c   : > { %v3429_v36 = vadd.f32 %v3428_v34, %v7657_v32  ;;  %v4864_v37 = vpop.f32.mrb[21].mxu0  ;;  %v3708_v32 = vld [vmem:[#allocation56 + $0x18] sm:$0xff] }
 0xe3d   : > { %v3431_v39 = vpop.f32.mrb[22].mxu0  ;;  %v3713_v54 = vpack.c.bf16 %v3708_v32, %v3707_v4 }
 0xe3e   : > { %v3522_v40 = vadd.f32 %v4548_v63, %v3429_v36  ;;  %v4865_v41 = vpop.f32.mrb[23].mxu0  ;;  %v3702_v63 = vpack.c.bf16 %v3697_v62, %v3696_v61 }
 0xe40   : > { %v3530_v42 = vadd.f32 %v4364_v38, %v3522_v40 }
 0xe42   : > { %v3531_v43 = vsub.f32 0.0, %v3530_v42 }
 0xe44   : > { %v3532_v44 = vmul.f32 1.442695, %v3531_v43 }
 0xe46   : > { %5340 = vpow2.f32 %v3532_v44 }
 0xe50   : > { %v5341_v45 = vpop.eup %5340 }
 0xe51   : > { %v3534_v46 = vadd.f32 1.0, %v5341_v45 }
 0xe53   : > { %5342 = vrcp.f32 %v3534_v46 }
 0xe5d   : > { %v5343_v49 = vpop.eup %5342 }
 0xe5e   : > { %v3536_v50 = vmul.f32 %v5343_v49, %v3530_v42 }
 0xe60   : > { %v3553_v55 = vpack.c.bf16 %v3536_v50, %v3536_v50 }
 0xe62   : > { %4883 = vmatmul.mubr.bf16.vlgmr.msra.gmra.mrb[24].mxu0 %v3553_v55 }
 0xe63   : > { %4907 = vmatpush3.bf16.msra.mxu0 %v3712_v53  ;;  %4912 = vmatprep.mubr.msk.bf16.mxu0 %vm6492_vm9, %v6491_v14 }
 0xe64   : > { %4908 = vmatprep.subr.bf16.mxu0 %v6491_v14 }
 0xe67   : > { %4909 = vmatpush3.bf16.msra.mxu0 %v3713_v54 }
 0xe68   : > { %4910 = vmatprep.subr.bf16.mxu0 %v6491_v14 }
 0xe6b   : > { %4911 = vmatpush3.bf16.msra.mxu0 %v3714_v59 }
 0xe6c   : > { %4916 = vmatprep.subr.bf16.mxu0 %v6491_v14 }
 0xe6e   : > { %4913 = vmatmul.mubr.msk.bf16.vlgmr.msra.gmra.mrb[28].mxu0 %vm2358_vm4, %v3711_v0 }
 0xe6f   : > { %4917 = vmatpush3.bf16.msra.mxu0 %v3702_v63  ;;  %4922 = vmatprep.mubr.msk.bf16.mxu0 %vm6492_vm9, %v6491_v14 }
 0xe70   : > { %4918 = vmatprep.subr.bf16.mxu0 %v6491_v14 }
 0xe73   : > { %4919 = vmatpush3.bf16.msra.mxu0 %v3703_v2 }
 0xe74   : > { %4920 = vmatprep.subr.bf16.mxu0 %v6491_v14 }
 0xe77   : > { %4921 = vmatpush3.bf16.msra.mxu0 %v3704_v5 }
 0xe7a   : > { %4923 = vmatmul.mubr.msk.bf16.vlgmr.msra.gmra.mrb[28].mxu0 %vm2358_vm4, %v7558_v33  ;;  %v3620_v33 = vld [vmem:[%s7952_s7 + $0x28] sm:$0xff] }
 0xe7b   : > { %v3634_v13 = vpack.c.bf16 %v3620_v33, %v3619_v12 }
 0xe7d   : > { %4891 = vmatpush3.bf16.msra.mxu1 %v3634_v13 }
 0xe7e   : > { %4892 = vmatprep.subr.bf16.mxu1 %v6491_v14 }
 0xe81   : > { %4893 = vmatpush3.bf16.msra.mxu1 %v3635_v17 }
 0xe82   : > { %4894 = vmatprep.subr.bf16.mxu1 %v6491_v14 }
 0xe85   : > { %4895 = vmatpush3.bf16.msra.mxu1 %v3636_v20 }
 0xe86   : > { %4896 = vmatprep.subr.bf16.mxu1 %v6491_v14 }
 0xe89   : > { %4897 = vmatpush3.bf16.msra.mxu1 %v3637_v23 }
 0xe8a   : > { %4898 = vmatprep.subr.bf16.mxu1 %v6491_v14 }
 0xe8d   : > { %4899 = vmatpush3.bf16.msra.mxu1 %v3638_v27 }
 0xe8e   : > { %4900 = vmatprep.subr.bf16.mxu1 %v6491_v14 }
 0xe91   : > { %4901 = vmatpush3.bf16.msra.mxu1 %v3639_v30 }
 0xf35   : > { %v3603_v35 = vpop.f32.mrb[24].mxu0 }
 0xf36   : > { %v3604_v51 = vadd.f32 %v4365_v31, %v3603_v35  ;;  %v4884_v34 = vpop.f32.mrb[25].mxu0 }
 0xf37   : > { %v3606_v36 = vpop.f32.mrb[26].mxu0 }
 0xf38   : > { %v3609_v37 = vsub.f32 0.0, %v3604_v51  ;;  %v4885_v38 = vpop.f32.mrb[27].mxu0 }
 0xf3a   : > { %v3610_v39 = vmul.f32 1.442695, %v3609_v37 }
 0xf3c   : > { %5344 = vpow2.f32 %v3610_v39 }
 0xf46   : > { %v5345_v40 = vpop.eup %5344 }
 0xf47   : > { %v3612_v41 = vadd.f32 1.0, %v5345_v40 }
 0xf49   : > { %5346 = vrcp.f32 %v3612_v41 }
 0xf4d   : > { %v3792_v42 = vpop.f32.mrb[28].mxu0 }
 0xf4e   : > { %v4924_v43 = vpop.f32.mrb[29].mxu0 }
 0xf4f   : > { %v3795_v44 = vpop.f32.mrb[30].mxu0 }
 0xf50   : > { %v4925_v14 = vpop.f32.mrb[31].mxu0 }
 0xf53   : > { %v5347_v45 = vpop.eup %5346 }
 0xf54   : > { %v3614_v46 = vmul.f32 %v5347_v45, %v3604_v51 }
 0xf56   : > { %v3631_v47 = vpack.c.bf16 %v3614_v46, %v3614_v46 }
 0xf58   : > { %4903 = vmatmul.mubr.bf16.vlgmr.msra.gmra.mrb[32].mxu1 %v3631_v47 }
0x102b   : > { %v3681_v49 = vpop.f32.mrb[32].mxu1 }
0x102c   : > { %v3682_v50 = vadd.f32 %v4366_v48, %v3681_v49  ;;  %v4904_v53 = vpop.f32.mrb[33].mxu1 }
0x102d   : > { %v3684_v55 = vpop.f32.mrb[34].mxu1 }
0x102e   : > { %3691 = vrot.lane.b32.xlu1 %v3682_v50, %s6493_s19  ;;  %3688 = vrot.lane.b32.xlu0 %v3682_v50, %s6494_s13  ;;  %v4905_v4 = vpop.f32.mrb[35].mxu1 }
0x10a0   : > { %v3692_v32 = vpop.permute.xlu1 %3691  ;;  %v3689_v54 = vpop.permute.xlu0 %3688 }
0x10a1   : > { %v3694_v56 = vsel %vm2334_vm7, %v3682_v50, %v3689_v54 }
0x10a2   : > { %v3695_v57 = vsel %vm2336_vm8, %v3694_v56, %v3692_v32 }
0x10a3   : > { %v3798_v58 = vmul.f32 %v3792_v42, %v3695_v57 }
0x10a5   : > { %3800 = vst.msk [vmem:[#allocation59 + $0x8] sm:$0xff] %vm2358_vm4, %v3798_v58 }
0x10a6 PF: > { %p5141_p7 = scmp.eq.s32.totalorder %s6759_s10, 7  ;;  %s6495_s8 = smov [#allocation59]  }
0x10a7   : > { %s3808_s23 = sshll.u32 %s6495_s8, 4  ;;  %s3809_s23 = int_to_ptr.vmem [resolvable:$true] %s3808_s23 }
0x10a8   : > { %s6220_s6 = scalar_lea.vmem %s3809_s23, 256  ;;  %p6227_p8 = scmp.lt.s32.totalorder %s3809_s23, %s3809_s23 }
0x10a9   : > { %p6221_p10 = scmp.ne.s32.totalorder %s3809_s23, %s6220_s6  ;;  %p6228_p11 = scmp.lt.s32.totalorder %s6220_s6, %s6220_s6 }
0x10ab   : > { %p6222_p2 = pnand %p6221_p10, %p5141_p7  ;;  %p6229_p12 = por %p6228_p11, %p6227_p8 }
0x10ad   : > { %p6223_p9 = pneg %p6222_p2 }
0x10af   : > { %p6230_p1 = pnand %p6229_p12, %p6223_p9 }
0x10b1   : > { %6233 = shalt.err (!%p6230_p1)
}
0x10b2   : > { %s7953_s22 = sld [smem:[#allocation118_spill]] }
0x10b8   : > { %s7954_s15 = smov %s7953_s22  ;;  %s6234_s9 = scalar_lea.hbm %s7953_s22, 256 }
0x10b9   : > { %p6235_p3 = scmp.ne.s32.totalorder %s7954_s15, %s6234_s9  ;;  %p6240_p6 = scmp.lt.u32.totalorder %s6234_s9, %s7954_s15 }
0x10bb   : > { %p6236_p5 = pnand %p6235_p3, %p5141_p7 }
0x10bd   : > { %p6237_p0 = pneg %p6236_p5 }
0x10bf   : > { %p6242_p13 = pnand %p6240_p6, %p6237_p0 }
0x10c1   : > { %6245 = shalt.err (!%p6242_p13)
}
0x10c2   : > { %5069 = dma.vmem_to_hbm [thread:$0]  (%p5141_p7), %s3809_s23, 256, %s7954_s15, [#allocation10]  }
0x10c3   : > { %6361 = dma.done.wait (%p5141_p7), [#allocation10], 256  }
0x10c4   : > { %6363 = vsyncadd (%p5141_p7), [#allocation10], 4294967040 }
0x10c5 PF: > { %s119_s2 = sadd.s32 1, %s6394_s2   ;;  %s7955_s4 = sld [smem:[#allocation122_spill]] }
0x10c6   : > { %p116_p4 = scmp.ge.s32.totalorder %s119_s2, 10   ;;  %s7956_s22 = sld [smem:[#allocation119_spill]] }
0x10c7   : > { %s7957_s3 = sld [smem:[#allocation120_spill]]  ;;  %s7958_s1 = sld [smem:[#allocation121_spill]] }
0x10c8   : > { %s7959_s0 = smov %s6370_s5  ;;  %s7960_s5 = smov %s6374_s28 }
0x10c9   : > { %s7962_s18 = smov %s6386_s26  ;;  %118 = sbr.rel (!%p116_p4) target bundleno = 113 (0x71), region = 449 }
0x10cb   : > { %s7961_s28 = smov %s7955_s4 }
0x10cd   : > { %s7963_s26 = smov %s7957_s3 }
0x10d0   :  { %3821 = vsyncpa [#allocation9], 1 }
0x10d1   :  { %3823 = vsyncpa [#allocation9 + $0x1], 1 }
0x10d2   :  { %3824 = vsyncpa [#allocation12], 1 }
0x10d3   :  { %3826 = vsyncpa [#allocation12 + $0x1], 1 }
0x10d4   :  { %3827 = vsyncpa [#allocation15], 1 }
0x10d5   :  { %3828 = vsyncpa [#allocation18], 1 }
0x10d6   :  { %3829 = vsyncpa [#allocation21], 1 }
0x10d7   :  { %3830 = vsyncpa [#allocation24], 1 }
0x10d8   :  { %3831 = vsyncpa [#allocation27], 1 }
0x10d9   :  { %3832 = vsyncpa [#allocation30], 1 }
0x10da   :  { %3833 = vsyncpa [#allocation33], 1 }
0x10db   :  { %3834 = vsyncpa [#allocation36], 1 }
0x10dc   :  { %3835 = vsyncpa [#allocation39], 1 }
0x10dd   :  { %3836 = vsyncpa [#allocation42], 1 }
0x10de   :  { %3837 = vsyncpa [#allocation45], 1 }
0x10df   :  { %3838 = vsyncpa [#allocation48], 1 }
0x10e0   :  { %3839 = vsyncpa [#allocation51], 1 }
0x10e1   :  { %3840 = vsyncpa [#allocation54], 1 }
0x10e2   :  { %3841 = vsyncpa [#allocation57], 1 }
0x10e3   :  { %3842 = vsyncpa [#allocation10], 1 }
0x10e4   :  { %3844 = vsyncpa [#allocation10 + $0x1], 1 }

</bundles_post_ra>
